<compile_context>
chip_gen: v6e
topology: v6e:2x2x1
jax: 0.10.0
libtpu: 0.0.40
codegen_flags: <defaults>
</compile_context>

<pallas_src>
import functools
import math

import jax
import jax.numpy as jnp
from jax.experimental import pallas as pl
from jax.experimental.pallas import tpu as pltpu

# Whole-array operand resident in VMEM (weights are tiny -> no tiling needed).
VMEM = pl.BlockSpec(memory_space=pltpu.MemorySpace.VMEM)

_N_LAYER_PARAMS = 16  # arrays per encoder layer in the flat argument list


# ------------------------------ fused kernel -------------------------------

def _forward_kernel(*refs, num_layers, num_heads, batch, seq):
    """Fused TransformerBrain forward for the whole batch (single invocation).

    refs = (x_ref,
            emb_w, emb_b, norm_g, norm_b,
            [q_w3, q_b3, k_w3, k_b3, v_w3, v_b3,      # (H,D,dh)/(H,1,dh), Q pre-scaled
             op_w3, op_b,                             # (H,dh,D), (1,D)
             lin1_w, lin1_b, lin2_w, lin2_b,
             norm1_g, norm1_b, norm2_g, norm2_b] * num_layers,
            fc_w, fc_b, out_w, out_b,
            o_ref)
    """
    x_ref = refs[0]
    o_ref = refs[-1]
    w = refs[1:-1]
    emb_w, emb_b, norm_g, norm_b = w[0:4]
    tail = 4 + _N_LAYER_PARAMS * num_layers
    fc_w, fc_b, out_w, out_b = w[tail:tail + 4]

    B, S, H = batch, seq, num_heads
    R = B * S
    BH = B * H

    def dense(h, w_ref, b_ref, relu=False):
        y = jnp.dot(h, w_ref[...], preferred_element_type=jnp.float32)
        y = y + b_ref[...]
        if relu:
            y = jnp.maximum(y, 0.0)
        return y

    def layer_norm(h, g_ref, b_ref):
        mean = jnp.mean(h, axis=-1, keepdims=True)
        hc = h - mean
        var = jnp.mean(hc * hc, axis=-1, keepdims=True)
        inv = jax.lax.rsqrt(var + 1e-5)            # PyTorch LayerNorm default eps
        return hc * inv * g_ref[...] + b_ref[...]

    x = x_ref[...]                                 # (R, Din) = (B*S, Din)

    # Input embedding + LayerNorm.
    h = layer_norm(dense(x, emb_w, emb_b), norm_g, norm_b)     # (R, D)
    D = h.shape[-1]
    dh = D // H

    # Batched-matmul dimension numbers (leading batch axis on both operands).
    bdims = (((2,), (1,)), ((0,), (0,)))           # (b,m,k)x(b,k,n)->(b,m,n)
    sdims = (((2,), (2,)), ((0,), (0,)))           # (b,q,d)x(b,k,d)->(b,q,k)  (no .T)

    for li in range(num_layers):                   # static unroll (trace time)
        base = 4 + _N_LAYER_PARAMS * li
        (qw, qb, kw, kb, vw, vb, opw, opb,
         l1_w, l1_b, l2_w, l2_b,
         n1_g, n1_b, n2_g, n2_b) = w[base:base + _N_LAYER_PARAMS]

        # ---- self-attention block (post-norm), heads batched over (B*H) ----
        h3 = h.reshape(B, S, D)
        hb = jnp.broadcast_to(h3[:, None], (B, H, S, D)).reshape(BH, S, D)

        def head_proj(w_ref, b_ref):
            wb = jnp.broadcast_to(w_ref[...][None], (B, H, D, dh)).reshape(BH, D, dh)
            bb = jnp.broadcast_to(b_ref[...][None], (B, H, 1, dh)).reshape(BH, 1, dh)
            return jax.lax.dot_general(hb, wb, bdims,
                                       preferred_element_type=jnp.float32) + bb

        q = head_proj(qw, qb)                      # (BH, S, dh); 1/sqrt(dh) folded in
        k = head_proj(kw, kb)
        v = head_proj(vw, vb)

        s = jax.lax.dot_general(q, k, sdims,
                                preferred_element_type=jnp.float32)     # (BH, S, S)
        m = jnp.max(s, axis=-1, keepdims=True)
        p = jnp.exp(s - m)
        p = p * pl.reciprocal(jnp.sum(p, axis=-1, keepdims=True), approx=True)
        a = jax.lax.dot_general(p, v, bdims,
                                preferred_element_type=jnp.float32)     # (BH, S, dh)

        # Out-projection without re-concatenating heads: per-head row-block of the
        # projection weight (H, dh, D), batched matmul, then sum over heads.
        ow = jnp.broadcast_to(opw[...][None], (B, H, dh, D)).reshape(BH, dh, D)
        sa = jax.lax.dot_general(a, ow, bdims,
                                 preferred_element_type=jnp.float32)    # (BH, S, D)
        sa = jnp.sum(sa.reshape(B, H, S, D), axis=1).reshape(R, D) + opb[...]

        h = layer_norm(h + sa, n1_g, n1_b)         # fused residual + LN1

        # ---- feed-forward block (post-norm), fused lin1 + ReLU + lin2 ----
        ff = dense(dense(h, l1_w, l1_b, relu=True), l2_w, l2_b)
        h = layer_norm(h + ff, n2_g, n2_b)         # fused residual + LN2

    # Output head: fc -> ReLU -> output.
    y = dense(h, fc_w, fc_b, relu=True)
    y = dense(y, out_w, out_b)                     # (R, Din)
    o_ref[...] = y


# ------------------------------ host wrapper --------------------------------

def _flatten_params(params, num_layers, num_heads):
    """Flatten params into kernel layout: per-head Q/K/V stacks, pre-scaled Q."""
    D = params["emb_w"].shape[1]
    H = num_heads
    dh = D // H
    scale = 1.0 / math.sqrt(dh)

    def split_heads_w(wmat):                       # (D, D) cols per head -> (H, D, dh)
        return jnp.transpose(wmat.reshape(D, H, dh), (1, 0, 2))

    def split_heads_b(bvec):                       # (1, D) -> (H, 1, dh)
        return bvec.reshape(H, dh)[:, None, :]

    flat = [params["emb_w"], params["emb_b"], params["norm_g"], params["norm_b"]]
    for i in range(num_layers):
        lp = params["layers"][i]
        in_w, in_b = lp["in_proj_w"], lp["in_proj_b"]        # (D, 3D), (1, 3D)
        qw, kw, vw = in_w[:, :D], in_w[:, D:2 * D], in_w[:, 2 * D:]
        qb, kb, vb = in_b[:, :D], in_b[:, D:2 * D], in_b[:, 2 * D:]
        flat += [split_heads_w(qw * scale), split_heads_b(qb * scale),
                 split_heads_w(kw), split_heads_b(kb),
                 split_heads_w(vw), split_heads_b(vb),
                 lp["out_proj_w"].reshape(H, dh, D), lp["out_proj_b"],
                 lp["lin1_w"], lp["lin1_b"],
                 lp["lin2_w"], lp["lin2_b"],
                 lp["norm1_g"], lp["norm1_b"],
                 lp["norm2_g"], lp["norm2_b"]]
    flat += [params["fc_w"], params["fc_b"], params["out_w"], params["out_b"]]
    return flat


def _cost_estimate(R, S, Din, D, num_layers, num_heads, flat):
    # Rough advisory numbers (matmul flops dominate).
    dh = D // num_heads
    attn = 3 * 2 * R * D * dh * num_heads + 2 * 2 * num_heads * R * S * dh \
           + 2 * R * dh * D * num_heads
    ffn = 2 * 2 * R * D * (4 * D)
    flops = 2 * R * Din * D + num_layers * (attn + ffn) \
            + 2 * R * D * D + 2 * R * D * Din
    transc = num_layers * num_heads * R * S + R * (2 * num_layers + 1)
    weight_bytes = sum(int(a.size) * a.dtype.itemsize for a in flat)
    bytes_accessed = 2 * 4 * R * Din + weight_bytes
    return pl.CostEstimate(flops=int(flops), transcendentals=int(transc),
                           bytes_accessed=int(bytes_accessed))


def transformer_brain_forward(x, params, *, num_layers, num_heads):
    S, B, Din = x.shape
    D = params["emb_w"].shape[1]
    R = B * S
    # NOTE: at production shapes, accept batch-first input to avoid this transpose
    # (separate XLA op + HBM round trip); negligible at (8, 2, 16).
    xr = jnp.transpose(x, (1, 0, 2)).reshape(R, Din)         # (B*S, Din)
    flat = _flatten_params(params, num_layers, num_heads)
    kern = functools.partial(_forward_kernel, num_layers=num_layers,
                             num_heads=num_heads, batch=B, seq=S)
    out = pl.pallas_call(
        kern,
        out_shape=jax.ShapeDtypeStruct((R, Din), jnp.float32),
        in_specs=[VMEM] * (1 + len(flat)),
        out_specs=VMEM,
        compiler_params=pltpu.CompilerParams(
            vmem_limit_bytes=32 * 1024 * 1024),
        cost_estimate=_cost_estimate(R, S, Din, D, num_layers, num_heads, flat),
    )(xr, *flat)
    return jnp.transpose(out.reshape(B, S, Din), (1, 0, 2))  # back to (S, B, Din)


# ------------------------------ params init --------------------------------

def init_params(key, input_size, hidden_size, num_layers, num_heads):
    """Arrays only (safe to pass through jit); static config stays in Python."""
    def lin(k, din, dout, scale=0.05):
        kw, kb = jax.random.split(k)
        w = jax.random.normal(kw, (din, dout), jnp.float32) * scale
        b = jax.random.normal(kb, (1, dout), jnp.float32) * scale
        return w, b

    keys = jax.random.split(key, 4 + num_layers)
    p = {}
    p["emb_w"], p["emb_b"] = lin(keys[0], input_size, hidden_size)
    p["fc_w"], p["fc_b"] = lin(keys[1], hidden_size, hidden_size)
    p["out_w"], p["out_b"] = lin(keys[2], hidden_size, input_size)
    p["norm_g"] = jnp.ones((1, hidden_size), jnp.float32)
    p["norm_b"] = jnp.zeros((1, hidden_size), jnp.float32)
    layers = []
    for i in range(num_layers):
        lk = jax.random.split(keys[4 + i], 4)
        lp = {}
        lp["in_proj_w"], lp["in_proj_b"] = lin(lk[0], hidden_size, 3 * hidden_size)
        lp["out_proj_w"], lp["out_proj_b"] = lin(lk[1], hidden_size, hidden_size)
        lp["lin1_w"], lp["lin1_b"] = lin(lk[2], hidden_size, 4 * hidden_size)
        lp["lin2_w"], lp["lin2_b"] = lin(lk[3], 4 * hidden_size, hidden_size)
        lp["norm1_g"] = jnp.ones((1, hidden_size), jnp.float32)
        lp["norm1_b"] = jnp.zeros((1, hidden_size), jnp.float32)
        lp["norm2_g"] = jnp.ones((1, hidden_size), jnp.float32)
        lp["norm2_b"] = jnp.zeros((1, hidden_size), jnp.float32)
        layers.append(lp)
    p["layers"] = layers
    return p


# --------------------------------- main -------------------------------------

if __name__ == "__main__":
    input_size, hidden_size, num_layers, num_heads = 16, 32, 2, 4
    seq, batch = 8, 2

    key = jax.random.PRNGKey(0)
    kx, kp = jax.random.split(key)
    x = jax.random.normal(kx, (seq, batch, input_size), jnp.float32)
    params = init_params(kp, input_size, hidden_size, num_layers, num_heads)

    fwd = jax.jit(functools.partial(transformer_brain_forward,
                                    num_layers=num_layers, num_heads=num_heads))
    out = fwd(x, params)
    out = jax.block_until_ready(out)

    assert out.shape == (seq, batch, input_size)
    assert bool(jnp.all(jnp.isfinite(out)))
    print("KERNEL_OK")
</pallas_src>

<mosaic_0001>
module attributes {stable_mosaic.version = 11 : i64} {
  func.func @_forward_kernel(%arg0: memref<16x16xf32, #tpu.memory_space<vmem>>, %arg1: memref<16x32xf32, #tpu.memory_space<vmem>>, %arg2: memref<1x32xf32, #tpu.memory_space<vmem>>, %arg3: memref<1x32xf32, #tpu.memory_space<vmem>>, %arg4: memref<1x32xf32, #tpu.memory_space<vmem>>, %arg5: memref<4x32x8xf32, #tpu.memory_space<vmem>>, %arg6: memref<4x1x8xf32, #tpu.memory_space<vmem>>, %arg7: memref<4x32x8xf32, #tpu.memory_space<vmem>>, %arg8: memref<4x1x8xf32, #tpu.memory_space<vmem>>, %arg9: memref<4x32x8xf32, #tpu.memory_space<vmem>>, %arg10: memref<4x1x8xf32, #tpu.memory_space<vmem>>, %arg11: memref<4x8x32xf32, #tpu.memory_space<vmem>>, %arg12: memref<1x32xf32, #tpu.memory_space<vmem>>, %arg13: memref<32x128xf32, #tpu.memory_space<vmem>>, %arg14: memref<1x128xf32, #tpu.memory_space<vmem>>, %arg15: memref<128x32xf32, #tpu.memory_space<vmem>>, %arg16: memref<1x32xf32, #tpu.memory_space<vmem>>, %arg17: memref<1x32xf32, #tpu.memory_space<vmem>>, %arg18: memref<1x32xf32, #tpu.memory_space<vmem>>, %arg19: memref<1x32xf32, #tpu.memory_space<vmem>>, %arg20: memref<1x32xf32, #tpu.memory_space<vmem>>, %arg21: memref<4x32x8xf32, #tpu.memory_space<vmem>>, %arg22: memref<4x1x8xf32, #tpu.memory_space<vmem>>, %arg23: memref<4x32x8xf32, #tpu.memory_space<vmem>>, %arg24: memref<4x1x8xf32, #tpu.memory_space<vmem>>, %arg25: memref<4x32x8xf32, #tpu.memory_space<vmem>>, %arg26: memref<4x1x8xf32, #tpu.memory_space<vmem>>, %arg27: memref<4x8x32xf32, #tpu.memory_space<vmem>>, %arg28: memref<1x32xf32, #tpu.memory_space<vmem>>, %arg29: memref<32x128xf32, #tpu.memory_space<vmem>>, %arg30: memref<1x128xf32, #tpu.memory_space<vmem>>, %arg31: memref<128x32xf32, #tpu.memory_space<vmem>>, %arg32: memref<1x32xf32, #tpu.memory_space<vmem>>, %arg33: memref<1x32xf32, #tpu.memory_space<vmem>>, %arg34: memref<1x32xf32, #tpu.memory_space<vmem>>, %arg35: memref<1x32xf32, #tpu.memory_space<vmem>>, %arg36: memref<1x32xf32, #tpu.memory_space<vmem>>, %arg37: memref<32x32xf32, #tpu.memory_space<vmem>>, %arg38: memref<1x32xf32, #tpu.memory_space<vmem>>, %arg39: memref<32x16xf32, #tpu.memory_space<vmem>>, %arg40: memref<1x16xf32, #tpu.memory_space<vmem>>, %arg41: memref<16x16xf32, #tpu.memory_space<vmem>>) attributes {dimension_semantics = [], scalar_prefetch = 0 : i64, scratch_operands = 0 : i64, tpu.core_type = #tpu.core_type<tc>} {
    %c0 = arith.constant 0 : index
    %c0_0 = arith.constant 0 : index
    %0 = vector.load %arg0[%c0, %c0_0] : memref<16x16xf32, #tpu.memory_space<vmem>>, vector<16x16xf32>
    %c0_1 = arith.constant 0 : index
    %c0_2 = arith.constant 0 : index
    %1 = vector.load %arg1[%c0_1, %c0_2] : memref<16x32xf32, #tpu.memory_space<vmem>>, vector<16x32xf32>
    %cst = arith.constant dense<0.000000e+00> : vector<16x32xf32>
    %2 = tpu.matmul %0, %1, %cst {dimension_numbers = #tpu.dot_dimension_numbers<[1], [0], [0], [1], [0, 0, 1, 1], [], []>} : vector<16x16xf32>, vector<16x32xf32>, vector<16x32xf32> -> vector<16x32xf32>
    %c0_3 = arith.constant 0 : index
    %c0_4 = arith.constant 0 : index
    %3 = vector.load %arg2[%c0_3, %c0_4] : memref<1x32xf32, #tpu.memory_space<vmem>>, vector<1x32xf32>
    %4 = vector.broadcast %3 : vector<1x32xf32> to vector<16x32xf32>
    %5 = arith.addf %2, %4 : vector<16x32xf32>
    %cst_5 = arith.constant dense<0.000000e+00> : vector<16xf32>
    %6 = vector.multi_reduction <add>, %5, %cst_5 [1] : vector<16x32xf32> to vector<16xf32>
    %7 = vector.shape_cast %6 : vector<16xf32> to vector<16x1xf32>
    %cst_6 = arith.constant 3.200000e+01 : f32
    %8 = vector.broadcast %cst_6 : f32 to vector<16x1xf32>
    %9 = arith.divf %7, %8 : vector<16x1xf32>
    %10 = vector.broadcast %9 : vector<16x1xf32> to vector<16x32xf32>
    %11 = arith.subf %5, %10 : vector<16x32xf32>
    %12 = arith.mulf %11, %11 : vector<16x32xf32>
    %cst_7 = arith.constant dense<0.000000e+00> : vector<16xf32>
    %13 = vector.multi_reduction <add>, %12, %cst_7 [1] : vector<16x32xf32> to vector<16xf32>
    %14 = vector.shape_cast %13 : vector<16xf32> to vector<16x1xf32>
    %cst_8 = arith.constant 3.200000e+01 : f32
    %15 = vector.broadcast %cst_8 : f32 to vector<16x1xf32>
    %16 = arith.divf %14, %15 : vector<16x1xf32>
    %cst_9 = arith.constant 9.99999974E-6 : f32
    %17 = vector.broadcast %cst_9 : f32 to vector<16x1xf32>
    %18 = arith.addf %16, %17 : vector<16x1xf32>
    %19 = math.rsqrt %18 : vector<16x1xf32>
    %20 = vector.broadcast %19 : vector<16x1xf32> to vector<16x32xf32>
    %21 = arith.mulf %11, %20 : vector<16x32xf32>
    %c0_10 = arith.constant 0 : index
    %c0_11 = arith.constant 0 : index
    %22 = vector.load %arg3[%c0_10, %c0_11] : memref<1x32xf32, #tpu.memory_space<vmem>>, vector<1x32xf32>
    %23 = vector.broadcast %22 : vector<1x32xf32> to vector<16x32xf32>
    %24 = arith.mulf %21, %23 : vector<16x32xf32>
    %c0_12 = arith.constant 0 : index
    %c0_13 = arith.constant 0 : index
    %25 = vector.load %arg4[%c0_12, %c0_13] : memref<1x32xf32, #tpu.memory_space<vmem>>, vector<1x32xf32>
    %26 = vector.broadcast %25 : vector<1x32xf32> to vector<16x32xf32>
    %27 = arith.addf %24, %26 : vector<16x32xf32>
    %28 = vector.shape_cast %27 : vector<16x32xf32> to vector<2x8x32xf32>
    %29 = vector.shape_cast %28 : vector<2x8x32xf32> to vector<2x1x8x32xf32>
    %30 = vector.shape_cast %29 : vector<2x1x8x32xf32> to vector<2x1x8x32xf32>
    %31 = vector.broadcast %30 : vector<2x1x8x32xf32> to vector<2x4x8x32xf32>
    %32 = vector.shape_cast %31 : vector<2x4x8x32xf32> to vector<8x8x32xf32>
    %c0_14 = arith.constant 0 : index
    %c0_15 = arith.constant 0 : index
    %c0_16 = arith.constant 0 : index
    %33 = vector.load %arg5[%c0_14, %c0_15, %c0_16] : memref<4x32x8xf32, #tpu.memory_space<vmem>>, vector<4x32x8xf32>
    %34 = vector.shape_cast %33 : vector<4x32x8xf32> to vector<1x4x32x8xf32>
    %35 = vector.shape_cast %34 : vector<1x4x32x8xf32> to vector<1x4x32x8xf32>
    %36 = vector.broadcast %35 : vector<1x4x32x8xf32> to vector<2x4x32x8xf32>
    %37 = vector.shape_cast %36 : vector<2x4x32x8xf32> to vector<8x32x8xf32>
    %c0_17 = arith.constant 0 : index
    %c0_18 = arith.constant 0 : index
    %c0_19 = arith.constant 0 : index
    %38 = vector.load %arg6[%c0_17, %c0_18, %c0_19] : memref<4x1x8xf32, #tpu.memory_space<vmem>>, vector<4x1x8xf32>
    %39 = vector.shape_cast %38 : vector<4x1x8xf32> to vector<1x4x1x8xf32>
    %40 = vector.shape_cast %39 : vector<1x4x1x8xf32> to vector<1x4x1x8xf32>
    %41 = vector.broadcast %40 : vector<1x4x1x8xf32> to vector<2x4x1x8xf32>
    %42 = vector.shape_cast %41 : vector<2x4x1x8xf32> to vector<8x1x8xf32>
    %cst_20 = arith.constant dense<0.000000e+00> : vector<8x8x8xf32>
    %43 = tpu.matmul %32, %37, %cst_20 {dimension_numbers = #tpu.dot_dimension_numbers<[2], [1], [1], [2], [0, 0, 0, 1, 1, 2], [0], [0]>} : vector<8x8x32xf32>, vector<8x32x8xf32>, vector<8x8x8xf32> -> vector<8x8x8xf32>
    %44 = vector.broadcast %42 : vector<8x1x8xf32> to vector<8x8x8xf32>
    %45 = arith.addf %43, %44 : vector<8x8x8xf32>
    %c0_21 = arith.constant 0 : index
    %c0_22 = arith.constant 0 : index
    %c0_23 = arith.constant 0 : index
    %46 = vector.load %arg7[%c0_21, %c0_22, %c0_23] : memref<4x32x8xf32, #tpu.memory_space<vmem>>, vector<4x32x8xf32>
    %47 = vector.shape_cast %46 : vector<4x32x8xf32> to vector<1x4x32x8xf32>
    %48 = vector.shape_cast %47 : vector<1x4x32x8xf32> to vector<1x4x32x8xf32>
    %49 = vector.broadcast %48 : vector<1x4x32x8xf32> to vector<2x4x32x8xf32>
    %50 = vector.shape_cast %49 : vector<2x4x32x8xf32> to vector<8x32x8xf32>
    %c0_24 = arith.constant 0 : index
    %c0_25 = arith.constant 0 : index
    %c0_26 = arith.constant 0 : index
    %51 = vector.load %arg8[%c0_24, %c0_25, %c0_26] : memref<4x1x8xf32, #tpu.memory_space<vmem>>, vector<4x1x8xf32>
    %52 = vector.shape_cast %51 : vector<4x1x8xf32> to vector<1x4x1x8xf32>
    %53 = vector.shape_cast %52 : vector<1x4x1x8xf32> to vector<1x4x1x8xf32>
    %54 = vector.broadcast %53 : vector<1x4x1x8xf32> to vector<2x4x1x8xf32>
    %55 = vector.shape_cast %54 : vector<2x4x1x8xf32> to vector<8x1x8xf32>
    %cst_27 = arith.constant dense<0.000000e+00> : vector<8x8x8xf32>
    %56 = tpu.matmul %32, %50, %cst_27 {dimension_numbers = #tpu.dot_dimension_numbers<[2], [1], [1], [2], [0, 0, 0, 1, 1, 2], [0], [0]>} : vector<8x8x32xf32>, vector<8x32x8xf32>, vector<8x8x8xf32> -> vector<8x8x8xf32>
    %57 = vector.broadcast %55 : vector<8x1x8xf32> to vector<8x8x8xf32>
    %58 = arith.addf %56, %57 : vector<8x8x8xf32>
    %c0_28 = arith.constant 0 : index
    %c0_29 = arith.constant 0 : index
    %c0_30 = arith.constant 0 : index
    %59 = vector.load %arg9[%c0_28, %c0_29, %c0_30] : memref<4x32x8xf32, #tpu.memory_space<vmem>>, vector<4x32x8xf32>
    %60 = vector.shape_cast %59 : vector<4x32x8xf32> to vector<1x4x32x8xf32>
    %61 = vector.shape_cast %60 : vector<1x4x32x8xf32> to vector<1x4x32x8xf32>
    %62 = vector.broadcast %61 : vector<1x4x32x8xf32> to vector<2x4x32x8xf32>
    %63 = vector.shape_cast %62 : vector<2x4x32x8xf32> to vector<8x32x8xf32>
    %c0_31 = arith.constant 0 : index
    %c0_32 = arith.constant 0 : index
    %c0_33 = arith.constant 0 : index
    %64 = vector.load %arg10[%c0_31, %c0_32, %c0_33] : memref<4x1x8xf32, #tpu.memory_space<vmem>>, vector<4x1x8xf32>
    %65 = vector.shape_cast %64 : vector<4x1x8xf32> to vector<1x4x1x8xf32>
    %66 = vector.shape_cast %65 : vector<1x4x1x8xf32> to vector<1x4x1x8xf32>
    %67 = vector.broadcast %66 : vector<1x4x1x8xf32> to vector<2x4x1x8xf32>
    %68 = vector.shape_cast %67 : vector<2x4x1x8xf32> to vector<8x1x8xf32>
    %cst_34 = arith.constant dense<0.000000e+00> : vector<8x8x8xf32>
    %69 = tpu.matmul %32, %63, %cst_34 {dimension_numbers = #tpu.dot_dimension_numbers<[2], [1], [1], [2], [0, 0, 0, 1, 1, 2], [0], [0]>} : vector<8x8x32xf32>, vector<8x32x8xf32>, vector<8x8x8xf32> -> vector<8x8x8xf32>
    %70 = vector.broadcast %68 : vector<8x1x8xf32> to vector<8x8x8xf32>
    %71 = arith.addf %69, %70 : vector<8x8x8xf32>
    %cst_35 = arith.constant dense<0.000000e+00> : vector<8x8x8xf32>
    %72 = tpu.matmul %45, %58, %cst_35 {dimension_numbers = #tpu.dot_dimension_numbers<[2], [2], [1], [1], [0, 0, 0, 1, 1, 1], [0], [0]>} : vector<8x8x8xf32>, vector<8x8x8xf32>, vector<8x8x8xf32> -> vector<8x8x8xf32>
    %cst_36 = arith.constant dense<0xFF800000> : vector<8x8xf32>
    %73 = vector.multi_reduction <maximumf>, %72, %cst_36 [2] : vector<8x8x8xf32> to vector<8x8xf32>
    %74 = vector.shape_cast %73 : vector<8x8xf32> to vector<8x8x1xf32>
    %75 = vector.broadcast %74 : vector<8x8x1xf32> to vector<8x8x8xf32>
    %76 = arith.subf %72, %75 : vector<8x8x8xf32>
    %77 = math.exp %76 : vector<8x8x8xf32>
    %cst_37 = arith.constant dense<0.000000e+00> : vector<8x8xf32>
    %78 = vector.multi_reduction <add>, %77, %cst_37 [2] : vector<8x8x8xf32> to vector<8x8xf32>
    %79 = vector.shape_cast %78 : vector<8x8xf32> to vector<8x8x1xf32>
    %80 = tpu.reciprocal %79 {approx = true} : vector<8x8x1xf32> -> vector<8x8x1xf32>
    %81 = vector.broadcast %80 : vector<8x8x1xf32> to vector<8x8x8xf32>
    %82 = arith.mulf %77, %81 : vector<8x8x8xf32>
    %cst_38 = arith.constant dense<0.000000e+00> : vector<8x8x8xf32>
    %83 = tpu.matmul %82, %71, %cst_38 {dimension_numbers = #tpu.dot_dimension_numbers<[2], [1], [1], [2], [0, 0, 0, 1, 1, 2], [0], [0]>} : vector<8x8x8xf32>, vector<8x8x8xf32>, vector<8x8x8xf32> -> vector<8x8x8xf32>
    %c0_39 = arith.constant 0 : index
    %c0_40 = arith.constant 0 : index
    %c0_41 = arith.constant 0 : index
    %84 = vector.load %arg11[%c0_39, %c0_40, %c0_41] : memref<4x8x32xf32, #tpu.memory_space<vmem>>, vector<4x8x32xf32>
    %85 = vector.shape_cast %84 : vector<4x8x32xf32> to vector<1x4x8x32xf32>
    %86 = vector.shape_cast %85 : vector<1x4x8x32xf32> to vector<1x4x8x32xf32>
    %87 = vector.broadcast %86 : vector<1x4x8x32xf32> to vector<2x4x8x32xf32>
    %88 = vector.shape_cast %87 : vector<2x4x8x32xf32> to vector<8x8x32xf32>
    %cst_42 = arith.constant dense<0.000000e+00> : vector<8x8x32xf32>
    %89 = tpu.matmul %83, %88, %cst_42 {dimension_numbers = #tpu.dot_dimension_numbers<[2], [1], [1], [2], [0, 0, 0, 1, 1, 2], [0], [0]>} : vector<8x8x8xf32>, vector<8x8x32xf32>, vector<8x8x32xf32> -> vector<8x8x32xf32>
    %90 = vector.shape_cast %89 : vector<8x8x32xf32> to vector<2x4x8x32xf32>
    %cst_43 = arith.constant dense<0.000000e+00> : vector<2x8x32xf32>
    %91 = vector.multi_reduction <add>, %90, %cst_43 [1] : vector<2x4x8x32xf32> to vector<2x8x32xf32>
    %92 = vector.shape_cast %91 : vector<2x8x32xf32> to vector<16x32xf32>
    %c0_44 = arith.constant 0 : index
    %c0_45 = arith.constant 0 : index
    %93 = vector.load %arg12[%c0_44, %c0_45] : memref<1x32xf32, #tpu.memory_space<vmem>>, vector<1x32xf32>
    %94 = vector.broadcast %93 : vector<1x32xf32> to vector<16x32xf32>
    %95 = arith.addf %92, %94 : vector<16x32xf32>
    %96 = arith.addf %27, %95 : vector<16x32xf32>
    %cst_46 = arith.constant dense<0.000000e+00> : vector<16xf32>
    %97 = vector.multi_reduction <add>, %96, %cst_46 [1] : vector<16x32xf32> to vector<16xf32>
    %98 = vector.shape_cast %97 : vector<16xf32> to vector<16x1xf32>
    %cst_47 = arith.constant 3.200000e+01 : f32
    %99 = vector.broadcast %cst_47 : f32 to vector<16x1xf32>
    %100 = arith.divf %98, %99 : vector<16x1xf32>
    %101 = vector.broadcast %100 : vector<16x1xf32> to vector<16x32xf32>
    %102 = arith.subf %96, %101 : vector<16x32xf32>
    %103 = arith.mulf %102, %102 : vector<16x32xf32>
    %cst_48 = arith.constant dense<0.000000e+00> : vector<16xf32>
    %104 = vector.multi_reduction <add>, %103, %cst_48 [1] : vector<16x32xf32> to vector<16xf32>
    %105 = vector.shape_cast %104 : vector<16xf32> to vector<16x1xf32>
    %cst_49 = arith.constant 3.200000e+01 : f32
    %106 = vector.broadcast %cst_49 : f32 to vector<16x1xf32>
    %107 = arith.divf %105, %106 : vector<16x1xf32>
    %cst_50 = arith.constant 9.99999974E-6 : f32
    %108 = vector.broadcast %cst_50 : f32 to vector<16x1xf32>
    %109 = arith.addf %107, %108 : vector<16x1xf32>
    %110 = math.rsqrt %109 : vector<16x1xf32>
    %111 = vector.broadcast %110 : vector<16x1xf32> to vector<16x32xf32>
    %112 = arith.mulf %102, %111 : vector<16x32xf32>
    %c0_51 = arith.constant 0 : index
    %c0_52 = arith.constant 0 : index
    %113 = vector.load %arg17[%c0_51, %c0_52] : memref<1x32xf32, #tpu.memory_space<vmem>>, vector<1x32xf32>
    %114 = vector.broadcast %113 : vector<1x32xf32> to vector<16x32xf32>
    %115 = arith.mulf %112, %114 : vector<16x32xf32>
    %c0_53 = arith.constant 0 : index
    %c0_54 = arith.constant 0 : index
    %116 = vector.load %arg18[%c0_53, %c0_54] : memref<1x32xf32, #tpu.memory_space<vmem>>, vector<1x32xf32>
    %117 = vector.broadcast %116 : vector<1x32xf32> to vector<16x32xf32>
    %118 = arith.addf %115, %117 : vector<16x32xf32>
    %c0_55 = arith.constant 0 : index
    %c0_56 = arith.constant 0 : index
    %119 = vector.load %arg13[%c0_55, %c0_56] : memref<32x128xf32, #tpu.memory_space<vmem>>, vector<32x128xf32>
    %cst_57 = arith.constant dense<0.000000e+00> : vector<16x128xf32>
    %120 = tpu.matmul %118, %119, %cst_57 {dimension_numbers = #tpu.dot_dimension_numbers<[1], [0], [0], [1], [0, 0, 1, 1], [], []>} : vector<16x32xf32>, vector<32x128xf32>, vector<16x128xf32> -> vector<16x128xf32>
    %c0_58 = arith.constant 0 : index
    %c0_59 = arith.constant 0 : index
    %121 = vector.load %arg14[%c0_58, %c0_59] : memref<1x128xf32, #tpu.memory_space<vmem>>, vector<1x128xf32>
    %122 = vector.broadcast %121 : vector<1x128xf32> to vector<16x128xf32>
    %123 = arith.addf %120, %122 : vector<16x128xf32>
    %cst_60 = arith.constant 0.000000e+00 : f32
    %124 = vector.broadcast %cst_60 : f32 to vector<16x128xf32>
    %125 = arith.maximumf %123, %124 : vector<16x128xf32>
    %c0_61 = arith.constant 0 : index
    %c0_62 = arith.constant 0 : index
    %126 = vector.load %arg15[%c0_61, %c0_62] : memref<128x32xf32, #tpu.memory_space<vmem>>, vector<128x32xf32>
    %cst_63 = arith.constant dense<0.000000e+00> : vector<16x32xf32>
    %127 = tpu.matmul %125, %126, %cst_63 {dimension_numbers = #tpu.dot_dimension_numbers<[1], [0], [0], [1], [0, 0, 1, 1], [], []>} : vector<16x128xf32>, vector<128x32xf32>, vector<16x32xf32> -> vector<16x32xf32>
    %c0_64 = arith.constant 0 : index
    %c0_65 = arith.constant 0 : index
    %128 = vector.load %arg16[%c0_64, %c0_65] : memref<1x32xf32, #tpu.memory_space<vmem>>, vector<1x32xf32>
    %129 = vector.broadcast %128 : vector<1x32xf32> to vector<16x32xf32>
    %130 = arith.addf %127, %129 : vector<16x32xf32>
    %131 = arith.addf %118, %130 : vector<16x32xf32>
    %cst_66 = arith.constant dense<0.000000e+00> : vector<16xf32>
    %132 = vector.multi_reduction <add>, %131, %cst_66 [1] : vector<16x32xf32> to vector<16xf32>
    %133 = vector.shape_cast %132 : vector<16xf32> to vector<16x1xf32>
    %cst_67 = arith.constant 3.200000e+01 : f32
    %134 = vector.broadcast %cst_67 : f32 to vector<16x1xf32>
    %135 = arith.divf %133, %134 : vector<16x1xf32>
    %136 = vector.broadcast %135 : vector<16x1xf32> to vector<16x32xf32>
    %137 = arith.subf %131, %136 : vector<16x32xf32>
    %138 = arith.mulf %137, %137 : vector<16x32xf32>
    %cst_68 = arith.constant dense<0.000000e+00> : vector<16xf32>
    %139 = vector.multi_reduction <add>, %138, %cst_68 [1] : vector<16x32xf32> to vector<16xf32>
    %140 = vector.shape_cast %139 : vector<16xf32> to vector<16x1xf32>
    %cst_69 = arith.constant 3.200000e+01 : f32
    %141 = vector.broadcast %cst_69 : f32 to vector<16x1xf32>
    %142 = arith.divf %140, %141 : vector<16x1xf32>
    %cst_70 = arith.constant 9.99999974E-6 : f32
    %143 = vector.broadcast %cst_70 : f32 to vector<16x1xf32>
    %144 = arith.addf %142, %143 : vector<16x1xf32>
    %145 = math.rsqrt %144 : vector<16x1xf32>
    %146 = vector.broadcast %145 : vector<16x1xf32> to vector<16x32xf32>
    %147 = arith.mulf %137, %146 : vector<16x32xf32>
    %c0_71 = arith.constant 0 : index
    %c0_72 = arith.constant 0 : index
    %148 = vector.load %arg19[%c0_71, %c0_72] : memref<1x32xf32, #tpu.memory_space<vmem>>, vector<1x32xf32>
    %149 = vector.broadcast %148 : vector<1x32xf32> to vector<16x32xf32>
    %150 = arith.mulf %147, %149 : vector<16x32xf32>
    %c0_73 = arith.constant 0 : index
    %c0_74 = arith.constant 0 : index
    %151 = vector.load %arg20[%c0_73, %c0_74] : memref<1x32xf32, #tpu.memory_space<vmem>>, vector<1x32xf32>
    %152 = vector.broadcast %151 : vector<1x32xf32> to vector<16x32xf32>
    %153 = arith.addf %150, %152 : vector<16x32xf32>
    %154 = vector.shape_cast %153 : vector<16x32xf32> to vector<2x8x32xf32>
    %155 = vector.shape_cast %154 : vector<2x8x32xf32> to vector<2x1x8x32xf32>
    %156 = vector.shape_cast %155 : vector<2x1x8x32xf32> to vector<2x1x8x32xf32>
    %157 = vector.broadcast %156 : vector<2x1x8x32xf32> to vector<2x4x8x32xf32>
    %158 = vector.shape_cast %157 : vector<2x4x8x32xf32> to vector<8x8x32xf32>
    %c0_75 = arith.constant 0 : index
    %c0_76 = arith.constant 0 : index
    %c0_77 = arith.constant 0 : index
    %159 = vector.load %arg21[%c0_75, %c0_76, %c0_77] : memref<4x32x8xf32, #tpu.memory_space<vmem>>, vector<4x32x8xf32>
    %160 = vector.shape_cast %159 : vector<4x32x8xf32> to vector<1x4x32x8xf32>
    %161 = vector.shape_cast %160 : vector<1x4x32x8xf32> to vector<1x4x32x8xf32>
    %162 = vector.broadcast %161 : vector<1x4x32x8xf32> to vector<2x4x32x8xf32>
    %163 = vector.shape_cast %162 : vector<2x4x32x8xf32> to vector<8x32x8xf32>
    %c0_78 = arith.constant 0 : index
    %c0_79 = arith.constant 0 : index
    %c0_80 = arith.constant 0 : index
    %164 = vector.load %arg22[%c0_78, %c0_79, %c0_80] : memref<4x1x8xf32, #tpu.memory_space<vmem>>, vector<4x1x8xf32>
    %165 = vector.shape_cast %164 : vector<4x1x8xf32> to vector<1x4x1x8xf32>
    %166 = vector.shape_cast %165 : vector<1x4x1x8xf32> to vector<1x4x1x8xf32>
    %167 = vector.broadcast %166 : vector<1x4x1x8xf32> to vector<2x4x1x8xf32>
    %168 = vector.shape_cast %167 : vector<2x4x1x8xf32> to vector<8x1x8xf32>
    %cst_81 = arith.constant dense<0.000000e+00> : vector<8x8x8xf32>
    %169 = tpu.matmul %158, %163, %cst_81 {dimension_numbers = #tpu.dot_dimension_numbers<[2], [1], [1], [2], [0, 0, 0, 1, 1, 2], [0], [0]>} : vector<8x8x32xf32>, vector<8x32x8xf32>, vector<8x8x8xf32> -> vector<8x8x8xf32>
    %170 = vector.broadcast %168 : vector<8x1x8xf32> to vector<8x8x8xf32>
    %171 = arith.addf %169, %170 : vector<8x8x8xf32>
    %c0_82 = arith.constant 0 : index
    %c0_83 = arith.constant 0 : index
    %c0_84 = arith.constant 0 : index
    %172 = vector.load %arg23[%c0_82, %c0_83, %c0_84] : memref<4x32x8xf32, #tpu.memory_space<vmem>>, vector<4x32x8xf32>
    %173 = vector.shape_cast %172 : vector<4x32x8xf32> to vector<1x4x32x8xf32>
    %174 = vector.shape_cast %173 : vector<1x4x32x8xf32> to vector<1x4x32x8xf32>
    %175 = vector.broadcast %174 : vector<1x4x32x8xf32> to vector<2x4x32x8xf32>
    %176 = vector.shape_cast %175 : vector<2x4x32x8xf32> to vector<8x32x8xf32>
    %c0_85 = arith.constant 0 : index
    %c0_86 = arith.constant 0 : index
    %c0_87 = arith.constant 0 : index
    %177 = vector.load %arg24[%c0_85, %c0_86, %c0_87] : memref<4x1x8xf32, #tpu.memory_space<vmem>>, vector<4x1x8xf32>
    %178 = vector.shape_cast %177 : vector<4x1x8xf32> to vector<1x4x1x8xf32>
    %179 = vector.shape_cast %178 : vector<1x4x1x8xf32> to vector<1x4x1x8xf32>
    %180 = vector.broadcast %179 : vector<1x4x1x8xf32> to vector<2x4x1x8xf32>
    %181 = vector.shape_cast %180 : vector<2x4x1x8xf32> to vector<8x1x8xf32>
    %cst_88 = arith.constant dense<0.000000e+00> : vector<8x8x8xf32>
    %182 = tpu.matmul %158, %176, %cst_88 {dimension_numbers = #tpu.dot_dimension_numbers<[2], [1], [1], [2], [0, 0, 0, 1, 1, 2], [0], [0]>} : vector<8x8x32xf32>, vector<8x32x8xf32>, vector<8x8x8xf32> -> vector<8x8x8xf32>
    %183 = vector.broadcast %181 : vector<8x1x8xf32> to vector<8x8x8xf32>
    %184 = arith.addf %182, %183 : vector<8x8x8xf32>
    %c0_89 = arith.constant 0 : index
    %c0_90 = arith.constant 0 : index
    %c0_91 = arith.constant 0 : index
    %185 = vector.load %arg25[%c0_89, %c0_90, %c0_91] : memref<4x32x8xf32, #tpu.memory_space<vmem>>, vector<4x32x8xf32>
    %186 = vector.shape_cast %185 : vector<4x32x8xf32> to vector<1x4x32x8xf32>
    %187 = vector.shape_cast %186 : vector<1x4x32x8xf32> to vector<1x4x32x8xf32>
    %188 = vector.broadcast %187 : vector<1x4x32x8xf32> to vector<2x4x32x8xf32>
    %189 = vector.shape_cast %188 : vector<2x4x32x8xf32> to vector<8x32x8xf32>
    %c0_92 = arith.constant 0 : index
    %c0_93 = arith.constant 0 : index
    %c0_94 = arith.constant 0 : index
    %190 = vector.load %arg26[%c0_92, %c0_93, %c0_94] : memref<4x1x8xf32, #tpu.memory_space<vmem>>, vector<4x1x8xf32>
    %191 = vector.shape_cast %190 : vector<4x1x8xf32> to vector<1x4x1x8xf32>
    %192 = vector.shape_cast %191 : vector<1x4x1x8xf32> to vector<1x4x1x8xf32>
    %193 = vector.broadcast %192 : vector<1x4x1x8xf32> to vector<2x4x1x8xf32>
    %194 = vector.shape_cast %193 : vector<2x4x1x8xf32> to vector<8x1x8xf32>
    %cst_95 = arith.constant dense<0.000000e+00> : vector<8x8x8xf32>
    %195 = tpu.matmul %158, %189, %cst_95 {dimension_numbers = #tpu.dot_dimension_numbers<[2], [1], [1], [2], [0, 0, 0, 1, 1, 2], [0], [0]>} : vector<8x8x32xf32>, vector<8x32x8xf32>, vector<8x8x8xf32> -> vector<8x8x8xf32>
    %196 = vector.broadcast %194 : vector<8x1x8xf32> to vector<8x8x8xf32>
    %197 = arith.addf %195, %196 : vector<8x8x8xf32>
    %cst_96 = arith.constant dense<0.000000e+00> : vector<8x8x8xf32>
    %198 = tpu.matmul %171, %184, %cst_96 {dimension_numbers = #tpu.dot_dimension_numbers<[2], [2], [1], [1], [0, 0, 0, 1, 1, 1], [0], [0]>} : vector<8x8x8xf32>, vector<8x8x8xf32>, vector<8x8x8xf32> -> vector<8x8x8xf32>
    %cst_97 = arith.constant dense<0xFF800000> : vector<8x8xf32>
    %199 = vector.multi_reduction <maximumf>, %198, %cst_97 [2] : vector<8x8x8xf32> to vector<8x8xf32>
    %200 = vector.shape_cast %199 : vector<8x8xf32> to vector<8x8x1xf32>
    %201 = vector.broadcast %200 : vector<8x8x1xf32> to vector<8x8x8xf32>
    %202 = arith.subf %198, %201 : vector<8x8x8xf32>
    %203 = math.exp %202 : vector<8x8x8xf32>
    %cst_98 = arith.constant dense<0.000000e+00> : vector<8x8xf32>
    %204 = vector.multi_reduction <add>, %203, %cst_98 [2] : vector<8x8x8xf32> to vector<8x8xf32>
    %205 = vector.shape_cast %204 : vector<8x8xf32> to vector<8x8x1xf32>
    %206 = tpu.reciprocal %205 {approx = true} : vector<8x8x1xf32> -> vector<8x8x1xf32>
    %207 = vector.broadcast %206 : vector<8x8x1xf32> to vector<8x8x8xf32>
    %208 = arith.mulf %203, %207 : vector<8x8x8xf32>
    %cst_99 = arith.constant dense<0.000000e+00> : vector<8x8x8xf32>
    %209 = tpu.matmul %208, %197, %cst_99 {dimension_numbers = #tpu.dot_dimension_numbers<[2], [1], [1], [2], [0, 0, 0, 1, 1, 2], [0], [0]>} : vector<8x8x8xf32>, vector<8x8x8xf32>, vector<8x8x8xf32> -> vector<8x8x8xf32>
    %c0_100 = arith.constant 0 : index
    %c0_101 = arith.constant 0 : index
    %c0_102 = arith.constant 0 : index
    %210 = vector.load %arg27[%c0_100, %c0_101, %c0_102] : memref<4x8x32xf32, #tpu.memory_space<vmem>>, vector<4x8x32xf32>
    %211 = vector.shape_cast %210 : vector<4x8x32xf32> to vector<1x4x8x32xf32>
    %212 = vector.shape_cast %211 : vector<1x4x8x32xf32> to vector<1x4x8x32xf32>
    %213 = vector.broadcast %212 : vector<1x4x8x32xf32> to vector<2x4x8x32xf32>
    %214 = vector.shape_cast %213 : vector<2x4x8x32xf32> to vector<8x8x32xf32>
    %cst_103 = arith.constant dense<0.000000e+00> : vector<8x8x32xf32>
    %215 = tpu.matmul %209, %214, %cst_103 {dimension_numbers = #tpu.dot_dimension_numbers<[2], [1], [1], [2], [0, 0, 0, 1, 1, 2], [0], [0]>} : vector<8x8x8xf32>, vector<8x8x32xf32>, vector<8x8x32xf32> -> vector<8x8x32xf32>
    %216 = vector.shape_cast %215 : vector<8x8x32xf32> to vector<2x4x8x32xf32>
    %cst_104 = arith.constant dense<0.000000e+00> : vector<2x8x32xf32>
    %217 = vector.multi_reduction <add>, %216, %cst_104 [1] : vector<2x4x8x32xf32> to vector<2x8x32xf32>
    %218 = vector.shape_cast %217 : vector<2x8x32xf32> to vector<16x32xf32>
    %c0_105 = arith.constant 0 : index
    %c0_106 = arith.constant 0 : index
    %219 = vector.load %arg28[%c0_105, %c0_106] : memref<1x32xf32, #tpu.memory_space<vmem>>, vector<1x32xf32>
    %220 = vector.broadcast %219 : vector<1x32xf32> to vector<16x32xf32>
    %221 = arith.addf %218, %220 : vector<16x32xf32>
    %222 = arith.addf %153, %221 : vector<16x32xf32>
    %cst_107 = arith.constant dense<0.000000e+00> : vector<16xf32>
    %223 = vector.multi_reduction <add>, %222, %cst_107 [1] : vector<16x32xf32> to vector<16xf32>
    %224 = vector.shape_cast %223 : vector<16xf32> to vector<16x1xf32>
    %cst_108 = arith.constant 3.200000e+01 : f32
    %225 = vector.broadcast %cst_108 : f32 to vector<16x1xf32>
    %226 = arith.divf %224, %225 : vector<16x1xf32>
    %227 = vector.broadcast %226 : vector<16x1xf32> to vector<16x32xf32>
    %228 = arith.subf %222, %227 : vector<16x32xf32>
    %229 = arith.mulf %228, %228 : vector<16x32xf32>
    %cst_109 = arith.constant dense<0.000000e+00> : vector<16xf32>
    %230 = vector.multi_reduction <add>, %229, %cst_109 [1] : vector<16x32xf32> to vector<16xf32>
    %231 = vector.shape_cast %230 : vector<16xf32> to vector<16x1xf32>
    %cst_110 = arith.constant 3.200000e+01 : f32
    %232 = vector.broadcast %cst_110 : f32 to vector<16x1xf32>
    %233 = arith.divf %231, %232 : vector<16x1xf32>
    %cst_111 = arith.constant 9.99999974E-6 : f32
    %234 = vector.broadcast %cst_111 : f32 to vector<16x1xf32>
    %235 = arith.addf %233, %234 : vector<16x1xf32>
    %236 = math.rsqrt %235 : vector<16x1xf32>
    %237 = vector.broadcast %236 : vector<16x1xf32> to vector<16x32xf32>
    %238 = arith.mulf %228, %237 : vector<16x32xf32>
    %c0_112 = arith.constant 0 : index
    %c0_113 = arith.constant 0 : index
    %239 = vector.load %arg33[%c0_112, %c0_113] : memref<1x32xf32, #tpu.memory_space<vmem>>, vector<1x32xf32>
    %240 = vector.broadcast %239 : vector<1x32xf32> to vector<16x32xf32>
    %241 = arith.mulf %238, %240 : vector<16x32xf32>
    %c0_114 = arith.constant 0 : index
    %c0_115 = arith.constant 0 : index
    %242 = vector.load %arg34[%c0_114, %c0_115] : memref<1x32xf32, #tpu.memory_space<vmem>>, vector<1x32xf32>
    %243 = vector.broadcast %242 : vector<1x32xf32> to vector<16x32xf32>
    %244 = arith.addf %241, %243 : vector<16x32xf32>
    %c0_116 = arith.constant 0 : index
    %c0_117 = arith.constant 0 : index
    %245 = vector.load %arg29[%c0_116, %c0_117] : memref<32x128xf32, #tpu.memory_space<vmem>>, vector<32x128xf32>
    %cst_118 = arith.constant dense<0.000000e+00> : vector<16x128xf32>
    %246 = tpu.matmul %244, %245, %cst_118 {dimension_numbers = #tpu.dot_dimension_numbers<[1], [0], [0], [1], [0, 0, 1, 1], [], []>} : vector<16x32xf32>, vector<32x128xf32>, vector<16x128xf32> -> vector<16x128xf32>
    %c0_119 = arith.constant 0 : index
    %c0_120 = arith.constant 0 : index
    %247 = vector.load %arg30[%c0_119, %c0_120] : memref<1x128xf32, #tpu.memory_space<vmem>>, vector<1x128xf32>
    %248 = vector.broadcast %247 : vector<1x128xf32> to vector<16x128xf32>
    %249 = arith.addf %246, %248 : vector<16x128xf32>
    %cst_121 = arith.constant 0.000000e+00 : f32
    %250 = vector.broadcast %cst_121 : f32 to vector<16x128xf32>
    %251 = arith.maximumf %249, %250 : vector<16x128xf32>
    %c0_122 = arith.constant 0 : index
    %c0_123 = arith.constant 0 : index
    %252 = vector.load %arg31[%c0_122, %c0_123] : memref<128x32xf32, #tpu.memory_space<vmem>>, vector<128x32xf32>
    %cst_124 = arith.constant dense<0.000000e+00> : vector<16x32xf32>
    %253 = tpu.matmul %251, %252, %cst_124 {dimension_numbers = #tpu.dot_dimension_numbers<[1], [0], [0], [1], [0, 0, 1, 1], [], []>} : vector<16x128xf32>, vector<128x32xf32>, vector<16x32xf32> -> vector<16x32xf32>
    %c0_125 = arith.constant 0 : index
    %c0_126 = arith.constant 0 : index
    %254 = vector.load %arg32[%c0_125, %c0_126] : memref<1x32xf32, #tpu.memory_space<vmem>>, vector<1x32xf32>
    %255 = vector.broadcast %254 : vector<1x32xf32> to vector<16x32xf32>
    %256 = arith.addf %253, %255 : vector<16x32xf32>
    %257 = arith.addf %244, %256 : vector<16x32xf32>
    %cst_127 = arith.constant dense<0.000000e+00> : vector<16xf32>
    %258 = vector.multi_reduction <add>, %257, %cst_127 [1] : vector<16x32xf32> to vector<16xf32>
    %259 = vector.shape_cast %258 : vector<16xf32> to vector<16x1xf32>
    %cst_128 = arith.constant 3.200000e+01 : f32
    %260 = vector.broadcast %cst_128 : f32 to vector<16x1xf32>
    %261 = arith.divf %259, %260 : vector<16x1xf32>
    %262 = vector.broadcast %261 : vector<16x1xf32> to vector<16x32xf32>
    %263 = arith.subf %257, %262 : vector<16x32xf32>
    %264 = arith.mulf %263, %263 : vector<16x32xf32>
    %cst_129 = arith.constant dense<0.000000e+00> : vector<16xf32>
    %265 = vector.multi_reduction <add>, %264, %cst_129 [1] : vector<16x32xf32> to vector<16xf32>
    %266 = vector.shape_cast %265 : vector<16xf32> to vector<16x1xf32>
    %cst_130 = arith.constant 3.200000e+01 : f32
    %267 = vector.broadcast %cst_130 : f32 to vector<16x1xf32>
    %268 = arith.divf %266, %267 : vector<16x1xf32>
    %cst_131 = arith.constant 9.99999974E-6 : f32
    %269 = vector.broadcast %cst_131 : f32 to vector<16x1xf32>
    %270 = arith.addf %268, %269 : vector<16x1xf32>
    %271 = math.rsqrt %270 : vector<16x1xf32>
    %272 = vector.broadcast %271 : vector<16x1xf32> to vector<16x32xf32>
    %273 = arith.mulf %263, %272 : vector<16x32xf32>
    %c0_132 = arith.constant 0 : index
    %c0_133 = arith.constant 0 : index
    %274 = vector.load %arg35[%c0_132, %c0_133] : memref<1x32xf32, #tpu.memory_space<vmem>>, vector<1x32xf32>
    %275 = vector.broadcast %274 : vector<1x32xf32> to vector<16x32xf32>
    %276 = arith.mulf %273, %275 : vector<16x32xf32>
    %c0_134 = arith.constant 0 : index
    %c0_135 = arith.constant 0 : index
    %277 = vector.load %arg36[%c0_134, %c0_135] : memref<1x32xf32, #tpu.memory_space<vmem>>, vector<1x32xf32>
    %278 = vector.broadcast %277 : vector<1x32xf32> to vector<16x32xf32>
    %279 = arith.addf %276, %278 : vector<16x32xf32>
    %c0_136 = arith.constant 0 : index
    %c0_137 = arith.constant 0 : index
    %280 = vector.load %arg37[%c0_136, %c0_137] : memref<32x32xf32, #tpu.memory_space<vmem>>, vector<32x32xf32>
    %cst_138 = arith.constant dense<0.000000e+00> : vector<16x32xf32>
    %281 = tpu.matmul %279, %280, %cst_138 {dimension_numbers = #tpu.dot_dimension_numbers<[1], [0], [0], [1], [0, 0, 1, 1], [], []>} : vector<16x32xf32>, vector<32x32xf32>, vector<16x32xf32> -> vector<16x32xf32>
    %c0_139 = arith.constant 0 : index
    %c0_140 = arith.constant 0 : index
    %282 = vector.load %arg38[%c0_139, %c0_140] : memref<1x32xf32, #tpu.memory_space<vmem>>, vector<1x32xf32>
    %283 = vector.broadcast %282 : vector<1x32xf32> to vector<16x32xf32>
    %284 = arith.addf %281, %283 : vector<16x32xf32>
    %cst_141 = arith.constant 0.000000e+00 : f32
    %285 = vector.broadcast %cst_141 : f32 to vector<16x32xf32>
    %286 = arith.maximumf %284, %285 : vector<16x32xf32>
    %c0_142 = arith.constant 0 : index
    %c0_143 = arith.constant 0 : index
    %287 = vector.load %arg39[%c0_142, %c0_143] : memref<32x16xf32, #tpu.memory_space<vmem>>, vector<32x16xf32>
    %cst_144 = arith.constant dense<0.000000e+00> : vector<16x16xf32>
    %288 = tpu.matmul %286, %287, %cst_144 {dimension_numbers = #tpu.dot_dimension_numbers<[1], [0], [0], [1], [0, 0, 1, 1], [], []>} : vector<16x32xf32>, vector<32x16xf32>, vector<16x16xf32> -> vector<16x16xf32>
    %c0_145 = arith.constant 0 : index
    %c0_146 = arith.constant 0 : index
    %289 = vector.load %arg40[%c0_145, %c0_146] : memref<1x16xf32, #tpu.memory_space<vmem>>, vector<1x16xf32>
    %290 = vector.broadcast %289 : vector<1x16xf32> to vector<16x16xf32>
    %291 = arith.addf %288, %290 : vector<16x16xf32>
    %c0_147 = arith.constant 0 : index
    %c0_148 = arith.constant 0 : index
    %292 = vector.load %arg41[%c0_147, %c0_148] : memref<16x16xf32, #tpu.memory_space<vmem>>, vector<16x16xf32>
    tpu.vector_store %arg41[%c0_147, %c0_148], %291 {strides = array<i32>} : memref<16x16xf32, #tpu.memory_space<vmem>>, vector<16x16xf32>,
    return
  }
}

</mosaic_0001>

<bundles_post_ra>
// kernel: transformer_brain_forward.1
= control target key start
LH: loop header
LB: loop body
LE: loop exit
PB: predicated region body
PF: predicated region fallthrough
CT: control target
= control target key end

     0   :  { %s10110_s3 = smov 1   ;;  %vm181_vm0 = vcmask 130048   ;;  %s10111_s10 = smov 2   ;;  %vm263_vm1 = vcmask 261120   ;;  %v10113_v21 = vmov 0.0   ;;  %vm10114_vm2 = vmmov 0   ;;  %s11251_s0 = inlined_call_operand.smem [shape: u32[42], index: -1, kind: input, shape index: {}] }
   0x1   :  { %s8488_s6 = sld [smem:[%s11251_s0 + %s10110_s3]]   ;;  %s10112_s14 = smov 5   ;;  %9112 = vmatprep.subr.mxu0 %v10113_v21  ;;  %9120 = vmatprep.mubr.msk.f32.mxu0 %vm10114_vm2, %v10113_v21  ;;  %vm2127_vm3 = vcmask 64512  }
   0x2   :  { %s1_s9 = sld [smem:[%s11251_s0]]   ;;  %s10115_s18 = smov 3  }
   0x3   :  { %s8489_s13 = sld [smem:[%s11251_s0 + %s10111_s10]]   ;;  %s10116_s22 = smov 4  }
   0x4   :  { %s10180_s17 = sld [smem:[%s11251_s0 + %s10112_s14]]   ;;  %s10117_s26 = smov 7  }
   0x5   :  { %s8490_s21 = sld [smem:[%s11251_s0 + %s10115_s18]]   ;;  %s10118_s30 = smov 9  }
   0x6   :  { %s8491_s25 = sld [smem:[%s11251_s0 + %s10116_s22]]   ;;  %s10119_s4 = smov 8  }
   0x7   :  { %v173_v0 = vld [vmem:[%s8488_s6 + $0x8] sm:$0xff]  ;;  %v172_v1 = vld [vmem:[%s8488_s6] sm:$0xff]  ;;  %s10294_s29 = sld [smem:[%s11251_s0 + %s10117_s26]]   ;;  %s10120_s8 = smov 6  }
   0x8   :  { %9094 = vmatprep.subr.mxu1 %v173_v0  ;;  %v170_v2 = vld [vmem:[%s1_s9] sm:$0xff]  ;;  %v171_v3 = vld [vmem:[%s1_s9 + $0x8] sm:$0xff]  ;;  %s10379_s3 = sld [smem:[%s11251_s0 + %s10118_s30]]   ;;  %s10121_s12 = smov 10  }
   0x9   :  { %9095 = vmatpush3.msra.mxu1 %v173_v0  ;;  %9098 = vmatprep.mubr.msk.f32.mxu1 %vm181_vm0, %v170_v2  ;;  %v8529_v5 = vld [vmem:[%s8489_s13] ss:$0 sm:$0xff]  ;;  %s8495_s7 = sld [smem:[%s11251_s0 + %s10119_s4]]   ;;  %s10122_s16 = smov 11  }
   0xa   :  { %9096 = vmatprep.subr.mxu1 %v172_v1  ;;  %v10185_v22 = vld [vmem:[%s10180_s17 + $0x18] sm:$0xff]  ;;  %v10195_v24 = vld [vmem:[%s10180_s17 + $0x10] sm:$0xff]  ;;  %v10205_v26 = vld [vmem:[%s10180_s17 + $0x8] sm:$0xff]  ;;  %s8493_s11 = sld [smem:[%s11251_s0 + %s10120_s8]]   ;;  %s10123_s20 = smov 12  }
   0xb   :  { %9097 = vmatpush3.msra.mxu1 %v172_v1  ;;  %v10188_v23 = vld [vmem:[%s10180_s17 + $0x38] sm:$0xff]  ;;  %v10198_v25 = vld [vmem:[%s10180_s17 + $0x30] sm:$0xff]  ;;  %v10208_v27 = vld [vmem:[%s10180_s17 + $0x28] sm:$0xff]  ;;  %s8497_s15 = sld [smem:[%s11251_s0 + %s10121_s12]]   ;;  %s10124_s24 = smov 13  }
   0xc   :  { %9099 = vmatmul.mubr.msk.f32.vlgmr.msra.gmra.mxu1 %vm181_vm0, %v171_v3  ;;  %9101 = vmatprep.subr.mxu1 %v10113_v21  ;;  %v10215_v28 = vld [vmem:[%s10180_s17] sm:$0xff]  ;;  %v320_v42 = vld [vmem:[%s10180_s17 + $0x58] sm:$0xff]  ;;  %v319_v44 = vld [vmem:[%s10180_s17 + $0x50] sm:$0xff]  ;;  %s8498_s19 = sld [smem:[%s11251_s0 + %s10122_s16]]   ;;  %s10125_s28 = smov 15  }
   0xd   :  { %9102 = vmatpush3.msra.mxu1 %v10185_v22  ;;  %9113 = vmatpush3.msra.mxu0 %v10188_v23  ;;  %v10218_v29 = vld [vmem:[%s10180_s17 + $0x20] sm:$0xff]  ;;  %v324_v43 = vld [vmem:[%s10180_s17 + $0x78] sm:$0xff]  ;;  %v323_v45 = vld [vmem:[%s10180_s17 + $0x70] sm:$0xff]  ;;  %s8499_s23 = sld [smem:[%s11251_s0 + %s10123_s20]]   ;;  %s10126_s2 = smov 17  }
   0xe   :  { %9103 = vmatprep.subr.mxu1 %v10113_v21  ;;  %9114 = vmatprep.subr.mxu0 %v10113_v21  ;;  %v8532_v37 = vld [vmem:[%s8490_s21] ss:$0 sm:$0xff]  ;;  %v318_v46 = vld [vmem:[%s10180_s17 + $0x48] sm:$0xff]  ;;  %v922_v54 = vld [vmem:[%s10294_s29 + $0x18] sm:$0xff]  ;;  %s8500_s27 = sld [smem:[%s11251_s0 + %s10124_s24]]   ;;  %s10127_s6 = smov 18  }
   0xf   :  { %9104 = vmatpush3.msra.mxu1 %v10195_v24  ;;  %9115 = vmatpush3.msra.mxu0 %v10198_v25  ;;  %v8533_v39 = vld [vmem:[%s8491_s25] ss:$0 sm:$0xff]  ;;  %v322_v47 = vld [vmem:[%s10180_s17 + $0x68] sm:$0xff]  ;;  %v926_v55 = vld [vmem:[%s10294_s29 + $0x38] sm:$0xff]  ;;  %s10662_s1 = sld [smem:[%s11251_s0 + %s10125_s28]]   ;;  %s10128_s10 = smov 14  }
  0x10   :  { %9105 = vmatprep.subr.mxu1 %v10113_v21  ;;  %9116 = vmatprep.subr.mxu0 %v10113_v21  ;;  %v317_v48 = vld [vmem:[%s10180_s17 + $0x40] sm:$0xff]  ;;  %v921_v56 = vld [vmem:[%s10294_s29 + $0x10] sm:$0xff]  ;;  %v920_v58 = vld [vmem:[%s10294_s29 + $0x8] sm:$0xff]  ;;  %s8504_s5 = sld [smem:[%s11251_s0 + %s10126_s2]]   ;;  %s10129_s14 = smov 16  }
  0x11   :  { %9106 = vmatpush3.msra.mxu1 %v10205_v26  ;;  %9117 = vmatpush3.msra.mxu0 %v10208_v27  ;;  %v321_v49 = vld [vmem:[%s10180_s17 + $0x60] sm:$0xff]  ;;  %v925_v57 = vld [vmem:[%s10294_s29 + $0x30] sm:$0xff]  ;;  %v924_v59 = vld [vmem:[%s10294_s29 + $0x28] sm:$0xff]  ;;  %s8505_s9 = sld [smem:[%s11251_s0 + %s10127_s6]]   ;;  %s10130_s18 = smov 21  }
  0x12   :  { %9107 = vmatprep.subr.mxu1 %v10113_v21  ;;  %9118 = vmatprep.subr.mxu0 %v10113_v21  ;;  %v919_v60 = vld [vmem:[%s10294_s29] sm:$0xff]  ;;  %v930_v62 = vld [vmem:[%s10294_s29 + $0x58] sm:$0xff]  ;;  %v929_v0 = vld [vmem:[%s10294_s29 + $0x50] sm:$0xff]  ;;  %s8501_s13 = sld [smem:[%s11251_s0 + %s10128_s10]]   ;;  %s10131_s22 = smov 19  }
  0x13   :  { %9108 = vmatpush3.msra.mxu1 %v10215_v28  ;;  %9119 = vmatpush3.msra.mxu0 %v10218_v29  ;;  %v923_v61 = vld [vmem:[%s10294_s29 + $0x20] sm:$0xff]  ;;  %v934_v63 = vld [vmem:[%s10294_s29 + $0x78] sm:$0xff]  ;;  %v933_v1 = vld [vmem:[%s10294_s29 + $0x70] sm:$0xff]  ;;  %s8503_s17 = sld [smem:[%s11251_s0 + %s10129_s14]]   ;;  %s10132_s26 = smov 20  }
  0x14   :  { %9109 = vmatprep.mubr.msk.f32.mxu1 %vm10114_vm2, %v10113_v21  ;;  %9123 = vmatprep.subr.mxu1 %v10113_v21  ;;  %v928_v2 = vld [vmem:[%s10294_s29 + $0x48] sm:$0xff]  ;;  %s10709_s21 = sld [smem:[%s11251_s0 + %s10130_s18]]   ;;  %s10133_s30 = smov 23  }
  0x15   :  { %9134 = vmatprep.subr.mxu0 %v10113_v21  ;;  %v932_v3 = vld [vmem:[%s10294_s29 + $0x68] sm:$0xff]  ;;  %s8506_s25 = sld [smem:[%s11251_s0 + %s10131_s22]]   ;;  %s10134_s4 = smov 25  }
  0x16   :  { %s10135_s8 = smov 24   ;;  %s10136_s12 = smov 22  }
  0x17   :  { %s10137_s16 = smov 26   ;;  %s10138_s20 = smov 27  }
  0x18   :  { %s10139_s24 = smov 28   ;;  %s10140_s28 = smov 29  }
  0x19   :  { %s10141_s2 = smov 31   ;;  %s10142_s6 = smov 33  }
  0x1a   :  { %s10143_s10 = smov 34   ;;  %s10144_s14 = smov 30  }
  0x1b   :  { %s10145_s18 = smov 32   ;;  %s10146_s22 = smov 37  }
  0xcc   :  { %v9100_v4 = vpop.f32.mrf.mxu1 }
  0xcd   :  { %v260_v8 = vadd.f32 %v9100_v4, %v8529_v5  ;;  %v927_v4 = vld [vmem:[%s10294_s29 + $0x40] sm:$0xff] }
  0xce   :  { %v254_v6 = vpop.f32.mrf.mxu1 }
  0xcf   :  { %v255_v7 = vadd.f32 %v8529_v5, %v254_v6  ;;  %v267_v10 = vsel %vm263_vm1, %v260_v8, 0.0  ;;  %v931_v5 = vld [vmem:[%s10294_s29 + $0x60] sm:$0xff]  ;;  %v1526_v6 = vld [vmem:[%s10379_s3 + $0x18] sm:$0xff]  ;;  %s8507_s29 = sld [smem:[%s11251_s0 + %s10132_s26]]   ;;  %s10147_s26 = smov 35  }
  0xd1   :  { %v264_v9 = vsel %vm263_vm1, %v255_v7, 0.0 }
  0xd2   :  { %265 = vadd.xlane.f32.xlu0 %v264_v9  ;;  %v1529_v9 = vld [vmem:[%s10379_s3 + $0x30] sm:$0xff] }
  0xd6   :  { %268 = vadd.xlane.f32.xlu0 %v267_v10  ;;  %v1524_v10 = vld [vmem:[%s10379_s3 + $0x8] sm:$0xff] }
 0x15b   :  { %v266_v11 = vpop.xlane.xlu0 %265 }
 0x15c   :  { %v271_v12 = vmul.f32 0.03125, %v266_v11  ;;  %v1528_v11 = vld [vmem:[%s10379_s3 + $0x28] sm:$0xff] }
 0x15e   :  { %v273_v13 = vsub.f32 %v255_v7, %v271_v12  ;;  %v1530_v7 = vld [vmem:[%s10379_s3 + $0x38] sm:$0xff]  ;;  %v1523_v12 = vld [vmem:[%s10379_s3] sm:$0xff] }
 0x15f   :  { %v269_v14 = vpop.xlane.xlu0 %268 }
 0x160   :  { %v272_v15 = vmul.f32 0.03125, %v269_v14  ;;  %v275_v16 = vmul.f32 %v273_v13, %v273_v13  ;;  %v1534_v14 = vld [vmem:[%s10379_s3 + $0x58] sm:$0xff] }
 0x162   :  { %v10171_v17 = vsub.f32 %v260_v8, %v272_v15  ;;  %v277_v18 = vsel %vm263_vm1, %v275_v16, 0.0  ;;  %v1525_v8 = vld [vmem:[%s10379_s3 + $0x10] sm:$0xff]  ;;  %v1538_v15 = vld [vmem:[%s10379_s3 + $0x78] sm:$0xff] }
 0x163   :  { %278 = vadd.xlane.f32.xlu1 %v277_v18  ;;  %v1533_v16 = vld [vmem:[%s10379_s3 + $0x50] sm:$0xff]  ;;  %v1532_v18 = vld [vmem:[%s10379_s3 + $0x48] sm:$0xff] }
 0x164   :  { %v276_v19 = vmul.f32 %v10171_v17, %v10171_v17 }
 0x166   :  { %v280_v20 = vsel %vm263_vm1, %v276_v19, 0.0  ;;  %v1536_v19 = vld [vmem:[%s10379_s3 + $0x68] sm:$0xff] }
 0x167   :  { %281 = vadd.xlane.f32.xlu1 %v280_v20  ;;  %v1531_v20 = vld [vmem:[%s10379_s3 + $0x40] sm:$0xff] }
 0x1ec   :  { %v279_v30 = vpop.xlane.xlu1 %278 }
 0x1ed   :  { %v283_v31 = vmul.f32 0.03125, %v279_v30 }
 0x1ef   :  { %v285_v32 = vadd.f32 1e-05, %v283_v31 }
 0x1f0   :  { %v282_v33 = vpop.xlane.xlu1 %281 }
 0x1f1   :  { %10026 = vrsqrt.f32 %v285_v32  ;;  %v284_v34 = vmul.f32 0.03125, %v282_v33 }
 0x1f3   :  { %v286_v35 = vadd.f32 1e-05, %v284_v34 }
 0x1f5   :  { %10028 = vrsqrt.f32 %v286_v35 }
 0x1fe   :  { %v10027_v36 = vpop.eup %10026 }
 0x1ff   :  { %v289_v38 = vmul.f32 %v10027_v36, %v273_v13  ;;  %v1527_v13 = vld [vmem:[%s10379_s3 + $0x20] sm:$0xff] }
 0x201   :  { %v298_v40 = vmul.f32 %v8532_v37, %v289_v38 }
 0x202   :  { %v10029_v50 = vpop.eup %10028 }
 0x203   :  { %v10234_v41 = vadd.f32 %v8533_v39, %v298_v40  ;;  %v290_v51 = vmul.f32 %v10029_v50, %v10171_v17  ;;  %v1537_v17 = vld [vmem:[%s10379_s3 + $0x70] sm:$0xff]  ;;  %v8547_v40 = vld [vmem:[%s8495_s7 + $0x1] ss:$0 sm:$0xff] }
 0x205   :  { %9110 = vmatmul.mubr.msk.f32.vlgmr.msra.gmra.mxu1 %vm263_vm1, %v10234_v41  ;;  %9121 = vmatmul.mubr.msk.f32.vlgmr.msra.gmra.mxu0 %vm263_vm1, %v10234_v41  ;;  %v299_v52 = vmul.f32 %v8532_v37, %v290_v51 }
 0x206   :  { %9124 = vmatpush3.msra.mxu1 %v320_v42  ;;  %9135 = vmatpush3.msra.mxu0 %v324_v43 }
 0x207   :  { %9125 = vmatprep.subr.mxu1 %v10113_v21  ;;  %9136 = vmatprep.subr.mxu0 %v10113_v21  ;;  %v10277_v53 = vadd.f32 %v8533_v39, %v299_v52  ;;  %v8546_v39 = vld [vmem:[%s8495_s7] ss:$0 sm:$0xff]  ;;  %v8548_v52 = vld [vmem:[%s8495_s7 + $0x2] ss:$0 sm:$0xff] }
 0x208   :  { %9126 = vmatpush3.msra.mxu1 %v319_v44  ;;  %9137 = vmatpush3.msra.mxu0 %v323_v45 }
 0x209   :  { %9127 = vmatprep.subr.mxu1 %v10113_v21  ;;  %9138 = vmatprep.subr.mxu0 %v10113_v21 }
 0x20a   :  { %9128 = vmatpush3.msra.mxu1 %v318_v46  ;;  %9139 = vmatpush3.msra.mxu0 %v322_v47 }
 0x20b   :  { %9129 = vmatprep.subr.mxu1 %v10113_v21  ;;  %9140 = vmatprep.subr.mxu0 %v10113_v21 }
 0x20c   :  { %9130 = vmatpush3.msra.mxu1 %v317_v48  ;;  %9131 = vmatprep.mubr.msk.f32.mxu1 %vm10114_vm2, %v10113_v21 }
 0x20d   :  { %9141 = vmatpush3.msra.mxu0 %v321_v49  ;;  %9142 = vmatprep.mubr.msk.f32.mxu0 %vm10114_vm2, %v10113_v21 }
 0x20e   :  { %9132 = vmatmul.mubr.msk.f32.vlgmr.msra.gmra.mxu1 %vm263_vm1, %v10234_v41  ;;  %9143 = vmatmul.mubr.msk.f32.vlgmr.msra.gmra.mxu0 %vm263_vm1, %v10234_v41 }
 0x20f   :  { %9145 = vmatprep.subr.mxu1 %v10113_v21  ;;  %9156 = vmatprep.subr.mxu0 %v10113_v21 }
 0x210   :  { %9146 = vmatpush3.msra.mxu1 %v10185_v22  ;;  %9157 = vmatpush3.msra.mxu0 %v10188_v23  ;;  %v1535_v22 = vld [vmem:[%s10379_s3 + $0x60] sm:$0xff]  ;;  %s10735_s3 = sld [smem:[%s11251_s0 + %s10133_s30]]   ;;  %s10148_s30 = smov 36  }
 0x211   :  { %9147 = vmatprep.subr.mxu1 %v10113_v21  ;;  %9158 = vmatprep.subr.mxu0 %v10113_v21 }
 0x212   :  { %9148 = vmatpush3.msra.mxu1 %v10195_v24  ;;  %9159 = vmatpush3.msra.mxu0 %v10198_v25 }
 0x213   :  { %9149 = vmatprep.subr.mxu1 %v10113_v21  ;;  %9160 = vmatprep.subr.mxu0 %v10113_v21 }
 0x214   :  { %9150 = vmatpush3.msra.mxu1 %v10205_v26  ;;  %9161 = vmatpush3.msra.mxu0 %v10208_v27 }
 0x215   :  { %9151 = vmatprep.subr.mxu1 %v10113_v21  ;;  %9162 = vmatprep.subr.mxu0 %v10113_v21 }
 0x216   :  { %9152 = vmatpush3.msra.mxu1 %v10215_v28  ;;  %9153 = vmatprep.mubr.msk.f32.mxu1 %vm10114_vm2, %v10113_v21 }
 0x217   :  { %9163 = vmatpush3.msra.mxu0 %v10218_v29  ;;  %9164 = vmatprep.mubr.msk.f32.mxu0 %vm10114_vm2, %v10113_v21 }
 0x218   :  { %9154 = vmatmul.mubr.msk.f32.vlgmr.msra.gmra.mxu1 %vm263_vm1, %v10277_v53  ;;  %9165 = vmatmul.mubr.msk.f32.vlgmr.msra.gmra.mxu0 %vm263_vm1, %v10277_v53 }
 0x219   :  { %9167 = vmatprep.subr.mxu1 %v10113_v21  ;;  %9178 = vmatprep.subr.mxu0 %v10113_v21 }
 0x21a   :  { %9168 = vmatpush3.msra.mxu1 %v320_v42  ;;  %9179 = vmatpush3.msra.mxu0 %v324_v43 }
 0x21b   :  { %9169 = vmatprep.subr.mxu1 %v10113_v21  ;;  %9180 = vmatprep.subr.mxu0 %v10113_v21 }
 0x21c   :  { %9170 = vmatpush3.msra.mxu1 %v319_v44  ;;  %9181 = vmatpush3.msra.mxu0 %v323_v45  ;;  %v8534_v44 = vld [vmem:[%s8493_s11] ss:$0 sm:$0xff]  ;;  %v8535_v45 = vld [vmem:[%s8493_s11 + $0x1] ss:$0 sm:$0xff] }
 0x21d   :  { %9171 = vmatprep.subr.mxu1 %v10113_v21  ;;  %9182 = vmatprep.subr.mxu0 %v10113_v21 }
 0x21e   :  { %9172 = vmatpush3.msra.mxu1 %v318_v46  ;;  %9183 = vmatpush3.msra.mxu0 %v322_v47 }
 0x21f   :  { %9173 = vmatprep.subr.mxu1 %v10113_v21  ;;  %9184 = vmatprep.subr.mxu0 %v10113_v21 }
 0x220   :  { %9174 = vmatpush3.msra.mxu1 %v317_v48  ;;  %9175 = vmatprep.mubr.msk.f32.mxu1 %vm10114_vm2, %v10113_v21 }
 0x221   :  { %9185 = vmatpush3.msra.mxu0 %v321_v49  ;;  %9186 = vmatprep.mubr.msk.f32.mxu0 %vm10114_vm2, %v10113_v21 }
 0x222   :  { %9176 = vmatmul.mubr.msk.f32.vlgmr.msra.gmra.mxu1 %vm263_vm1, %v10277_v53  ;;  %9187 = vmatmul.mubr.msk.f32.vlgmr.msra.gmra.mxu0 %vm263_vm1, %v10277_v53 }
 0x223   :  { %9189 = vmatprep.subr.mxu1 %v10113_v21  ;;  %9200 = vmatprep.subr.mxu0 %v10113_v21 }
 0x224   :  { %9190 = vmatpush3.msra.mxu1 %v922_v54  ;;  %9201 = vmatpush3.msra.mxu0 %v926_v55 }
 0x225   :  { %9191 = vmatprep.subr.mxu1 %v10113_v21  ;;  %9202 = vmatprep.subr.mxu0 %v10113_v21 }
 0x226   :  { %9192 = vmatpush3.msra.mxu1 %v921_v56  ;;  %9203 = vmatpush3.msra.mxu0 %v925_v57 }
 0x227   :  { %9193 = vmatprep.subr.mxu1 %v10113_v21  ;;  %9204 = vmatprep.subr.mxu0 %v10113_v21 }
 0x228   :  { %9194 = vmatpush3.msra.mxu1 %v920_v58  ;;  %9205 = vmatpush3.msra.mxu0 %v924_v59 }
 0x229   :  { %9195 = vmatprep.subr.mxu1 %v10113_v21  ;;  %9206 = vmatprep.subr.mxu0 %v10113_v21 }
 0x22a   :  { %9196 = vmatpush3.msra.mxu1 %v919_v60  ;;  %9197 = vmatprep.mubr.msk.f32.mxu1 %vm10114_vm2, %v10113_v21 }
 0x22b   :  { %9207 = vmatpush3.msra.mxu0 %v923_v61  ;;  %9208 = vmatprep.mubr.msk.f32.mxu0 %vm10114_vm2, %v10113_v21 }
 0x22c   :  { %9198 = vmatmul.mubr.msk.f32.vlgmr.msra.gmra.mxu1 %vm263_vm1, %v10234_v41  ;;  %9209 = vmatmul.mubr.msk.f32.vlgmr.msra.gmra.mxu0 %vm263_vm1, %v10234_v41 }
 0x22d   :  { %9211 = vmatprep.subr.mxu1 %v10113_v21  ;;  %9222 = vmatprep.subr.mxu0 %v10113_v21 }
 0x22e   :  { %9212 = vmatpush3.msra.mxu1 %v930_v62  ;;  %9223 = vmatpush3.msra.mxu0 %v934_v63 }
 0x22f   :  { %9213 = vmatprep.subr.mxu1 %v10113_v21  ;;  %9224 = vmatprep.subr.mxu0 %v10113_v21 }
 0x230   :  { %9214 = vmatpush3.msra.mxu1 %v929_v0  ;;  %9225 = vmatpush3.msra.mxu0 %v933_v1 }
 0x231   :  { %9215 = vmatprep.subr.mxu1 %v10113_v21  ;;  %9226 = vmatprep.subr.mxu0 %v10113_v21 }
 0x232   :  { %9216 = vmatpush3.msra.mxu1 %v928_v2  ;;  %9227 = vmatpush3.msra.mxu0 %v932_v3 }
 0x233   :  { %9217 = vmatprep.subr.mxu1 %v10113_v21  ;;  %9228 = vmatprep.subr.mxu0 %v10113_v21 }
 0x234   :  { %9218 = vmatpush3.msra.mxu1 %v927_v4  ;;  %9219 = vmatprep.mubr.msk.f32.mxu1 %vm10114_vm2, %v10113_v21 }
 0x235   :  { %9229 = vmatpush3.msra.mxu0 %v931_v5  ;;  %9230 = vmatprep.mubr.msk.f32.mxu0 %vm10114_vm2, %v10113_v21 }
 0x236   :  { %9220 = vmatmul.mubr.msk.f32.vlgmr.msra.gmra.mxu1 %vm263_vm1, %v10234_v41  ;;  %9231 = vmatmul.mubr.msk.f32.vlgmr.msra.gmra.mxu0 %vm263_vm1, %v10234_v41 }
 0x237   :  { %9233 = vmatprep.subr.mxu1 %v10113_v21  ;;  %9244 = vmatprep.subr.mxu0 %v10113_v21 }
 0x238   :  { %9234 = vmatpush3.msra.mxu1 %v922_v54  ;;  %9245 = vmatpush3.msra.mxu0 %v926_v55  ;;  %v8549_v54 = vld [vmem:[%s8495_s7 + $0x3] ss:$0 sm:$0xff]  ;;  %s10840_s7 = sld [smem:[%s11251_s0 + %s10134_s4]]   ;;  %s10149_s4 = smov 39  }
 0x239   :  { %9235 = vmatprep.subr.mxu1 %v10113_v21  ;;  %9246 = vmatprep.subr.mxu0 %v10113_v21 }
 0x23a   :  { %9236 = vmatpush3.msra.mxu1 %v921_v56  ;;  %9247 = vmatpush3.msra.mxu0 %v925_v57  ;;  %v8536_v57 = vld [vmem:[%s8493_s11 + $0x2] ss:$0 sm:$0xff] }
 0x23b   :  { %9237 = vmatprep.subr.mxu1 %v10113_v21  ;;  %9248 = vmatprep.subr.mxu0 %v10113_v21 }
 0x23c   :  { %9238 = vmatpush3.msra.mxu1 %v920_v58  ;;  %9249 = vmatpush3.msra.mxu0 %v924_v59  ;;  %v8537_v58 = vld [vmem:[%s8493_s11 + $0x3] ss:$0 sm:$0xff]  ;;  %s10990_s11 = sld [smem:[%s11251_s0 + %s10135_s8]]   ;;  %s10150_s8 = smov 38  }
 0x23d   :  { %9239 = vmatprep.subr.mxu1 %v10113_v21  ;;  %9250 = vmatprep.subr.mxu0 %v10113_v21 }
 0x23e   :  { %9240 = vmatpush3.msra.mxu1 %v919_v60  ;;  %9241 = vmatprep.mubr.msk.f32.mxu1 %vm10114_vm2, %v10113_v21 }
 0x23f   :  { %9251 = vmatpush3.msra.mxu0 %v923_v61  ;;  %9252 = vmatprep.mubr.msk.f32.mxu0 %vm10114_vm2, %v10113_v21 }
 0x240   :  { %9242 = vmatmul.mubr.msk.f32.vlgmr.msra.gmra.mxu1 %vm263_vm1, %v10277_v53  ;;  %9253 = vmatmul.mubr.msk.f32.vlgmr.msra.gmra.mxu0 %vm263_vm1, %v10277_v53 }
 0x241   :  { %9255 = vmatprep.subr.mxu1 %v10113_v21  ;;  %9266 = vmatprep.subr.mxu0 %v10113_v21 }
 0x242   :  { %9256 = vmatpush3.msra.mxu1 %v930_v62  ;;  %9267 = vmatpush3.msra.mxu0 %v934_v63 }
 0x243   :  { %9257 = vmatprep.subr.mxu1 %v10113_v21  ;;  %9268 = vmatprep.subr.mxu0 %v10113_v21 }
 0x244   :  { %9258 = vmatpush3.msra.mxu1 %v929_v0  ;;  %9269 = vmatpush3.msra.mxu0 %v933_v1 }
 0x245   :  { %9259 = vmatprep.subr.mxu1 %v10113_v21  ;;  %9270 = vmatprep.subr.mxu0 %v10113_v21 }
 0x246   :  { %9260 = vmatpush3.msra.mxu1 %v928_v2  ;;  %9271 = vmatpush3.msra.mxu0 %v932_v3 }
 0x247   :  { %9261 = vmatprep.subr.mxu1 %v10113_v21  ;;  %9272 = vmatprep.subr.mxu0 %v10113_v21 }
 0x248   :  { %9262 = vmatpush3.msra.mxu1 %v927_v4  ;;  %9263 = vmatprep.mubr.msk.f32.mxu1 %vm10114_vm2, %v10113_v21 }
 0x249   :  { %9273 = vmatpush3.msra.mxu0 %v931_v5  ;;  %9274 = vmatprep.mubr.msk.f32.mxu0 %vm10114_vm2, %v10113_v21 }
 0x24a   :  { %9264 = vmatmul.mubr.msk.f32.vlgmr.msra.gmra.mxu1 %vm263_vm1, %v10277_v53  ;;  %9275 = vmatmul.mubr.msk.f32.vlgmr.msra.gmra.mxu0 %vm263_vm1, %v10277_v53 }
 0x24b   :  { %9277 = vmatprep.subr.mxu1 %v10113_v21  ;;  %9288 = vmatprep.subr.mxu0 %v10113_v21 }
 0x24c   :  { %9278 = vmatpush3.msra.mxu1 %v1526_v6  ;;  %9289 = vmatpush3.msra.mxu0 %v1530_v7 }
 0x24d   :  { %9279 = vmatprep.subr.mxu1 %v10113_v21  ;;  %9290 = vmatprep.subr.mxu0 %v10113_v21 }
 0x24e   :  { %9280 = vmatpush3.msra.mxu1 %v1525_v8  ;;  %9291 = vmatpush3.msra.mxu0 %v1529_v9 }
 0x24f   :  { %9281 = vmatprep.subr.mxu1 %v10113_v21  ;;  %9292 = vmatprep.subr.mxu0 %v10113_v21 }
 0x250   :  { %9282 = vmatpush3.msra.mxu1 %v1524_v10  ;;  %9293 = vmatpush3.msra.mxu0 %v1528_v11 }
 0x251   :  { %9283 = vmatprep.subr.mxu1 %v10113_v21  ;;  %9294 = vmatprep.subr.mxu0 %v10113_v21 }
 0x252   :  { %9284 = vmatpush3.msra.mxu1 %v1523_v12  ;;  %9285 = vmatprep.mubr.msk.f32.mxu1 %vm10114_vm2, %v10113_v21 }
 0x253   :  { %9295 = vmatpush3.msra.mxu0 %v1527_v13  ;;  %9296 = vmatprep.mubr.msk.f32.mxu0 %vm10114_vm2, %v10113_v21 }
 0x254   :  { %9286 = vmatmul.mubr.msk.f32.vlgmr.msra.gmra.mxu1 %vm263_vm1, %v10234_v41  ;;  %9297 = vmatmul.mubr.msk.f32.vlgmr.msra.gmra.mxu0 %vm263_vm1, %v10234_v41 }
 0x255   :  { %9299 = vmatprep.subr.mxu1 %v10113_v21  ;;  %9310 = vmatprep.subr.mxu0 %v10113_v21 }
 0x256   :  { %9300 = vmatpush3.msra.mxu1 %v1534_v14  ;;  %9311 = vmatpush3.msra.mxu0 %v1538_v15 }
 0x257   :  { %9301 = vmatprep.subr.mxu1 %v10113_v21  ;;  %9312 = vmatprep.subr.mxu0 %v10113_v21 }
 0x258   :  { %9302 = vmatpush3.msra.mxu1 %v1533_v16  ;;  %9313 = vmatpush3.msra.mxu0 %v1537_v17 }
 0x259   :  { %9303 = vmatprep.subr.mxu1 %v10113_v21  ;;  %9314 = vmatprep.subr.mxu0 %v10113_v21 }
 0x25a   :  { %9304 = vmatpush3.msra.mxu1 %v1532_v18  ;;  %9315 = vmatpush3.msra.mxu0 %v1536_v19 }
 0x25b   :  { %9305 = vmatprep.subr.mxu1 %v10113_v21  ;;  %9316 = vmatprep.subr.mxu0 %v10113_v21 }
 0x25c   :  { %9306 = vmatpush3.msra.mxu1 %v1531_v20  ;;  %9307 = vmatprep.mubr.msk.f32.mxu1 %vm10114_vm2, %v10113_v21 }
 0x25d   :  { %9317 = vmatpush3.msra.mxu0 %v1535_v22  ;;  %9318 = vmatprep.mubr.msk.f32.mxu0 %vm10114_vm2, %v10113_v21 }
 0x25e   :  { %9308 = vmatmul.mubr.msk.f32.vlgmr.msra.gmra.mxu1 %vm263_vm1, %v10234_v41  ;;  %9319 = vmatmul.mubr.msk.f32.vlgmr.msra.gmra.mxu0 %vm263_vm1, %v10234_v41 }
 0x25f   :  { %9321 = vmatprep.subr.mxu1 %v10113_v21  ;;  %9332 = vmatprep.subr.mxu0 %v10113_v21 }
 0x260   :  { %9322 = vmatpush3.msra.mxu1 %v1526_v6  ;;  %9333 = vmatpush3.msra.mxu0 %v1530_v7 }
 0x261   :  { %9323 = vmatprep.subr.mxu1 %v10113_v21  ;;  %9334 = vmatprep.subr.mxu0 %v10113_v21 }
 0x262   :  { %9324 = vmatpush3.msra.mxu1 %v1525_v8  ;;  %9335 = vmatpush3.msra.mxu0 %v1529_v9 }
 0x263   :  { %9325 = vmatprep.subr.mxu1 %v10113_v21  ;;  %9336 = vmatprep.subr.mxu0 %v10113_v21 }
 0x264   :  { %9326 = vmatpush3.msra.mxu1 %v1524_v10  ;;  %9337 = vmatpush3.msra.mxu0 %v1528_v11 }
 0x265   :  { %9327 = vmatprep.subr.mxu1 %v10113_v21  ;;  %9338 = vmatprep.subr.mxu0 %v10113_v21 }
 0x266   :  { %9328 = vmatpush3.msra.mxu1 %v1523_v12  ;;  %9329 = vmatprep.mubr.msk.f32.mxu1 %vm10114_vm2, %v10113_v21 }
 0x267   :  { %9339 = vmatpush3.msra.mxu0 %v1527_v13  ;;  %9340 = vmatprep.mubr.msk.f32.mxu0 %vm10114_vm2, %v10113_v21 }
 0x268   :  { %9330 = vmatmul.mubr.msk.f32.vlgmr.msra.gmra.mxu1 %vm263_vm1, %v10277_v53  ;;  %9341 = vmatmul.mubr.msk.f32.vlgmr.msra.gmra.mxu0 %vm263_vm1, %v10277_v53 }
 0x269   :  { %9343 = vmatprep.subr.mxu1 %v10113_v21  ;;  %9354 = vmatprep.subr.mxu0 %v10113_v21 }
 0x26a   :  { %9344 = vmatpush3.msra.mxu1 %v1534_v14  ;;  %9355 = vmatpush3.msra.mxu0 %v1538_v15 }
 0x26b   :  { %9345 = vmatprep.subr.mxu1 %v10113_v21  ;;  %9356 = vmatprep.subr.mxu0 %v10113_v21 }
 0x26c   :  { %9346 = vmatpush3.msra.mxu1 %v1533_v16  ;;  %9357 = vmatpush3.msra.mxu0 %v1537_v17  ;;  %v8558_v17 = vld [vmem:[%s8497_s15] ss:$0 sm:$0xff] }
 0x26d   :  { %9347 = vmatprep.subr.mxu1 %v10113_v21  ;;  %9358 = vmatprep.subr.mxu0 %v10113_v21 }
 0x26e   :  { %9348 = vmatpush3.msra.mxu1 %v1532_v18  ;;  %9359 = vmatpush3.msra.mxu0 %v1536_v19  ;;  %v8559_v18 = vld [vmem:[%s8497_s15 + $0x1] ss:$0 sm:$0xff] }
 0x26f   :  { %9349 = vmatprep.subr.mxu1 %v10113_v21  ;;  %9360 = vmatprep.subr.mxu0 %v10113_v21 }
 0x270   :  { %9350 = vmatpush3.msra.mxu1 %v1531_v20  ;;  %9351 = vmatprep.mubr.msk.f32.mxu1 %vm10114_vm2, %v10113_v21 }
 0x271   :  { %9361 = vmatpush3.msra.mxu0 %v1535_v22  ;;  %9362 = vmatprep.mubr.msk.f32.mxu0 %vm10114_vm2, %v10113_v21 }
 0x272   :  { %9352 = vmatmul.mubr.msk.f32.vlgmr.msra.gmra.mxu1 %vm263_vm1, %v10277_v53  ;;  %9363 = vmatmul.mubr.msk.f32.vlgmr.msra.gmra.mxu0 %vm263_vm1, %v10277_v53 }
 0x273   :  { %9365 = vmatprep.subr.mxu1 %v10113_v21  ;;  %9370 = vmatprep.subr.mxu0 %v10113_v21 }
 0x274   :  { %9367 = vmatprep.mubr.msk.f32.mxu1 %vm10114_vm2, %v10113_v21  ;;  %9372 = vmatprep.mubr.msk.f32.mxu0 %vm10114_vm2, %v10113_v21 }
 0x2c5   :  { %v422_v23 = vpop.f32.mrf.mxu1  ;;  %v492_v24 = vpop.f32.mrf.mxu0 }
 0x2c6   :  { %v423_v50 = vadd.f32 %v8534_v44, %v422_v23  ;;  %v493_v51 = vadd.f32 %v8535_v45, %v492_v24 }
 0x2c7   :  { %v9111_v25 = vpop.f32.mrf.mxu1  ;;  %v9122_v26 = vpop.f32.mrf.mxu0 }
 0x2c8   :  { %v8560_v26 = vld [vmem:[%s8497_s15 + $0x2] ss:$0 sm:$0xff] }
 0x2ce   :  { %v562_v27 = vpop.f32.mrf.mxu1  ;;  %v632_v28 = vpop.f32.mrf.mxu0 }
 0x2cf   :  { %v563_v63 = vadd.f32 %v8536_v57, %v562_v27  ;;  %v633_v0 = vadd.f32 %v8537_v58, %v632_v28  ;;  %v8561_v27 = vld [vmem:[%s8497_s15 + $0x3] ss:$0 sm:$0xff]  ;;  %s10995_s15 = sld [smem:[%s11251_s0 + %s10136_s12]]   ;;  %s10151_s12 = smov 40  }
 0x2d0   :  { %v9133_v29 = vpop.f32.mrf.mxu1  ;;  %v9144_v30 = vpop.f32.mrf.mxu0 }
 0x2d8   :  { %v705_v31 = vpop.f32.mrf.mxu1  ;;  %v775_v32 = vpop.f32.mrf.mxu0 }
 0x2d9   :  { %v706_v7 = vadd.f32 %v8534_v44, %v705_v31  ;;  %v776_v8 = vadd.f32 %v8535_v45, %v775_v32 }
 0x2da   :  { %v9155_v33 = vpop.f32.mrf.mxu1  ;;  %v9166_v34 = vpop.f32.mrf.mxu0 }
 0x2e2   :  { %v10481_v35 = vpop.f32.mrf.mxu1  ;;  %v10483_v36 = vpop.f32.mrf.mxu0 }
 0x2e3   :  { %v846_v15 = vadd.f32 %v8536_v57, %v10481_v35  ;;  %v916_v16 = vadd.f32 %v8537_v58, %v10483_v36 }
 0x2e4   :  { %v9177_v37 = vpop.f32.mrf.mxu1  ;;  %v9188_v38 = vpop.f32.mrf.mxu0 }
 0x2ec   :  { %v1029_v42 = vpop.f32.mrf.mxu1  ;;  %v1099_v43 = vpop.f32.mrf.mxu0 }
 0x2ed   :  { %v1030_v46 = vadd.f32 %v8546_v39, %v1029_v42  ;;  %v1100_v47 = vadd.f32 %v8547_v40, %v1099_v43 }
 0x2ee   :  { %v9199_v48 = vpop.f32.mrf.mxu1  ;;  %v9210_v49 = vpop.f32.mrf.mxu0 }
 0x2ef   :  { %9366 = vmatpush3.xpose.msk.msra.mxu1 %vm2127_vm3, %v1030_v46  ;;  %9371 = vmatpush3.xpose.msk.msra.mxu0 %vm2127_vm3, %v1100_v47 }
 0x2f0   :  { %9375 = vmatprep.subr.mxu1 %v10113_v21  ;;  %9380 = vmatprep.subr.mxu0 %v10113_v21 }
 0x2f2   :  { %9368 = vmatmul.mubr.msk.f32.vlgmr.msra.gmra.mxu1 %vm2127_vm3, %v423_v50  ;;  %9373 = vmatmul.mubr.msk.f32.vlgmr.msra.gmra.mxu0 %vm2127_vm3, %v493_v51 }
 0x2f3   :  { %9377 = vmatprep.mubr.msk.f32.mxu1 %vm10114_vm2, %v10113_v21  ;;  %9382 = vmatprep.mubr.msk.f32.mxu0 %vm10114_vm2, %v10113_v21 }
 0x2f6   :  { %v1169_v55 = vpop.f32.mrf.mxu1  ;;  %v1239_v56 = vpop.f32.mrf.mxu0 }
 0x2f7   :  { %v1170_v59 = vadd.f32 %v8548_v52, %v1169_v55  ;;  %v1240_v60 = vadd.f32 %v8549_v54, %v1239_v56 }
 0x2f8   :  { %v9221_v61 = vpop.f32.mrf.mxu1  ;;  %v9232_v62 = vpop.f32.mrf.mxu0 }
 0x2f9   :  { %9376 = vmatpush3.xpose.msk.msra.mxu1 %vm2127_vm3, %v1170_v59  ;;  %9381 = vmatpush3.xpose.msk.msra.mxu0 %vm2127_vm3, %v1240_v60 }
 0x2fa   :  { %9385 = vmatprep.subr.mxu1 %v10113_v21  ;;  %9390 = vmatprep.subr.mxu0 %v10113_v21 }
 0x2fc   :  { %9378 = vmatmul.mubr.msk.f32.vlgmr.msra.gmra.mxu1 %vm2127_vm3, %v563_v63  ;;  %9383 = vmatmul.mubr.msk.f32.vlgmr.msra.gmra.mxu0 %vm2127_vm3, %v633_v0 }
 0x2fd   :  { %9387 = vmatprep.mubr.msk.f32.mxu1 %vm10114_vm2, %v10113_v21  ;;  %9392 = vmatprep.mubr.msk.f32.mxu0 %vm10114_vm2, %v10113_v21 }
 0x300   :  { %v1309_v1 = vpop.f32.mrf.mxu1  ;;  %v1379_v2 = vpop.f32.mrf.mxu0 }
 0x301   :  { %v1310_v3 = vadd.f32 %v8546_v39, %v1309_v1  ;;  %v1380_v4 = vadd.f32 %v8547_v40, %v1379_v2 }
 0x302   :  { %v9243_v5 = vpop.f32.mrf.mxu1  ;;  %v9254_v6 = vpop.f32.mrf.mxu0 }
 0x303   :  { %9386 = vmatpush3.xpose.msk.msra.mxu1 %vm2127_vm3, %v1310_v3  ;;  %9391 = vmatpush3.xpose.msk.msra.mxu0 %vm2127_vm3, %v1380_v4 }
 0x304   :  { %9395 = vmatprep.subr.mxu1 %v10113_v21  ;;  %9400 = vmatprep.subr.mxu0 %v10113_v21 }
 0x306   :  { %9388 = vmatmul.mubr.msk.f32.vlgmr.msra.gmra.mxu1 %vm2127_vm3, %v706_v7  ;;  %9393 = vmatmul.mubr.msk.f32.vlgmr.msra.gmra.mxu0 %vm2127_vm3, %v776_v8 }
 0x307   :  { %9397 = vmatprep.mubr.msk.f32.mxu1 %vm10114_vm2, %v10113_v21  ;;  %9402 = vmatprep.mubr.msk.f32.mxu0 %vm10114_vm2, %v10113_v21 }
 0x30a   :  { %v1449_v9 = vpop.f32.mrf.mxu1  ;;  %v1519_v10 = vpop.f32.mrf.mxu0 }
 0x30b   :  { %v1450_v11 = vadd.f32 %v8548_v52, %v1449_v9  ;;  %v1520_v12 = vadd.f32 %v8549_v54, %v1519_v10 }
 0x30c   :  { %v9265_v13 = vpop.f32.mrf.mxu1  ;;  %v9276_v14 = vpop.f32.mrf.mxu0 }
 0x30d   :  { %9396 = vmatpush3.xpose.msk.msra.mxu1 %vm2127_vm3, %v1450_v11  ;;  %9401 = vmatpush3.xpose.msk.msra.mxu0 %vm2127_vm3, %v1520_v12 }
 0x30e   :  { %9405 = vmatprep.subr.mxu1 %v10113_v21  ;;  %9410 = vmatprep.subr.mxu0 %v10113_v21 }
 0x310   :  { %9398 = vmatmul.mubr.msk.f32.vlgmr.msra.gmra.mxu1 %vm2127_vm3, %v846_v15  ;;  %9403 = vmatmul.mubr.msk.f32.vlgmr.msra.gmra.mxu0 %vm2127_vm3, %v916_v16 }
 0x311   :  { %9412 = vmatprep.mubr.msk.f32.mxu0 %vm10114_vm2, %v10113_v21  ;;  %9407 = vmatprep.mubr.msk.f32.mxu1 %vm10114_vm2, %v10113_v21 }
 0x314   :  { %v1633_v19 = vpop.f32.mrf.mxu1  ;;  %v1703_v20 = vpop.f32.mrf.mxu0 }
 0x315   :  { %v1634_v22 = vadd.f32 %v8558_v17, %v1633_v19  ;;  %v1704_v23 = vadd.f32 %v8559_v18, %v1703_v20 }
 0x316   :  { %v9287_v24 = vpop.f32.mrf.mxu1  ;;  %v9298_v25 = vpop.f32.mrf.mxu0 }
 0x317   :  { %9406 = vmatpush3.msra.mxu1 %v1634_v22  ;;  %9411 = vmatpush3.msra.mxu0 %v1704_v23 }
 0x318   :  { %9420 = vmatprep.subr.mxu0 %v10113_v21  ;;  %9415 = vmatprep.subr.mxu1 %v10113_v21 }
 0x31e   :  { %v1773_v28 = vpop.f32.mrf.mxu1  ;;  %v1843_v29 = vpop.f32.mrf.mxu0 }
 0x31f   :  { %v10538_v30 = vadd.f32 %v8560_v26, %v1773_v28  ;;  %v10540_v31 = vadd.f32 %v8561_v27, %v1843_v29 }
 0x320   :  { %v9309_v32 = vpop.f32.mrf.mxu1  ;;  %v9320_v33 = vpop.f32.mrf.mxu0 }
 0x328   :  { %v1913_v34 = vpop.f32.mrf.mxu1  ;;  %v1983_v35 = vpop.f32.mrf.mxu0 }
 0x329   :  { %v10542_v36 = vadd.f32 %v8558_v17, %v1913_v34  ;;  %v10544_v37 = vadd.f32 %v8559_v18, %v1983_v35 }
 0x32a   :  { %v9331_v38 = vpop.f32.mrf.mxu1  ;;  %v9342_v39 = vpop.f32.mrf.mxu0 }
 0x332   :  { %v2053_v40 = vpop.f32.mrf.mxu1  ;;  %v2123_v42 = vpop.f32.mrf.mxu0 }
 0x333   :  { %v10546_v43 = vadd.f32 %v8560_v26, %v2053_v40  ;;  %v10548_v44 = vadd.f32 %v8561_v27, %v2123_v42 }
 0x334   :  { %v9353_v45 = vpop.f32.mrf.mxu1  ;;  %v9364_v46 = vpop.f32.mrf.mxu0 }
 0x3b2   :  { %v2200_v47 = vpop.f32.mrf.mxu1  ;;  %v2276_v48 = vpop.f32.mrf.mxu0 }
 0x3b3   :  { %v2739_v49 = vsel %vm2127_vm3, %v2276_v48, -inf  ;;  %v2736_v50 = vsel %vm2127_vm3, %v2200_v47, -inf }
 0x3b4   :  { %2740 = vmax.xlane.f32.xlu1 %v2739_v49  ;;  %v9374_v51 = vpop.f32.mrf.mxu0  ;;  %2737 = vmax.xlane.f32.xlu0 %v2736_v50  ;;  %v9369_v52 = vpop.f32.mrf.mxu1 }
 0x3bc   :  { %v2352_v54 = vpop.f32.mrf.mxu1  ;;  %v2428_v55 = vpop.f32.mrf.mxu0 }
 0x3bd   :  { %v2745_v56 = vsel %vm2127_vm3, %v2428_v55, -inf  ;;  %v2742_v57 = vsel %vm2127_vm3, %v2352_v54, -inf }
 0x3be   :  { %2746 = vmax.xlane.f32.xlu1 %v2745_v56  ;;  %v9384_v58 = vpop.f32.mrf.mxu0  ;;  %2743 = vmax.xlane.f32.xlu0 %v2742_v57  ;;  %v9379_v59 = vpop.f32.mrf.mxu1 }
 0x3c6   :  { %v2504_v60 = vpop.f32.mrf.mxu1  ;;  %v2580_v61 = vpop.f32.mrf.mxu0 }
 0x3c7   :  { %v2751_v62 = vsel %vm2127_vm3, %v2580_v61, -inf  ;;  %v2748_v63 = vsel %vm2127_vm3, %v2504_v60, -inf }
 0x3c8   :  { %2752 = vmax.xlane.f32.xlu1 %v2751_v62  ;;  %v9394_v0 = vpop.f32.mrf.mxu0  ;;  %2749 = vmax.xlane.f32.xlu0 %v2748_v63  ;;  %v9389_v1 = vpop.f32.mrf.mxu1 }
 0x3d0   :  { %v2656_v2 = vpop.f32.mrf.mxu1  ;;  %v2732_v3 = vpop.f32.mrf.mxu0 }
 0x3d1   :  { %v2757_v4 = vsel %vm2127_vm3, %v2732_v3, -inf  ;;  %v2754_v5 = vsel %vm2127_vm3, %v2656_v2, -inf }
 0x3d2   :  { %2758 = vmax.xlane.f32.xlu1 %v2757_v4  ;;  %v9404_v6 = vpop.f32.mrf.mxu0  ;;  %2755 = vmax.xlane.f32.xlu0 %v2754_v5  ;;  %v9399_v7 = vpop.f32.mrf.mxu1 }
 0x43d   :  { %v2741_v8 = vpop.xlane.xlu1 %2740  ;;  %v2738_v9 = vpop.xlane.xlu0 %2737 }
 0x43e   :  { %v2761_v10 = vsub.f32 %v2276_v48, %v2741_v8  ;;  %v2760_v11 = vsub.f32 %v2200_v47, %v2738_v9 }
 0x440   :  { %v2770_v12 = vmul.f32 1.442695, %v2761_v10  ;;  %v2768_v13 = vmul.f32 1.442695, %v2760_v11 }
 0x442   :  { %10030 = vpow2.f32 %v2770_v12 }
 0x443   :  { %10032 = vpow2.f32 %v2768_v13  ;;  %v3411_v13 = vld [vmem:[%s8498_s19 + $0x18] sm:$0xff] }
 0x447   :  { %v2747_v14 = vpop.xlane.xlu1 %2746  ;;  %v2744_v15 = vpop.xlane.xlu0 %2743 }
 0x448   :  { %v2763_v16 = vsub.f32 %v2428_v55, %v2747_v14  ;;  %v2762_v17 = vsub.f32 %v2352_v54, %v2744_v15  ;;  %v3410_v15 = vld [vmem:[%s8498_s19 + $0x10] sm:$0xff] }
 0x44a   :  { %v2774_v18 = vmul.f32 1.442695, %v2763_v16  ;;  %v2772_v19 = vmul.f32 1.442695, %v2762_v17 }
 0x44c   :  { %10034 = vpow2.f32 %v2774_v18 }
 0x44d   :  { %10036 = vpow2.f32 %v2772_v19 }
 0x44f   :  { %v10031_v20 = vpop.eup %10030 }
 0x450   :  { %v10033_v22 = vpop.eup %10032  ;;  %v2787_v23 = vsel %vm2127_vm3, %v10031_v20, 0.0 }
 0x451   :  { %v2753_v24 = vpop.xlane.xlu1 %2752  ;;  %v2750_v25 = vpop.xlane.xlu0 %2749  ;;  %2788 = vadd.xlane.f32.xlu1 %v2787_v23  ;;  %v2784_v26 = vsel %vm2127_vm3, %v10033_v22, 0.0 }
 0x452   :  { %v2765_v27 = vsub.f32 %v2580_v61, %v2753_v24  ;;  %v2764_v28 = vsub.f32 %v2504_v60, %v2750_v25  ;;  %2785 = vadd.xlane.f32.xlu0 %v2784_v26 }
 0x454   :  { %v2778_v29 = vmul.f32 1.442695, %v2765_v27  ;;  %v2776_v32 = vmul.f32 1.442695, %v2764_v28 }
 0x456   :  { %10038 = vpow2.f32 %v2778_v29 }
 0x457   :  { %10040 = vpow2.f32 %v2776_v32 }
 0x459   :  { %v10035_v33 = vpop.eup %10034 }
 0x45a   :  { %v10037_v34 = vpop.eup %10036  ;;  %v2793_v35 = vsel %vm2127_vm3, %v10035_v33, 0.0 }
 0x45b   :  { %v2759_v38 = vpop.xlane.xlu1 %2758  ;;  %v2756_v39 = vpop.xlane.xlu0 %2755  ;;  %2794 = vadd.xlane.f32.xlu1 %v2793_v35  ;;  %v2790_v40 = vsel %vm2127_vm3, %v10037_v34, 0.0 }
 0x45c   :  { %v2767_v42 = vsub.f32 %v2732_v3, %v2759_v38  ;;  %v2766_v45 = vsub.f32 %v2656_v2, %v2756_v39  ;;  %2791 = vadd.xlane.f32.xlu0 %v2790_v40 }
 0x45e   :  { %v2782_v46 = vmul.f32 1.442695, %v2767_v42  ;;  %v2780_v47 = vmul.f32 1.442695, %v2766_v45 }
 0x460   :  { %10042 = vpow2.f32 %v2782_v46 }
 0x461   :  { %10044 = vpow2.f32 %v2780_v47 }
 0x463   :  { %v10039_v48 = vpop.eup %10038 }
 0x464   :  { %v10041_v49 = vpop.eup %10040  ;;  %v2799_v50 = vsel %vm2127_vm3, %v10039_v48, 0.0 }
 0x465   :  { %2800 = vadd.xlane.f32.xlu1 %v2799_v50  ;;  %v2796_v51 = vsel %vm2127_vm3, %v10041_v49, 0.0 }
 0x466   :  { %2797 = vadd.xlane.f32.xlu0 %v2796_v51 }
 0x46d   :  { %v10043_v52 = vpop.eup %10042 }
 0x46e   :  { %v10045_v54 = vpop.eup %10044  ;;  %v2805_v55 = vsel %vm2127_vm3, %v10043_v52, 0.0 }
 0x46f   :  { %2806 = vadd.xlane.f32.xlu1 %v2805_v55  ;;  %v2802_v56 = vsel %vm2127_vm3, %v10045_v54, 0.0 }
 0x470   :  { %2803 = vadd.xlane.f32.xlu0 %v2802_v56 }
 0x4da   :  { %v2789_v57 = vpop.xlane.xlu1 %2788 }
 0x4db   :  { %10046 = vrcp.f32 %v2789_v57  ;;  %v2786_v58 = vpop.xlane.xlu0 %2785 }
 0x4dc   :  { %10048 = vrcp.f32 %v2786_v58 }
 0x4e4   :  { %v2795_v59 = vpop.xlane.xlu1 %2794 }
 0x4e5   :  { %10050 = vrcp.f32 %v2795_v59  ;;  %v2792_v60 = vpop.xlane.xlu0 %2791 }
 0x4e6   :  { %10052 = vrcp.f32 %v2792_v60 }
 0x4e8   :  { %v10047_v61 = vpop.eup %10046 }
 0x4e9   :  { %v10049_v62 = vpop.eup %10048  ;;  %v2817_v63 = vmul.f32 %v10047_v61, %v10031_v20 }
 0x4ea   :  { %v2816_v0 = vmul.f32 %v10049_v62, %v10033_v22 }
 0x4eb   :  { %9413 = vmatmul.mubr.msk.f32.vlgmr.msra.gmra.mxu0 %vm2127_vm3, %v2817_v63 }
 0x4ec   :  { %9408 = vmatmul.mubr.msk.f32.vlgmr.msra.gmra.mxu1 %vm2127_vm3, %v2816_v0  ;;  %9421 = vmatpush3.msra.mxu0 %v10540_v31 }
 0x4ed   :  { %9416 = vmatpush3.msra.mxu1 %v10538_v30  ;;  %9422 = vmatprep.mubr.msk.f32.mxu0 %vm10114_vm2, %v10113_v21 }
 0x4ee   :  { %v2801_v1 = vpop.xlane.xlu1 %2800  ;;  %9430 = vmatprep.subr.mxu0 %v10113_v21  ;;  %9417 = vmatprep.mubr.msk.f32.mxu1 %vm10114_vm2, %v10113_v21 }
 0x4ef   :  { %10054 = vrcp.f32 %v2801_v1  ;;  %v2798_v2 = vpop.xlane.xlu0 %2797  ;;  %9425 = vmatprep.subr.mxu1 %v10113_v21 }
 0x4f0   :  { %10056 = vrcp.f32 %v2798_v2 }
 0x4f2   :  { %v10051_v3 = vpop.eup %10050 }
 0x4f3   :  { %v10053_v4 = vpop.eup %10052  ;;  %v2819_v5 = vmul.f32 %v10051_v3, %v10035_v33 }
 0x4f4   :  { %v2818_v31 = vmul.f32 %v10053_v4, %v10037_v34 }
 0x4f5   :  { %9423 = vmatmul.mubr.msk.f32.vlgmr.msra.gmra.mxu0 %vm2127_vm3, %v2819_v5 }
 0x4f6   :  { %9418 = vmatmul.mubr.msk.f32.vlgmr.msra.gmra.mxu1 %vm2127_vm3, %v2818_v31  ;;  %9431 = vmatpush3.msra.mxu0 %v10544_v37 }
 0x4f7   :  { %9426 = vmatpush3.msra.mxu1 %v10542_v36  ;;  %9427 = vmatprep.mubr.msk.f32.mxu1 %vm10114_vm2, %v10113_v21 }
 0x4f8   :  { %v2807_v30 = vpop.xlane.xlu1 %2806  ;;  %9432 = vmatprep.mubr.msk.f32.mxu0 %vm10114_vm2, %v10113_v21  ;;  %9435 = vmatprep.subr.mxu1 %v10113_v21 }
 0x4f9   :  { %10058 = vrcp.f32 %v2807_v30  ;;  %v2804_v6 = vpop.xlane.xlu0 %2803  ;;  %9440 = vmatprep.subr.mxu0 %v10113_v21 }
 0x4fa   :  { %10060 = vrcp.f32 %v2804_v6 }
 0x4fc   :  { %v10055_v7 = vpop.eup %10054 }
 0x4fd   :  { %v10057_v8 = vpop.eup %10056  ;;  %v2821_v9 = vmul.f32 %v10055_v7, %v10039_v48 }
 0x4fe   :  { %v2820_v37 = vmul.f32 %v10057_v8, %v10041_v49 }
 0x4ff   :  { %9433 = vmatmul.mubr.msk.f32.vlgmr.msra.gmra.mxu0 %vm2127_vm3, %v2821_v9 }
 0x500   :  { %9428 = vmatmul.mubr.msk.f32.vlgmr.msra.gmra.mxu1 %vm2127_vm3, %v2820_v37  ;;  %9441 = vmatpush3.msra.mxu0 %v10548_v44  ;;  %v3409_v44 = vld [vmem:[%s8498_s19 + $0x8] sm:$0xff] }
 0x501   :  { %9436 = vmatpush3.msra.mxu1 %v10546_v43  ;;  %9437 = vmatprep.mubr.msk.f32.mxu1 %vm10114_vm2, %v10113_v21  ;;  %v3408_v43 = vld [vmem:[%s8498_s19] sm:$0xff]  ;;  %s11019_s19 = sld [smem:[%s11251_s0 + %s10137_s16]]   ;;  %s10152_s16 = smov 41  }
 0x502   :  { %9442 = vmatprep.mubr.msk.f32.mxu0 %vm10114_vm2, %v10113_v21  ;;  %9445 = vmatprep.subr.mxu1 %v10113_v21 }
 0x503   :  { %9450 = vmatprep.subr.mxu0 %v10113_v21 }
 0x506   :  { %v10059_v36 = vpop.eup %10058 }
 0x507   :  { %v10061_v10 = vpop.eup %10060  ;;  %v2823_v11 = vmul.f32 %v10059_v36, %v10043_v52 }
 0x508   :  { %v2822_v12 = vmul.f32 %v10061_v10, %v10045_v54  ;;  %v8602_v54 = vld [vmem:[%s8499_s23] ss:$0 sm:$0xff]  ;;  %s11119_s23 = sld [smem:[%s11251_s0 + %s10138_s20]]  }
 0x509   :  { %9443 = vmatmul.mubr.msk.f32.vlgmr.msra.gmra.mxu0 %vm2127_vm3, %v2823_v11 }
 0x50a   :  { %9438 = vmatmul.mubr.msk.f32.vlgmr.msra.gmra.mxu1 %vm2127_vm3, %v2822_v12  ;;  %9452 = vmatprep.mubr.msk.f32.mxu0 %vm10114_vm2, %v10113_v21 }
 0x50b   :  { %9447 = vmatprep.mubr.msk.f32.mxu1 %vm10114_vm2, %v10113_v21  ;;  %9446 = vmatpush3.msra.mxu1 %v3408_v43 }
 0x50c   :  { %9451 = vmatpush3.msra.mxu0 %v3409_v44  ;;  %9455 = vmatprep.subr.mxu1 %v10113_v21 }
 0x50d   :  { %9460 = vmatprep.subr.mxu0 %v10113_v21 }
 0x5ab   :  { %v2966_v14 = vpop.f32.mrf.mxu0 }
 0x5ac   :  { %v2893_v16 = vpop.f32.mrf.mxu1  ;;  %9453 = vmatmul.mubr.msk.f32.vlgmr.msra.gmra.mxu0 %vm2127_vm3, %v2966_v14 }
 0x5ad   :  { %9448 = vmatmul.mubr.msk.f32.vlgmr.msra.gmra.mxu1 %vm2127_vm3, %v2893_v16  ;;  %v9414_v17 = vpop.f32.mrf.mxu0  ;;  %9461 = vmatpush3.msra.mxu0 %v3411_v13  ;;  %v4067_v16 = vld [vmem:[%s8500_s27 + $0x10] sm:$0xff] }
 0x5ae   :  { %v9409_v18 = vpop.f32.mrf.mxu1  ;;  %9456 = vmatpush3.msra.mxu1 %v3410_v15  ;;  %9457 = vmatprep.mubr.msk.f32.mxu1 %vm10114_vm2, %v10113_v21  ;;  %v4066_v17 = vld [vmem:[%s8500_s27 + $0x8] sm:$0xff] }
 0x5af   :  { %9462 = vmatprep.mubr.msk.f32.mxu0 %vm10114_vm2, %v10113_v21  ;;  %9465 = vmatprep.subr.mxu1 %v10113_v21  ;;  %v4065_v18 = vld [vmem:[%s8500_s27] sm:$0xff] }
 0x5b0   :  { %9470 = vmatprep.subr.mxu0 %v10113_v21 }
 0x5b5   :  { %v3112_v19 = vpop.f32.mrf.mxu0 }
 0x5b6   :  { %v3039_v20 = vpop.f32.mrf.mxu1  ;;  %9463 = vmatmul.mubr.msk.f32.vlgmr.msra.gmra.mxu0 %vm2127_vm3, %v3112_v19  ;;  %v4174_v19 = vld [vmem:[%s10662_s1 + $0x78] sm:$0xff] }
 0x5b7   :  { %9458 = vmatmul.mubr.msk.f32.vlgmr.msra.gmra.mxu1 %vm2127_vm3, %v3039_v20  ;;  %v9424_v22 = vpop.f32.mrf.mxu0  ;;  %9471 = vmatpush3.msra.mxu0 %v3409_v44  ;;  %v4173_v20 = vld [vmem:[%s10662_s1 + $0x70] sm:$0xff] }
 0x5b8   :  { %v9419_v23 = vpop.f32.mrf.mxu1  ;;  %9466 = vmatpush3.msra.mxu1 %v3408_v43  ;;  %9467 = vmatprep.mubr.msk.f32.mxu1 %vm10114_vm2, %v10113_v21  ;;  %v4172_v22 = vld [vmem:[%s10662_s1 + $0x68] sm:$0xff] }
 0x5b9   :  { %9472 = vmatprep.mubr.msk.f32.mxu0 %vm10114_vm2, %v10113_v21  ;;  %9475 = vmatprep.subr.mxu1 %v10113_v21  ;;  %v4171_v23 = vld [vmem:[%s10662_s1 + $0x60] sm:$0xff] }
 0x5ba   :  { %9480 = vmatprep.subr.mxu0 %v10113_v21 }
 0x5bf   :  { %v3258_v24 = vpop.f32.mrf.mxu0 }
 0x5c0   :  { %v3185_v25 = vpop.f32.mrf.mxu1  ;;  %9473 = vmatmul.mubr.msk.f32.vlgmr.msra.gmra.mxu0 %vm2127_vm3, %v3258_v24  ;;  %v4170_v24 = vld [vmem:[%s10662_s1 + $0x58] sm:$0xff] }
 0x5c1   :  { %9468 = vmatmul.mubr.msk.f32.vlgmr.msra.gmra.mxu1 %vm2127_vm3, %v3185_v25  ;;  %v9434_v26 = vpop.f32.mrf.mxu0  ;;  %9481 = vmatpush3.msra.mxu0 %v3411_v13  ;;  %v4169_v25 = vld [vmem:[%s10662_s1 + $0x50] sm:$0xff] }
 0x5c2   :  { %v9429_v27 = vpop.f32.mrf.mxu1  ;;  %9476 = vmatpush3.msra.mxu1 %v3410_v15  ;;  %9477 = vmatprep.mubr.msk.f32.mxu1 %vm10114_vm2, %v10113_v21  ;;  %v4068_v15 = vld [vmem:[%s8500_s27 + $0x18] sm:$0xff]  ;;  %v4168_v26 = vld [vmem:[%s10662_s1 + $0x48] sm:$0xff]  ;;  %s8515_s27 = sld [smem:[%s11251_s0 + %s10139_s24]]  }
 0x5c3   :  { %9482 = vmatprep.mubr.msk.f32.mxu0 %vm10114_vm2, %v10113_v21  ;;  %9485 = vmatprep.subr.mxu1 %v4068_v15  ;;  %v4167_v27 = vld [vmem:[%s10662_s1 + $0x40] sm:$0xff] }
 0x5c4   :  { %9496 = vmatprep.subr.mxu0 %v4174_v19 }
 0x5c9   :  { %v3404_v28 = vpop.f32.mrf.mxu0 }
 0x5ca   :  { %v3331_v29 = vpop.f32.mrf.mxu1  ;;  %9483 = vmatmul.mubr.msk.f32.vlgmr.msra.gmra.mxu0 %vm2127_vm3, %v3404_v28  ;;  %v4166_v28 = vld [vmem:[%s10662_s1 + $0x38] sm:$0xff] }
 0x5cb   :  { %9478 = vmatmul.mubr.msk.f32.vlgmr.msra.gmra.mxu1 %vm2127_vm3, %v3331_v29  ;;  %v9444_v32 = vpop.f32.mrf.mxu0  ;;  %9497 = vmatpush3.msra.mxu0 %v4174_v19  ;;  %v4165_v29 = vld [vmem:[%s10662_s1 + $0x30] sm:$0xff] }
 0x5cc   :  { %v9439_v33 = vpop.f32.mrf.mxu1  ;;  %9486 = vmatpush3.msra.mxu1 %v4068_v15  ;;  %9498 = vmatprep.subr.mxu0 %v4173_v20  ;;  %v4164_v32 = vld [vmem:[%s10662_s1 + $0x28] sm:$0xff]  ;;  %v4305_v15 = vld [vmem:[%s10709_s21 + $0x10] sm:$0xff] }
 0x5cd   :  { %9487 = vmatprep.subr.mxu1 %v4067_v16  ;;  %9499 = vmatpush3.msra.mxu0 %v4173_v20  ;;  %v4163_v33 = vld [vmem:[%s10662_s1 + $0x20] sm:$0xff] }
 0x5ce   :  { %9488 = vmatpush3.msra.mxu1 %v4067_v16  ;;  %9500 = vmatprep.subr.mxu0 %v4172_v22  ;;  %v4304_v16 = vld [vmem:[%s10709_s21 + $0x8] sm:$0xff] }
 0x5cf   :  { %9489 = vmatprep.subr.mxu1 %v4066_v17  ;;  %9501 = vmatpush3.msra.mxu0 %v4172_v22 }
 0x5d0   :  { %9490 = vmatpush3.msra.mxu1 %v4066_v17  ;;  %9502 = vmatprep.subr.mxu0 %v4171_v23  ;;  %v4303_v17 = vld [vmem:[%s10709_s21] sm:$0xff] }
 0x5d1   :  { %9491 = vmatprep.subr.mxu1 %v4065_v18  ;;  %9503 = vmatpush3.msra.mxu0 %v4171_v23 }
 0x5d2   :  { %9492 = vmatpush3.msra.mxu1 %v4065_v18  ;;  %9504 = vmatprep.subr.mxu0 %v4170_v24 }
 0x5d3   :  { %9531 = vmatprep.subr.mxu1 %v10113_v21  ;;  %9505 = vmatpush3.msra.mxu0 %v4170_v24 }
 0x5d4   :  { %9506 = vmatprep.subr.mxu0 %v4169_v25 }
 0x5d5   :  { %9507 = vmatpush3.msra.mxu0 %v4169_v25 }
 0x5d6   :  { %9508 = vmatprep.subr.mxu0 %v4168_v26 }
 0x5d7   :  { %9509 = vmatpush3.msra.mxu0 %v4168_v26  ;;  %v8609_v26 = vld [vmem:[%s8506_s25] ss:$0 sm:$0xff]  ;;  %s8524_s25 = sld [smem:[%s11251_s0 + %s10146_s22]]  }
 0x5d8   :  { %9510 = vmatprep.subr.mxu0 %v4167_v27 }
 0x5d9   :  { %9511 = vmatpush3.msra.mxu0 %v4167_v27 }
 0x5da   :  { %9512 = vmatprep.subr.mxu0 %v4166_v28 }
 0x5db   :  { %9513 = vmatpush3.msra.mxu0 %v4166_v28 }
 0x5dc   :  { %9514 = vmatprep.subr.mxu0 %v4165_v29 }
 0x5dd   :  { %9515 = vmatpush3.msra.mxu0 %v4165_v29  ;;  %v8610_v29 = vld [vmem:[%s8507_s29] ss:$0 sm:$0xff]  ;;  %s8522_s29 = sld [smem:[%s11251_s0 + %s10147_s26]]  }
 0x5de   :  { %9516 = vmatprep.subr.mxu0 %v4164_v32 }
 0x5df   :  { %9517 = vmatpush3.msra.mxu0 %v4164_v32 }
 0x5e0   :  { %9518 = vmatprep.subr.mxu0 %v4163_v33 }
 0x5e1   :  { %9519 = vmatpush3.msra.mxu0 %v4163_v33 }
 0x66c   :  { %v3554_v34 = vpop.f32.mrf.mxu0 }
 0x66d   :  { %v3481_v35 = vpop.f32.mrf.mxu1  ;;  %v3997_v42 = vsel %vm263_vm1, %v3554_v34, 0.0 }
 0x66e   :  { %v9454_v38 = vpop.f32.mrf.mxu0  ;;  %v3996_v40 = vsel %vm263_vm1, %v3481_v35, 0.0 }
 0x66f   :  { %v9449_v39 = vpop.f32.mrf.mxu1  ;;  %v3998_v46 = vadd.f32 %v3997_v42, %v3996_v40  ;;  %v8603_v40 = vld [vmem:[%s8504_s5] ss:$0 sm:$0xff]  ;;  %s11186_s5 = sld [smem:[%s11251_s0 + %s10141_s2]]  }
 0x676   :  { %v3700_v45 = vpop.f32.mrf.mxu0 }
 0x677   :  { %v3627_v47 = vpop.f32.mrf.mxu1  ;;  %v4001_v52 = vsel %vm263_vm1, %v3700_v45, 0.0 }
 0x678   :  { %v3999_v48 = vsel %vm263_vm1, %v3627_v47, 0.0  ;;  %v9464_v49 = vpop.f32.mrf.mxu0 }
 0x679   :  { %v4000_v50 = vadd.f32 %v3999_v48, %v3998_v46  ;;  %v9459_v51 = vpop.f32.mrf.mxu1  ;;  %v8604_v46 = vld [vmem:[%s8505_s9] ss:$0 sm:$0xff]  ;;  %s8520_s9 = sld [smem:[%s11251_s0 + %s10142_s6]]  }
 0x67b   :  { %v4002_v55 = vadd.f32 %v4001_v52, %v4000_v50 }
 0x67d   :  { %v4017_v56 = vadd.f32 %v8602_v54, %v4002_v55 }
 0x67f   :  { %v4019_v57 = vadd.f32 %v4017_v56, %v10234_v41  ;;  %v4162_v56 = vld [vmem:[%s10662_s1 + $0x18] sm:$0xff] }
 0x680   :  { %v3846_v58 = vpop.f32.mrf.mxu0  ;;  %9520 = vmatprep.subr.mxu0 %v4162_v56 }
 0x681   :  { %v3773_v59 = vpop.f32.mrf.mxu1  ;;  %v4021_v60 = vsel %vm263_vm1, %v4019_v57, 0.0  ;;  %v4004_v0 = vsel %vm263_vm1, %v3846_v58, 0.0  ;;  %9521 = vmatpush3.msra.mxu0 %v4162_v56  ;;  %v4160_v58 = vld [vmem:[%s10662_s1 + $0x8] sm:$0xff]  ;;  %v4318_v56 = vld [vmem:[%s10709_s21 + $0x78] sm:$0xff] }
 0x682   :  { %v9474_v61 = vpop.f32.mrf.mxu0  ;;  %4022 = vadd.xlane.f32.xlu0 %v4021_v60  ;;  %v4003_v63 = vsel %vm263_vm1, %v3773_v59, 0.0  ;;  %v4159_v59 = vld [vmem:[%s10662_s1] sm:$0xff] }
 0x683   :  { %v9469_v62 = vpop.f32.mrf.mxu1  ;;  %v4005_v2 = vadd.f32 %v4004_v0, %v4003_v63  ;;  %v8605_v60 = vld [vmem:[%s8501_s13] ss:$0 sm:$0xff]  ;;  %s8521_s13 = sld [smem:[%s11251_s0 + %s10143_s10]]  }
 0x68a   :  { %v3992_v1 = vpop.f32.mrf.mxu0 }
 0x68b   :  { %v3919_v3 = vpop.f32.mrf.mxu1  ;;  %v4008_v41 = vsel %vm263_vm1, %v3992_v1, 0.0 }
 0x68c   :  { %v4006_v4 = vsel %vm263_vm1, %v3919_v3, 0.0  ;;  %v9484_v5 = vpop.f32.mrf.mxu0  ;;  %v8608_v3 = vld [vmem:[%s8503_s17] ss:$0 sm:$0xff]  ;;  %s8517_s17 = sld [smem:[%s11251_s0 + %s10144_s14]]  }
 0x68d   :  { %v4007_v31 = vadd.f32 %v4006_v4, %v4005_v2  ;;  %v9479_v30 = vpop.f32.mrf.mxu1 }
 0x68f   :  { %v4009_v6 = vadd.f32 %v4008_v41, %v4007_v31 }
 0x691   :  { %v4018_v7 = vadd.f32 %v8602_v54, %v4009_v6 }
 0x693   :  { %v4020_v8 = vadd.f32 %v4018_v7, %v10277_v53 }
 0x695   :  { %v4024_v9 = vsel %vm263_vm1, %v4020_v8, 0.0 }
 0x696   :  { %4025 = vadd.xlane.f32.xlu1 %v4024_v9 }
 0x70b   :  { %v4023_v37 = vpop.xlane.xlu0 %4022 }
 0x70c   :  { %v4027_v36 = vmul.f32 0.03125, %v4023_v37 }
 0x70e   :  { %v10646_v10 = vsub.f32 %v4019_v57, %v4027_v36  ;;  %v4161_v57 = vld [vmem:[%s10662_s1 + $0x10] sm:$0xff]  ;;  %s8516_s1 = sld [smem:[%s11251_s0 + %s10140_s28]]  }
 0x70f   :  { %9522 = vmatprep.subr.mxu0 %v4161_v57 }
 0x710   :  { %v4031_v11 = vmul.f32 %v10646_v10, %v10646_v10  ;;  %9523 = vmatpush3.msra.mxu0 %v4161_v57  ;;  %v4923_v57 = vld [vmem:[%s10735_s3 + $0x50] sm:$0xff] }
 0x711   :  { %9524 = vmatprep.subr.mxu0 %v4160_v58 }
 0x712   :  { %v4033_v12 = vsel %vm263_vm1, %v4031_v11, 0.0  ;;  %9525 = vmatpush3.msra.mxu0 %v4160_v58  ;;  %v4317_v58 = vld [vmem:[%s10709_s21 + $0x70] sm:$0xff] }
 0x713   :  { %4034 = vadd.xlane.f32.xlu0 %v4033_v12  ;;  %9526 = vmatprep.subr.mxu0 %v4159_v59 }
 0x714   :  { %9527 = vmatpush3.msra.mxu0 %v4159_v59  ;;  %v4922_v59 = vld [vmem:[%s10735_s3 + $0x48] sm:$0xff] }
 0x715   :  { %9575 = vmatprep.subr.mxu0 %v10113_v21 }
 0x71f   :  { %v4026_v43 = vpop.xlane.xlu1 %4025 }
 0x720   :  { %v4028_v44 = vmul.f32 0.03125, %v4026_v43 }
 0x722   :  { %v10651_v13 = vsub.f32 %v4020_v8, %v4028_v44 }
 0x724   :  { %v4032_v53 = vmul.f32 %v10651_v13, %v10651_v13 }
 0x726   :  { %v4036_v14 = vsel %vm263_vm1, %v4032_v53, 0.0 }
 0x727   :  { %4037 = vadd.xlane.f32.xlu1 %v4036_v14  ;;  %v4306_v14 = vld [vmem:[%s10709_s21 + $0x18] sm:$0xff] }
 0x79c   :  { %v4035_v34 = vpop.xlane.xlu0 %4034 }
 0x79d   :  { %v4039_v35 = vmul.f32 0.03125, %v4035_v34 }
 0x79f   :  { %v4041_v38 = vadd.f32 1e-05, %v4039_v35 }
 0x7a1   :  { %10062 = vrsqrt.f32 %v4041_v38  ;;  %v4314_v38 = vld [vmem:[%s10709_s21 + $0x58] sm:$0xff] }
 0x7ae   :  { %v10063_v39 = vpop.eup %10062 }
 0x7af   :  { %v4045_v42 = vmul.f32 %v10063_v39, %v10646_v10 }
 0x7b0   :  { %v4038_v45 = vpop.xlane.xlu1 %4037 }
 0x7b1   :  { %v4040_v47 = vmul.f32 0.03125, %v4038_v45  ;;  %v4054_v48 = vmul.f32 %v8603_v40, %v4045_v42  ;;  %v4313_v42 = vld [vmem:[%s10709_s21 + $0x50] sm:$0xff] }
 0x7b2   :  { %v10751_v45 = vld [vmem:[%s10709_s21 + $0x30] sm:$0xff] }
 0x7b3   :  { %v4042_v49 = vadd.f32 1e-05, %v4040_v47  ;;  %v4063_v50 = vadd.f32 %v8604_v46, %v4054_v48  ;;  %v10758_v47 = vld [vmem:[%s10709_s21 + $0x28] sm:$0xff]  ;;  %v4311_v48 = vld [vmem:[%s10709_s21 + $0x40] sm:$0xff] }
 0x7b5   :  { %10064 = vrsqrt.f32 %v4042_v49  ;;  %9493 = vmatprep.mubr.msk.f32.mxu1 %vm263_vm1, %v4063_v50  ;;  %v10765_v49 = vld [vmem:[%s10709_s21 + $0x20] sm:$0xff] }
 0x7c2   :  { %v10065_v51 = vpop.eup %10064 }
 0x7c3   :  { %v4046_v52 = vmul.f32 %v10065_v51, %v10651_v13  ;;  %v4915_v51 = vld [vmem:[%s10735_s3 + $0x10] sm:$0xff] }
 0x7c5   :  { %v4055_v54 = vmul.f32 %v8603_v40, %v4046_v52  ;;  %v10742_v40 = vld [vmem:[%s10709_s21 + $0x38] sm:$0xff]  ;;  %v4914_v52 = vld [vmem:[%s10735_s3 + $0x8] sm:$0xff] }
 0x7c7   :  { %v4064_v55 = vadd.f32 %v8604_v46, %v4055_v54  ;;  %v4312_v46 = vld [vmem:[%s10709_s21 + $0x48] sm:$0xff]  ;;  %v4913_v54 = vld [vmem:[%s10735_s3] sm:$0xff] }
 0x7c9   :  { %9494 = vmatmul.mubr.msk.f32.vlgmr.msra.gmra.mxu1 %vm263_vm1, %v4064_v55 }
 0x7ca   :  { %9539 = vmatprep.mubr.msk.f32.mxu1 %vm10114_vm2, %v10113_v21  ;;  %9532 = vmatpush3.msra.mxu1 %v4306_v14 }
 0x7cb   :  { %9533 = vmatprep.subr.mxu1 %v10113_v21 }
 0x7cc   :  { %9534 = vmatpush3.msra.mxu1 %v4305_v15 }
 0x7cd   :  { %9535 = vmatprep.subr.mxu1 %v10113_v21 }
 0x7ce   :  { %9536 = vmatpush3.msra.mxu1 %v4304_v16 }
 0x7cf   :  { %9537 = vmatprep.subr.mxu1 %v10113_v21 }
 0x7d0   :  { %9538 = vmatpush3.msra.mxu1 %v4303_v17 }
 0x7d1   :  { %9542 = vmatprep.subr.mxu1 %v10113_v21 }
 0x889   :  { %v9495_v61 = vpop.f32.mrf.mxu1 }
 0x88a   :  { %v4154_v62 = vadd.f32 %v9495_v61, %v8605_v60  ;;  %v4921_v61 = vld [vmem:[%s10735_s3 + $0x40] sm:$0xff] }
 0x88b   :  { %v4148_v63 = vpop.f32.mrf.mxu1 }
 0x88c   :  { %v4149_v0 = vadd.f32 %v8605_v60, %v4148_v63  ;;  %v4158_v2 = vmax.f32 %v4154_v62, 0.0  ;;  %v4316_v60 = vld [vmem:[%s10709_s21 + $0x68] sm:$0xff]  ;;  %v4315_v62 = vld [vmem:[%s10709_s21 + $0x60] sm:$0xff]  ;;  %v5520_v63 = vld [vmem:[%s10840_s7 + $0x18] sm:$0xff]  ;;  %s8519_s21 = sld [smem:[%s11251_s0 + %s10145_s18]]  }
 0x88e   :  { %v4157_v1 = vmax.f32 %v4149_v0, 0.0  ;;  %v4920_v0 = vld [vmem:[%s10735_s3 + $0x38] sm:$0xff] }
 0x890   :  { %9528 = vmatprep.mubr.f32.mxu0 %v4157_v1  ;;  %v5519_v1 = vld [vmem:[%s10840_s7 + $0x10] sm:$0xff] }
 0x891   :  { %9529 = vmatmul.mubr.f32.vlgmr.msra.gmra.mxu0 %v4158_v2  ;;  %v4919_v2 = vld [vmem:[%s10735_s3 + $0x30] sm:$0xff] }
 0x892   :  { %9583 = vmatprep.mubr.msk.f32.mxu0 %vm10114_vm2, %v10113_v21  ;;  %9576 = vmatpush3.msra.mxu0 %v4306_v14  ;;  %v5529_v14 = vld [vmem:[%s10840_s7 + $0x60] sm:$0xff] }
 0x893   :  { %9577 = vmatprep.subr.mxu0 %v10113_v21 }
 0x894   :  { %9578 = vmatpush3.msra.mxu0 %v4305_v15 }
 0x895   :  { %9579 = vmatprep.subr.mxu0 %v10113_v21 }
 0x896   :  { %9580 = vmatpush3.msra.mxu0 %v4304_v16 }
 0x897   :  { %9581 = vmatprep.subr.mxu0 %v10113_v21 }
 0x898   :  { %9582 = vmatpush3.msra.mxu0 %v4303_v17 }
 0x899   :  { %9597 = vmatprep.subr.mxu0 %v10113_v21 }
 0x951   :  { %v9530_v4 = vpop.f32.mrf.mxu0 }
 0x952   :  { %v4254_v5 = vadd.f32 %v9530_v4, %v8608_v3  ;;  %v4918_v4 = vld [vmem:[%s10735_s3 + $0x28] sm:$0xff] }
 0x953   :  { %v4248_v31 = vpop.f32.mrf.mxu0 }
 0x954   :  { %v4249_v30 = vadd.f32 %v8608_v3, %v4248_v31  ;;  %v4258_v41 = vadd.f32 %v4254_v5, %v4064_v55  ;;  %v4924_v55 = vld [vmem:[%s10735_s3 + $0x58] sm:$0xff]  ;;  %v5518_v3 = vld [vmem:[%s10840_s7 + $0x8] sm:$0xff]  ;;  %v5517_v5 = vld [vmem:[%s10840_s7] sm:$0xff] }
 0x955   :  { %v4917_v31 = vld [vmem:[%s10735_s3 + $0x20] sm:$0xff] }
 0x956   :  { %v4262_v6 = vsel %vm263_vm1, %v4258_v41, 0.0  ;;  %v4257_v7 = vadd.f32 %v4249_v30, %v4063_v50  ;;  %v4916_v50 = vld [vmem:[%s10735_s3 + $0x18] sm:$0xff] }
 0x957   :  { %4263 = vadd.xlane.f32.xlu1 %v4262_v6  ;;  %v5528_v30 = vld [vmem:[%s10840_s7 + $0x58] sm:$0xff]  ;;  %v5527_v6 = vld [vmem:[%s10840_s7 + $0x50] sm:$0xff] }
 0x958   :  { %v4259_v8 = vsel %vm263_vm1, %v4257_v7, 0.0 }
 0x959   :  { %4260 = vadd.xlane.f32.xlu0 %v4259_v8  ;;  %v5526_v8 = vld [vmem:[%s10840_s7 + $0x48] sm:$0xff] }
 0x9e0   :  { %v4264_v9 = vpop.xlane.xlu1 %4263 }
 0x9e1   :  { %v4266_v37 = vmul.f32 0.03125, %v4264_v9  ;;  %v4926_v9 = vld [vmem:[%s10735_s3 + $0x68] sm:$0xff] }
 0x9e2   :  { %v4261_v36 = vpop.xlane.xlu0 %4260 }
 0x9e3   :  { %v4268_v10 = vsub.f32 %v4258_v41, %v4266_v37  ;;  %v4265_v11 = vmul.f32 0.03125, %v4261_v36  ;;  %v4928_v41 = vld [vmem:[%s10735_s3 + $0x78] sm:$0xff]  ;;  %v5525_v37 = vld [vmem:[%s10840_s7 + $0x40] sm:$0xff] }
 0x9e4   :  { %v4925_v36 = vld [vmem:[%s10735_s3 + $0x60] sm:$0xff] }
 0x9e5   :  { %v4267_v12 = vsub.f32 %v4257_v7, %v4265_v11  ;;  %v4270_v43 = vmul.f32 %v4268_v10, %v4268_v10  ;;  %v4927_v7 = vld [vmem:[%s10735_s3 + $0x70] sm:$0xff]  ;;  %s8523_s3 = sld [smem:[%s11251_s0 + %s10148_s30]]  }
 0x9e6   :  { %v5523_v11 = vld [vmem:[%s10840_s7 + $0x30] sm:$0xff] }
 0x9e7   :  { %v4274_v44 = vsel %vm263_vm1, %v4270_v43, 0.0  ;;  %v4269_v13 = vmul.f32 %v4267_v12, %v4267_v12  ;;  %v5521_v43 = vld [vmem:[%s10840_s7 + $0x20] sm:$0xff] }
 0x9e8   :  { %4275 = vadd.xlane.f32.xlu1 %v4274_v44  ;;  %v5532_v44 = vld [vmem:[%s10840_s7 + $0x78] sm:$0xff] }
 0x9e9   :  { %v4271_v53 = vsel %vm263_vm1, %v4269_v13, 0.0  ;;  %v5531_v13 = vld [vmem:[%s10840_s7 + $0x70] sm:$0xff] }
 0x9ea   :  { %4272 = vadd.xlane.f32.xlu0 %v4271_v53  ;;  %v5530_v53 = vld [vmem:[%s10840_s7 + $0x68] sm:$0xff] }
 0xa71   :  { %v4276_v18 = vpop.xlane.xlu1 %4275 }
 0xa72   :  { %v4278_v19 = vmul.f32 0.03125, %v4276_v18 }
 0xa73   :  { %v4273_v20 = vpop.xlane.xlu0 %4272 }
 0xa74   :  { %v4280_v22 = vadd.f32 1e-05, %v4278_v19  ;;  %v4277_v23 = vmul.f32 0.03125, %v4273_v20 }
 0xa76   :  { %10066 = vrsqrt.f32 %v4280_v22  ;;  %v4279_v24 = vadd.f32 1e-05, %v4277_v23 }
 0xa78   :  { %10068 = vrsqrt.f32 %v4279_v24  ;;  %v8623_v24 = vld [vmem:[%s10990_s11] ss:$0 sm:$0xff] }
 0xa83   :  { %v10067_v25 = vpop.eup %10066 }
 0xa84   :  { %v4284_v27 = vmul.f32 %v10067_v25, %v4268_v10  ;;  %v5524_v10 = vld [vmem:[%s10840_s7 + $0x38] sm:$0xff] }
 0xa85   :  { %v10069_v28 = vpop.eup %10068 }
 0xa86   :  { %v4293_v32 = vmul.f32 %v8609_v26, %v4284_v27  ;;  %v4283_v33 = vmul.f32 %v10069_v28, %v4267_v12  ;;  %v5522_v12 = vld [vmem:[%s10840_s7 + $0x28] sm:$0xff]  ;;  %v8611_v28 = vld [vmem:[%s10995_s15] ss:$0 sm:$0xff]  ;;  %s8526_s7 = sld [smem:[%s11251_s0 + %s10149_s4]]  }
 0xa88   :  { %v10729_v34 = vadd.f32 %v8610_v29, %v4293_v32  ;;  %v4292_v35 = vmul.f32 %v8609_v26, %v4283_v33 }
 0xa8a   :  { %v10737_v39 = vadd.f32 %v8610_v29, %v4292_v35  ;;  %9584 = vmatmul.mubr.msk.f32.vlgmr.msra.gmra.mxu0 %vm263_vm1, %v10729_v34  ;;  %v8625_v35 = vld [vmem:[%s10990_s11 + $0x2] ss:$0 sm:$0xff] }
 0xa8b   :  { %9598 = vmatpush3.msra.mxu0 %v4314_v38  ;;  %9605 = vmatprep.mubr.msk.f32.mxu0 %vm10114_vm2, %v10113_v21 }
 0xa8c   :  { %9599 = vmatprep.subr.mxu0 %v10113_v21  ;;  %9540 = vmatmul.mubr.msk.f32.vlgmr.msra.gmra.mxu1 %vm263_vm1, %v10737_v39 }
 0xa8d   :  { %9543 = vmatpush3.msra.mxu1 %v10742_v40  ;;  %9600 = vmatpush3.msra.mxu0 %v4313_v42 }
 0xa8e   :  { %9544 = vmatprep.subr.mxu1 %v10113_v21  ;;  %9601 = vmatprep.subr.mxu0 %v10113_v21 }
 0xa8f   :  { %9545 = vmatpush3.msra.mxu1 %v10751_v45  ;;  %9602 = vmatpush3.msra.mxu0 %v4312_v46 }
 0xa90   :  { %9546 = vmatprep.subr.mxu1 %v10113_v21  ;;  %9603 = vmatprep.subr.mxu0 %v10113_v21 }
 0xa91   :  { %9547 = vmatpush3.msra.mxu1 %v10758_v47  ;;  %9604 = vmatpush3.msra.mxu0 %v4311_v48 }
 0xa92   :  { %9548 = vmatprep.subr.mxu1 %v10113_v21  ;;  %9606 = vmatmul.mubr.msk.f32.vlgmr.msra.gmra.mxu0 %vm263_vm1, %v10729_v34 }
 0xa93   :  { %9619 = vmatprep.subr.mxu0 %v10113_v21  ;;  %9549 = vmatpush3.msra.mxu1 %v10765_v49 }
 0xa94   :  { %9550 = vmatprep.mubr.msk.f32.mxu1 %vm10114_vm2, %v10113_v21  ;;  %9620 = vmatpush3.msra.mxu0 %v4916_v50 }
 0xa95   :  { %9551 = vmatmul.mubr.msk.f32.vlgmr.msra.gmra.mxu1 %vm263_vm1, %v10737_v39  ;;  %9553 = vmatprep.subr.mxu1 %v10113_v21 }
 0xa96   :  { %9621 = vmatprep.subr.mxu0 %v10113_v21  ;;  %9554 = vmatpush3.msra.mxu1 %v4314_v38 }
 0xa97   :  { %9622 = vmatpush3.msra.mxu0 %v4915_v51  ;;  %9555 = vmatprep.subr.mxu1 %v10113_v21 }
 0xa98   :  { %9623 = vmatprep.subr.mxu0 %v10113_v21  ;;  %9556 = vmatpush3.msra.mxu1 %v4313_v42 }
 0xa99   :  { %9624 = vmatpush3.msra.mxu0 %v4914_v52  ;;  %9557 = vmatprep.subr.mxu1 %v10113_v21 }
 0xa9a   :  { %9625 = vmatprep.subr.mxu0 %v10113_v21  ;;  %9558 = vmatpush3.msra.mxu1 %v4312_v46 }
 0xa9b   :  { %9626 = vmatpush3.msra.mxu0 %v4913_v54  ;;  %9627 = vmatprep.mubr.msk.f32.mxu0 %vm10114_vm2, %v10113_v21 }
 0xa9c   :  { %9559 = vmatprep.subr.mxu1 %v10113_v21  ;;  %9628 = vmatmul.mubr.msk.f32.vlgmr.msra.gmra.mxu0 %vm263_vm1, %v10737_v39 }
 0xa9d   :  { %9641 = vmatprep.subr.mxu0 %v10113_v21  ;;  %9560 = vmatpush3.msra.mxu1 %v4311_v48 }
 0xa9e   :  { %9561 = vmatprep.mubr.msk.f32.mxu1 %vm10114_vm2, %v10113_v21  ;;  %9642 = vmatpush3.msra.mxu0 %v4924_v55 }
 0xa9f   :  { %9562 = vmatmul.mubr.msk.f32.vlgmr.msra.gmra.mxu1 %vm263_vm1, %v10737_v39  ;;  %9564 = vmatprep.subr.mxu1 %v10113_v21 }
 0xaa0   :  { %9643 = vmatprep.subr.mxu0 %v10113_v21  ;;  %9565 = vmatpush3.msra.mxu1 %v4318_v56 }
 0xaa1   :  { %9644 = vmatpush3.msra.mxu0 %v4923_v57  ;;  %9566 = vmatprep.subr.mxu1 %v10113_v21 }
 0xaa2   :  { %9645 = vmatprep.subr.mxu0 %v10113_v21  ;;  %9567 = vmatpush3.msra.mxu1 %v4317_v58 }
 0xaa3   :  { %9646 = vmatpush3.msra.mxu0 %v4922_v59  ;;  %9568 = vmatprep.subr.mxu1 %v10113_v21 }
 0xaa4   :  { %9647 = vmatprep.subr.mxu0 %v10113_v21  ;;  %9569 = vmatpush3.msra.mxu1 %v4316_v60 }
 0xaa5   :  { %9648 = vmatpush3.msra.mxu0 %v4921_v61  ;;  %9649 = vmatprep.mubr.msk.f32.mxu0 %vm10114_vm2, %v10113_v21 }
 0xaa6   :  { %9570 = vmatprep.subr.mxu1 %v10113_v21  ;;  %9650 = vmatmul.mubr.msk.f32.vlgmr.msra.gmra.mxu0 %vm263_vm1, %v10737_v39 }
 0xaa7   :  { %9663 = vmatprep.subr.mxu0 %v10113_v21  ;;  %9571 = vmatpush3.msra.mxu1 %v4315_v62 }
 0xaa8   :  { %9572 = vmatprep.mubr.msk.f32.mxu1 %vm10114_vm2, %v10113_v21  ;;  %9664 = vmatpush3.msra.mxu0 %v4916_v50 }
 0xaa9   :  { %9573 = vmatmul.mubr.msk.f32.vlgmr.msra.gmra.mxu1 %vm263_vm1, %v10737_v39  ;;  %9586 = vmatprep.subr.mxu1 %v10113_v21 }
 0xaaa   :  { %9665 = vmatprep.subr.mxu0 %v10113_v21  ;;  %9587 = vmatpush3.msra.mxu1 %v10742_v40 }
 0xaab   :  { %9666 = vmatpush3.msra.mxu0 %v4915_v51  ;;  %9588 = vmatprep.subr.mxu1 %v10113_v21 }
 0xaac   :  { %9667 = vmatprep.subr.mxu0 %v10113_v21  ;;  %9589 = vmatpush3.msra.mxu1 %v10751_v45  ;;  %v8613_v45 = vld [vmem:[%s10995_s15 + $0x2] ss:$0 sm:$0xff] }
 0xaad   :  { %9668 = vmatpush3.msra.mxu0 %v4914_v52  ;;  %9590 = vmatprep.subr.mxu1 %v10113_v21 }
 0xaae   :  { %9669 = vmatprep.subr.mxu0 %v10113_v21  ;;  %9591 = vmatpush3.msra.mxu1 %v10758_v47 }
 0xaaf   :  { %9670 = vmatpush3.msra.mxu0 %v4913_v54  ;;  %9671 = vmatprep.mubr.msk.f32.mxu0 %vm10114_vm2, %v10113_v21 }
 0xab0   :  { %9592 = vmatprep.subr.mxu1 %v10113_v21  ;;  %9672 = vmatmul.mubr.msk.f32.vlgmr.msra.gmra.mxu0 %vm263_vm1, %v10729_v34 }
 0xab1   :  { %9685 = vmatprep.subr.mxu0 %v10113_v21  ;;  %9593 = vmatpush3.msra.mxu1 %v10765_v49 }
 0xab2   :  { %9594 = vmatprep.mubr.msk.f32.mxu1 %vm10114_vm2, %v10113_v21  ;;  %9686 = vmatpush3.msra.mxu0 %v4924_v55 }
 0xab3   :  { %9595 = vmatmul.mubr.msk.f32.vlgmr.msra.gmra.mxu1 %vm263_vm1, %v10729_v34  ;;  %9608 = vmatprep.subr.mxu1 %v10113_v21 }
 0xab4   :  { %9687 = vmatprep.subr.mxu0 %v10113_v21  ;;  %9609 = vmatpush3.msra.mxu1 %v4318_v56 }
 0xab5   :  { %9688 = vmatpush3.msra.mxu0 %v4923_v57  ;;  %9610 = vmatprep.subr.mxu1 %v10113_v21 }
 0xab6   :  { %9689 = vmatprep.subr.mxu0 %v10113_v21  ;;  %9611 = vmatpush3.msra.mxu1 %v4317_v58 }
 0xab7   :  { %9690 = vmatpush3.msra.mxu0 %v4922_v59  ;;  %9612 = vmatprep.subr.mxu1 %v10113_v21 }
 0xab8   :  { %9691 = vmatprep.subr.mxu0 %v10113_v21  ;;  %9613 = vmatpush3.msra.mxu1 %v4316_v60 }
 0xab9   :  { %9692 = vmatpush3.msra.mxu0 %v4921_v61  ;;  %9693 = vmatprep.mubr.msk.f32.mxu0 %vm10114_vm2, %v10113_v21 }
 0xaba   :  { %9614 = vmatprep.subr.mxu1 %v10113_v21  ;;  %9694 = vmatmul.mubr.msk.f32.vlgmr.msra.gmra.mxu0 %vm263_vm1, %v10729_v34 }
 0xabb   :  { %9707 = vmatprep.subr.mxu0 %v10113_v21  ;;  %9615 = vmatpush3.msra.mxu1 %v4315_v62  ;;  %v8635_v62 = vld [vmem:[%s11019_s19] ss:$0 sm:$0xff] }
 0xabc   :  { %9616 = vmatprep.mubr.msk.f32.mxu1 %vm10114_vm2, %v10113_v21  ;;  %9708 = vmatpush3.msra.mxu0 %v5520_v63 }
 0xabd   :  { %9617 = vmatmul.mubr.msk.f32.vlgmr.msra.gmra.mxu1 %vm263_vm1, %v10729_v34  ;;  %9630 = vmatprep.subr.mxu1 %v10113_v21 }
 0xabe   :  { %9709 = vmatprep.subr.mxu0 %v10113_v21  ;;  %9631 = vmatpush3.msra.mxu1 %v4920_v0 }
 0xabf   :  { %9710 = vmatpush3.msra.mxu0 %v5519_v1  ;;  %9632 = vmatprep.subr.mxu1 %v10113_v21 }
 0xac0   :  { %9711 = vmatprep.subr.mxu0 %v10113_v21  ;;  %9633 = vmatpush3.msra.mxu1 %v4919_v2 }
 0xac1   :  { %9712 = vmatpush3.msra.mxu0 %v5518_v3  ;;  %9634 = vmatprep.subr.mxu1 %v10113_v21 }
 0xac2   :  { %9713 = vmatprep.subr.mxu0 %v10113_v21  ;;  %9635 = vmatpush3.msra.mxu1 %v4918_v4 }
 0xac3   :  { %9714 = vmatpush3.msra.mxu0 %v5517_v5  ;;  %9715 = vmatprep.mubr.msk.f32.mxu0 %vm10114_vm2, %v10113_v21 }
 0xac4   :  { %9636 = vmatprep.subr.mxu1 %v10113_v21  ;;  %9716 = vmatmul.mubr.msk.f32.vlgmr.msra.gmra.mxu0 %vm263_vm1, %v10737_v39 }
 0xac5   :  { %9729 = vmatprep.subr.mxu0 %v10113_v21  ;;  %9637 = vmatpush3.msra.mxu1 %v4917_v31 }
 0xac6   :  { %9638 = vmatprep.mubr.msk.f32.mxu1 %vm10114_vm2, %v10113_v21  ;;  %9730 = vmatpush3.msra.mxu0 %v5528_v30 }
 0xac7   :  { %9639 = vmatmul.mubr.msk.f32.vlgmr.msra.gmra.mxu1 %vm263_vm1, %v10737_v39  ;;  %9652 = vmatprep.subr.mxu1 %v10113_v21 }
 0xac8   :  { %9731 = vmatprep.subr.mxu0 %v10113_v21  ;;  %9653 = vmatpush3.msra.mxu1 %v4928_v41 }
 0xac9   :  { %9732 = vmatpush3.msra.mxu0 %v5527_v6  ;;  %9654 = vmatprep.subr.mxu1 %v10113_v21 }
 0xaca   :  { %9733 = vmatprep.subr.mxu0 %v10113_v21  ;;  %9655 = vmatpush3.msra.mxu1 %v4927_v7 }
 0xacb   :  { %9734 = vmatpush3.msra.mxu0 %v5526_v8  ;;  %9656 = vmatprep.subr.mxu1 %v10113_v21 }
 0xacc   :  { %9735 = vmatprep.subr.mxu0 %v10113_v21  ;;  %9657 = vmatpush3.msra.mxu1 %v4926_v9 }
 0xacd   :  { %9736 = vmatpush3.msra.mxu0 %v5525_v37  ;;  %9737 = vmatprep.mubr.msk.f32.mxu0 %vm10114_vm2, %v10113_v21 }
 0xace   :  { %9658 = vmatprep.subr.mxu1 %v10113_v21  ;;  %9738 = vmatmul.mubr.msk.f32.vlgmr.msra.gmra.mxu0 %vm263_vm1, %v10737_v39 }
 0xacf   :  { %9751 = vmatprep.subr.mxu0 %v10113_v21  ;;  %9659 = vmatpush3.msra.mxu1 %v4925_v36 }
 0xad0   :  { %9660 = vmatprep.mubr.msk.f32.mxu1 %vm10114_vm2, %v10113_v21  ;;  %9752 = vmatpush3.msra.mxu0 %v5520_v63 }
 0xad1   :  { %9661 = vmatmul.mubr.msk.f32.vlgmr.msra.gmra.mxu1 %vm263_vm1, %v10737_v39  ;;  %9674 = vmatprep.subr.mxu1 %v10113_v21 }
 0xad2   :  { %9753 = vmatprep.subr.mxu0 %v10113_v21  ;;  %9675 = vmatpush3.msra.mxu1 %v4920_v0 }
 0xad3   :  { %9754 = vmatpush3.msra.mxu0 %v5519_v1  ;;  %9676 = vmatprep.subr.mxu1 %v10113_v21  ;;  %v8624_v1 = vld [vmem:[%s10990_s11 + $0x1] ss:$0 sm:$0xff] }
 0xad4   :  { %9755 = vmatprep.subr.mxu0 %v10113_v21  ;;  %9677 = vmatpush3.msra.mxu1 %v4919_v2 }
 0xad5   :  { %9756 = vmatpush3.msra.mxu0 %v5518_v3  ;;  %9678 = vmatprep.subr.mxu1 %v10113_v21 }
 0xad6   :  { %9757 = vmatprep.subr.mxu0 %v10113_v21  ;;  %9679 = vmatpush3.msra.mxu1 %v4918_v4  ;;  %v8612_v4 = vld [vmem:[%s10995_s15 + $0x1] ss:$0 sm:$0xff] }
 0xad7   :  { %9758 = vmatpush3.msra.mxu0 %v5517_v5  ;;  %9759 = vmatprep.mubr.msk.f32.mxu0 %vm10114_vm2, %v10113_v21 }
 0xad8   :  { %9680 = vmatprep.subr.mxu1 %v10113_v21  ;;  %9760 = vmatmul.mubr.msk.f32.vlgmr.msra.gmra.mxu0 %vm263_vm1, %v10729_v34 }
 0xad9   :  { %9773 = vmatprep.subr.mxu0 %v10113_v21  ;;  %9681 = vmatpush3.msra.mxu1 %v4917_v31 }
 0xada   :  { %9682 = vmatprep.mubr.msk.f32.mxu1 %vm10114_vm2, %v10113_v21  ;;  %9774 = vmatpush3.msra.mxu0 %v5528_v30 }
 0xadb   :  { %9683 = vmatmul.mubr.msk.f32.vlgmr.msra.gmra.mxu1 %vm263_vm1, %v10729_v34  ;;  %9696 = vmatprep.subr.mxu1 %v10113_v21 }
 0xadc   :  { %9775 = vmatprep.subr.mxu0 %v10113_v21  ;;  %9697 = vmatpush3.msra.mxu1 %v4928_v41  ;;  %v8637_v41 = vld [vmem:[%s11019_s19 + $0x2] ss:$0 sm:$0xff] }
 0xadd   :  { %9776 = vmatpush3.msra.mxu0 %v5527_v6  ;;  %9698 = vmatprep.subr.mxu1 %v10113_v21 }
 0xade   :  { %9777 = vmatprep.subr.mxu0 %v10113_v21  ;;  %9699 = vmatpush3.msra.mxu1 %v4927_v7 }
 0xadf   :  { %9778 = vmatpush3.msra.mxu0 %v5526_v8  ;;  %9700 = vmatprep.subr.mxu1 %v10113_v21  ;;  %v8626_v8 = vld [vmem:[%s10990_s11 + $0x3] ss:$0 sm:$0xff]  ;;  %s8525_s11 = sld [smem:[%s11251_s0 + %s10150_s8]]  }
 0xae0   :  { %9779 = vmatprep.subr.mxu0 %v10113_v21  ;;  %9701 = vmatpush3.msra.mxu1 %v4926_v9 }
 0xae1   :  { %9780 = vmatpush3.msra.mxu0 %v5525_v37  ;;  %9781 = vmatprep.mubr.msk.f32.mxu0 %vm10114_vm2, %v10113_v21 }
 0xae2   :  { %9702 = vmatprep.subr.mxu1 %v10113_v21  ;;  %9782 = vmatmul.mubr.msk.f32.vlgmr.msra.gmra.mxu0 %vm263_vm1, %v10729_v34 }
 0xae3   :  { %9703 = vmatpush3.msra.mxu1 %v4925_v36  ;;  %9704 = vmatprep.mubr.msk.f32.mxu1 %vm10114_vm2, %v10113_v21  ;;  %v8614_v36 = vld [vmem:[%s10995_s15 + $0x3] ss:$0 sm:$0xff]  ;;  %s8527_s15 = sld [smem:[%s11251_s0 + %s10151_s12]]  }
 0xae4   :  { %9705 = vmatmul.mubr.msk.f32.vlgmr.msra.gmra.mxu1 %vm263_vm1, %v10729_v34  ;;  %9718 = vmatprep.subr.mxu1 %v10113_v21 }
 0xae5   :  { %9719 = vmatpush3.msra.mxu1 %v5524_v10  ;;  %9726 = vmatprep.mubr.msk.f32.mxu1 %vm10114_vm2, %v10113_v21 }
 0xae6   :  { %9720 = vmatprep.subr.mxu1 %v10113_v21  ;;  %9795 = vmatprep.subr.mxu0 %v10113_v21 }
 0xae7   :  { %9721 = vmatpush3.msra.mxu1 %v5523_v11  ;;  %9797 = vmatprep.mubr.msk.f32.mxu0 %vm10114_vm2, %v10113_v21 }
 0xae8   :  { %9722 = vmatprep.subr.mxu1 %v10113_v21 }
 0xae9   :  { %9723 = vmatpush3.msra.mxu1 %v5522_v12 }
 0xaea   :  { %9724 = vmatprep.subr.mxu1 %v10113_v21 }
 0xaeb   :  { %9725 = vmatpush3.msra.mxu1 %v5521_v43 }
 0xaec   :  { %9727 = vmatmul.mubr.msk.f32.vlgmr.msra.gmra.mxu1 %vm263_vm1, %v10737_v39  ;;  %9740 = vmatprep.subr.mxu1 %v10113_v21 }
 0xaed   :  { %9741 = vmatpush3.msra.mxu1 %v5532_v44  ;;  %9748 = vmatprep.mubr.msk.f32.mxu1 %vm10114_vm2, %v10113_v21 }
 0xaee   :  { %9742 = vmatprep.subr.mxu1 %v10113_v21 }
 0xaef   :  { %9743 = vmatpush3.msra.mxu1 %v5531_v13 }
 0xaf0   :  { %9744 = vmatprep.subr.mxu1 %v10113_v21 }
 0xaf1   :  { %9745 = vmatpush3.msra.mxu1 %v5530_v53 }
 0xaf2   :  { %9746 = vmatprep.subr.mxu1 %v10113_v21 }
 0xaf3   :  { %9747 = vmatpush3.msra.mxu1 %v5529_v14 }
 0xaf4   :  { %9749 = vmatmul.mubr.msk.f32.vlgmr.msra.gmra.mxu1 %vm263_vm1, %v10737_v39  ;;  %9762 = vmatprep.subr.mxu1 %v10113_v21 }
 0xaf5   :  { %9763 = vmatpush3.msra.mxu1 %v5524_v10  ;;  %9770 = vmatprep.mubr.msk.f32.mxu1 %vm10114_vm2, %v10113_v21 }
 0xaf6   :  { %9764 = vmatprep.subr.mxu1 %v10113_v21 }
 0xaf7   :  { %9765 = vmatpush3.msra.mxu1 %v5523_v11 }
 0xaf8   :  { %9766 = vmatprep.subr.mxu1 %v10113_v21 }
 0xaf9   :  { %9767 = vmatpush3.msra.mxu1 %v5522_v12 }
 0xafa   :  { %9768 = vmatprep.subr.mxu1 %v10113_v21 }
 0xafb   :  { %9769 = vmatpush3.msra.mxu1 %v5521_v43 }
 0xafc   :  { %9771 = vmatmul.mubr.msk.f32.vlgmr.msra.gmra.mxu1 %vm263_vm1, %v10729_v34  ;;  %9784 = vmatprep.subr.mxu1 %v10113_v21 }
 0xafd   :  { %9785 = vmatpush3.msra.mxu1 %v5532_v44  ;;  %9792 = vmatprep.mubr.msk.f32.mxu1 %vm10114_vm2, %v10113_v21 }
 0xafe   :  { %9786 = vmatprep.subr.mxu1 %v10113_v21 }
 0xaff   :  { %9787 = vmatpush3.msra.mxu1 %v5531_v13 }
 0xb00   :  { %9788 = vmatprep.subr.mxu1 %v10113_v21 }
 0xb01   :  { %9789 = vmatpush3.msra.mxu1 %v5530_v53 }
 0xb02   :  { %9790 = vmatprep.subr.mxu1 %v10113_v21 }
 0xb03   :  { %9791 = vmatpush3.msra.mxu1 %v5529_v14 }
 0xb04   :  { %9793 = vmatmul.mubr.msk.f32.vlgmr.msra.gmra.mxu1 %vm263_vm1, %v10729_v34  ;;  %9805 = vmatprep.subr.mxu1 %v10113_v21 }
 0xb05   :  { %9807 = vmatprep.mubr.msk.f32.mxu1 %vm10114_vm2, %v10113_v21 }
 0xb4a   :  { %v4699_v15 = vpop.f32.mrf.mxu0 }
 0xb4b   :  { %v4700_v54 = vadd.f32 %v8611_v28, %v4699_v15 }
 0xb4c   :  { %v4416_v16 = vpop.f32.mrf.mxu1  ;;  %v9585_v17 = vpop.f32.mrf.mxu0 }
 0xb4d   :  { %v4417_v32 = vadd.f32 %v8611_v28, %v4416_v16 }
 0xb4e   :  { %v9541_v18 = vpop.f32.mrf.mxu1 }
 0xb52   :  { %v4839_v19 = vpop.f32.mrf.mxu0 }
 0xb53   :  { %v4840_v60 = vadd.f32 %v8613_v45, %v4839_v19 }
 0xb54   :  { %v9607_v20 = vpop.f32.mrf.mxu0 }
 0xb55   :  { %v4486_v22 = vpop.f32.mrf.mxu1 }
 0xb56   :  { %v4487_v30 = vadd.f32 %v8612_v4, %v4486_v22 }
 0xb57   :  { %v9552_v23 = vpop.f32.mrf.mxu1 }
 0xb5c   :  { %v5023_v25 = vpop.f32.mrf.mxu0 }
 0xb5d   :  { %v5024_v26 = vadd.f32 %v8623_v24, %v5023_v25  ;;  %v8636_v25 = vld [vmem:[%s11019_s19 + $0x1] ss:$0 sm:$0xff] }
 0xb5e   :  { %v9629_v27 = vpop.f32.mrf.mxu0 }
 0xb5f   :  { %v4556_v29 = vpop.f32.mrf.mxu1  ;;  %9796 = vmatpush3.xpose.msk.msra.mxu0 %vm2127_vm3, %v5024_v26 }
 0xb60   :  { %9800 = vmatprep.subr.mxu0 %v10113_v21  ;;  %v4557_v47 = vadd.f32 %v8613_v45, %v4556_v29  ;;  %v8638_v29 = vld [vmem:[%s11019_s19 + $0x3] ss:$0 sm:$0xff]  ;;  %s8528_s19 = sld [smem:[%s11251_s0 + %s10152_s16]]  }
 0xb61   :  { %v9563_v33 = vpop.f32.mrf.mxu1 }
 0xb62   :  { %9798 = vmatmul.mubr.msk.f32.vlgmr.msra.gmra.mxu0 %vm2127_vm3, %v4417_v32 }
 0xb63   :  { %9802 = vmatprep.mubr.msk.f32.mxu0 %vm10114_vm2, %v10113_v21 }
 0xb66   :  { %v5163_v38 = vpop.f32.mrf.mxu0 }
 0xb67   :  { %v5164_v40 = vadd.f32 %v8625_v35, %v5163_v38 }
 0xb68   :  { %v9651_v42 = vpop.f32.mrf.mxu0 }
 0xb69   :  { %v4626_v46 = vpop.f32.mrf.mxu1  ;;  %9806 = vmatpush3.xpose.msk.msra.mxu1 %vm2127_vm3, %v5164_v40 }
 0xb6a   :  { %9815 = vmatprep.subr.mxu1 %v10113_v21  ;;  %v4627_v12 = vadd.f32 %v8614_v36, %v4626_v46 }
 0xb6b   :  { %v9574_v48 = vpop.f32.mrf.mxu1 }
 0xb6c   :  { %9808 = vmatmul.mubr.msk.f32.vlgmr.msra.gmra.mxu1 %vm2127_vm3, %v4557_v47 }
 0xb6d   :  { %9817 = vmatprep.mubr.msk.f32.mxu1 %vm10114_vm2, %v10113_v21 }
 0xb70   :  { %v5303_v49 = vpop.f32.mrf.mxu0 }
 0xb71   :  { %v5304_v50 = vadd.f32 %v8623_v24, %v5303_v49 }
 0xb72   :  { %v9673_v51 = vpop.f32.mrf.mxu0 }
 0xb73   :  { %v4769_v52 = vpop.f32.mrf.mxu1  ;;  %9816 = vmatpush3.xpose.msk.msra.mxu1 %vm2127_vm3, %v5304_v50 }
 0xb74   :  { %9825 = vmatprep.subr.mxu1 %v10113_v21  ;;  %v4770_v16 = vadd.f32 %v8612_v4, %v4769_v52 }
 0xb75   :  { %v9596_v55 = vpop.f32.mrf.mxu1 }
 0xb76   :  { %9818 = vmatmul.mubr.msk.f32.vlgmr.msra.gmra.mxu1 %vm2127_vm3, %v4700_v54 }
 0xb77   :  { %9827 = vmatprep.mubr.msk.f32.mxu1 %vm10114_vm2, %v10113_v21 }
 0xb7a   :  { %v5443_v56 = vpop.f32.mrf.mxu0 }
 0xb7b   :  { %v5444_v57 = vadd.f32 %v8625_v35, %v5443_v56 }
 0xb7c   :  { %v9695_v58 = vpop.f32.mrf.mxu0 }
 0xb7d   :  { %v4909_v59 = vpop.f32.mrf.mxu1  ;;  %9826 = vmatpush3.xpose.msk.msra.mxu1 %vm2127_vm3, %v5444_v57 }
 0xb7e   :  { %9835 = vmatprep.subr.mxu1 %v10113_v21  ;;  %v4910_v24 = vadd.f32 %v8614_v36, %v4909_v59 }
 0xb7f   :  { %v9618_v61 = vpop.f32.mrf.mxu1 }
 0xb80   :  { %9828 = vmatmul.mubr.msk.f32.vlgmr.msra.gmra.mxu1 %vm2127_vm3, %v4840_v60 }
 0xb81   :  { %9837 = vmatprep.mubr.msk.f32.mxu1 %vm10114_vm2, %v10113_v21 }
 0xb84   :  { %v5627_v63 = vpop.f32.mrf.mxu0 }
 0xb85   :  { %v5628_v0 = vadd.f32 %v8635_v62, %v5627_v63 }
 0xb86   :  { %v9717_v2 = vpop.f32.mrf.mxu0 }
 0xb87   :  { %v5093_v3 = vpop.f32.mrf.mxu1  ;;  %9836 = vmatpush3.msra.mxu1 %v5628_v0 }
 0xb88   :  { %v5094_v5 = vadd.f32 %v8624_v1, %v5093_v3  ;;  %9845 = vmatprep.subr.mxu1 %v10113_v21 }
 0xb89   :  { %v9640_v31 = vpop.f32.mrf.mxu1 }
 0xb8a   :  { %9801 = vmatpush3.xpose.msk.msra.mxu0 %vm2127_vm3, %v5094_v5 }
 0xb8b   :  { %9810 = vmatprep.subr.mxu0 %v10113_v21 }
 0xb8d   :  { %9803 = vmatmul.mubr.msk.f32.vlgmr.msra.gmra.mxu0 %vm2127_vm3, %v4487_v30 }
 0xb8e   :  { %v5767_v6 = vpop.f32.mrf.mxu0  ;;  %9812 = vmatprep.mubr.msk.f32.mxu0 %vm10114_vm2, %v10113_v21 }
 0xb8f   :  { %v11036_v7 = vadd.f32 %v8637_v41, %v5767_v6 }
 0xb90   :  { %v9739_v9 = vpop.f32.mrf.mxu0 }
 0xb91   :  { %v5233_v37 = vpop.f32.mrf.mxu1 }
 0xb92   :  { %v5234_v10 = vadd.f32 %v8626_v8, %v5233_v37 }
 0xb93   :  { %v9662_v11 = vpop.f32.mrf.mxu1 }
 0xb94   :  { %9811 = vmatpush3.xpose.msk.msra.mxu0 %vm2127_vm3, %v5234_v10 }
 0xb95   :  { %9820 = vmatprep.subr.mxu0 %v10113_v21 }
 0xb97   :  { %9813 = vmatmul.mubr.msk.f32.vlgmr.msra.gmra.mxu0 %vm2127_vm3, %v4627_v12 }
 0xb98   :  { %v5907_v43 = vpop.f32.mrf.mxu0  ;;  %9822 = vmatprep.mubr.msk.f32.mxu0 %vm10114_vm2, %v10113_v21 }
 0xb99   :  { %v11045_v44 = vadd.f32 %v8635_v62, %v5907_v43 }
 0xb9a   :  { %v9761_v13 = vpop.f32.mrf.mxu0 }
 0xb9b   :  { %v5373_v53 = vpop.f32.mrf.mxu1 }
 0xb9c   :  { %v5374_v14 = vadd.f32 %v8624_v1, %v5373_v53 }
 0xb9d   :  { %v9684_v15 = vpop.f32.mrf.mxu1 }
 0xb9e   :  { %9821 = vmatpush3.xpose.msk.msra.mxu0 %vm2127_vm3, %v5374_v14 }
 0xb9f   :  { %9830 = vmatprep.subr.mxu0 %v10113_v21 }
 0xba1   :  { %9823 = vmatmul.mubr.msk.f32.vlgmr.msra.gmra.mxu0 %vm2127_vm3, %v4770_v16 }
 0xba2   :  { %v6047_v17 = vpop.f32.mrf.mxu0  ;;  %9832 = vmatprep.mubr.msk.f32.mxu0 %vm10114_vm2, %v10113_v21 }
 0xba3   :  { %v11052_v18 = vadd.f32 %v8637_v41, %v6047_v17 }
 0xba4   :  { %v5513_v19 = vpop.f32.mrf.mxu1  ;;  %v9783_v20 = vpop.f32.mrf.mxu0 }
 0xba5   :  { %v5514_v22 = vadd.f32 %v8626_v8, %v5513_v19 }
 0xba6   :  { %v9706_v23 = vpop.f32.mrf.mxu1 }
 0xba7   :  { %9831 = vmatpush3.xpose.msk.msra.mxu0 %vm2127_vm3, %v5514_v22 }
 0xba8   :  { %9840 = vmatprep.subr.mxu0 %v10113_v21 }
 0xbaa   :  { %9833 = vmatmul.mubr.msk.f32.vlgmr.msra.gmra.mxu0 %vm2127_vm3, %v4910_v24 }
 0xbab   :  { %9842 = vmatprep.mubr.msk.f32.mxu0 %vm10114_vm2, %v10113_v21 }
 0xbac   :  { %v5697_v26 = vpop.f32.mrf.mxu1 }
 0xbad   :  { %v5698_v27 = vadd.f32 %v8636_v25, %v5697_v26 }
 0xbae   :  { %v9728_v28 = vpop.f32.mrf.mxu1 }
 0xbaf   :  { %9841 = vmatpush3.msra.mxu0 %v5698_v27 }
 0xbb0   :  { %9850 = vmatprep.subr.mxu0 %v10113_v21 }
 0xbb4   :  { %v5837_v32 = vpop.f32.mrf.mxu1 }
 0xbb5   :  { %v11062_v33 = vadd.f32 %v8638_v29, %v5837_v32 }
 0xbb6   :  { %v9750_v35 = vpop.f32.mrf.mxu1 }
 0xbbc   :  { %v5977_v38 = vpop.f32.mrf.mxu1 }
 0xbbd   :  { %v11064_v40 = vadd.f32 %v8636_v25, %v5977_v38 }
 0xbbe   :  { %v9772_v42 = vpop.f32.mrf.mxu1 }
 0xbc4   :  { %v6117_v45 = vpop.f32.mrf.mxu1 }
 0xbc5   :  { %v11066_v46 = vadd.f32 %v8638_v29, %v6117_v45 }
 0xbc6   :  { %v9794_v47 = vpop.f32.mrf.mxu1 }
 0xc22   :  { %v6193_v48 = vpop.f32.mrf.mxu0 }
 0xc23   :  { %v6729_v49 = vsel %vm2127_vm3, %v6193_v48, -inf }
 0xc24   :  { %6730 = vmax.xlane.f32.xlu0 %v6729_v49  ;;  %v9799_v50 = vpop.f32.mrf.mxu0 }
 0xc2c   :  { %v6345_v51 = vpop.f32.mrf.mxu1 }
 0xc2d   :  { %v6735_v52 = vsel %vm2127_vm3, %v6345_v51, -inf }
 0xc2e   :  { %6736 = vmax.xlane.f32.xlu0 %v6735_v52  ;;  %v9809_v54 = vpop.f32.mrf.mxu1 }
 0xc36   :  { %v6497_v55 = vpop.f32.mrf.mxu1 }
 0xc37   :  { %v6741_v56 = vsel %vm2127_vm3, %v6497_v55, -inf }
 0xc38   :  { %6742 = vmax.xlane.f32.xlu0 %v6741_v56  ;;  %v9819_v57 = vpop.f32.mrf.mxu1 }
 0xc40   :  { %v6649_v58 = vpop.f32.mrf.mxu1 }
 0xc41   :  { %v6747_v59 = vsel %vm2127_vm3, %v6649_v58, -inf }
 0xc42   :  { %6748 = vmax.xlane.f32.xlu0 %v6747_v59  ;;  %v9829_v60 = vpop.f32.mrf.mxu1 }
 0xc4d   :  { %v6269_v61 = vpop.f32.mrf.mxu0 }
 0xc4e   :  { %v6732_v62 = vsel %vm2127_vm3, %v6269_v61, -inf }
 0xc4f   :  { %6733 = vmax.xlane.f32.xlu1 %v6732_v62  ;;  %v9804_v63 = vpop.f32.mrf.mxu0 }
 0xc57   :  { %v6421_v0 = vpop.f32.mrf.mxu0 }
 0xc58   :  { %v6738_v1 = vsel %vm2127_vm3, %v6421_v0, -inf }
 0xc59   :  { %6739 = vmax.xlane.f32.xlu1 %v6738_v1  ;;  %v9814_v2 = vpop.f32.mrf.mxu0 }
 0xc61   :  { %v6573_v3 = vpop.f32.mrf.mxu0 }
 0xc62   :  { %v6744_v4 = vsel %vm2127_vm3, %v6573_v3, -inf }
 0xc63   :  { %6745 = vmax.xlane.f32.xlu1 %v6744_v4  ;;  %v9824_v5 = vpop.f32.mrf.mxu0 }
 0xc6a   :  { %v6725_v31 = vpop.f32.mrf.mxu0 }
 0xc6b   :  { %v6750_v30 = vsel %vm2127_vm3, %v6725_v31, -inf }
 0xc6c   :  { %6751 = vmax.xlane.f32.xlu1 %v6750_v30  ;;  %v9834_v41 = vpop.f32.mrf.mxu0 }
 0xcad   :  { %v6731_v6 = vpop.xlane.xlu0 %6730 }
 0xcae   :  { %v6753_v8 = vsub.f32 %v6193_v48, %v6731_v6 }
 0xcb0   :  { %v6761_v9 = vmul.f32 1.442695, %v6753_v8 }
 0xcb2   :  { %10070 = vpow2.f32 %v6761_v9 }
 0xcb7   :  { %v6737_v37 = vpop.xlane.xlu0 %6736 }
 0xcb8   :  { %v6755_v36 = vsub.f32 %v6345_v51, %v6737_v37 }
 0xcba   :  { %v6765_v10 = vmul.f32 1.442695, %v6755_v36  ;;  %v7401_v36 = vld [vmem:[%s11119_s23] sm:$0xff] }
 0xcbc   :  { %10072 = vpow2.f32 %v6765_v10  ;;  %v7403_v10 = vld [vmem:[%s11119_s23 + $0x10] sm:$0xff] }
 0xcbf   :  { %v10071_v11 = vpop.eup %10070 }
 0xcc0   :  { %v6777_v12 = vsel %vm2127_vm3, %v10071_v11, 0.0 }
 0xcc1   :  { %v6743_v43 = vpop.xlane.xlu0 %6742  ;;  %6778 = vadd.xlane.f32.xlu0 %v6777_v12 }
 0xcc2   :  { %v6757_v13 = vsub.f32 %v6497_v55, %v6743_v43 }
 0xcc4   :  { %v6769_v53 = vmul.f32 1.442695, %v6757_v13 }
 0xcc6   :  { %10074 = vpow2.f32 %v6769_v53 }
 0xcc9   :  { %v10073_v14 = vpop.eup %10072 }
 0xcca   :  { %v6783_v15 = vsel %vm2127_vm3, %v10073_v14, 0.0 }
 0xccb   :  { %v6749_v16 = vpop.xlane.xlu0 %6748  ;;  %6784 = vadd.xlane.f32.xlu0 %v6783_v15 }
 0xccc   :  { %v6759_v17 = vsub.f32 %v6649_v58, %v6749_v16 }
 0xcce   :  { %v6773_v19 = vmul.f32 1.442695, %v6759_v17  ;;  %v7404_v17 = vld [vmem:[%s11119_s23 + $0x18] sm:$0xff] }
 0xcd0   :  { %10076 = vpow2.f32 %v6773_v19 }
 0xcd3   :  { %v10075_v20 = vpop.eup %10074 }
 0xcd4   :  { %v6789_v22 = vsel %vm2127_vm3, %v10075_v20, 0.0 }
 0xcd5   :  { %6790 = vadd.xlane.f32.xlu0 %v6789_v22 }
 0xcd8   :  { %v6734_v23 = vpop.xlane.xlu1 %6733 }
 0xcd9   :  { %v6754_v24 = vsub.f32 %v6269_v61, %v6734_v23 }
 0xcdb   :  { %v6763_v25 = vmul.f32 1.442695, %v6754_v24 }
 0xcdd   :  { %v10077_v26 = vpop.eup %10076  ;;  %10078 = vpow2.f32 %v6763_v25 }
 0xcde   :  { %v6795_v27 = vsel %vm2127_vm3, %v10077_v26, 0.0 }
 0xcdf   :  { %6796 = vadd.xlane.f32.xlu0 %v6795_v27 }
 0xce2   :  { %v6740_v28 = vpop.xlane.xlu1 %6739 }
 0xce3   :  { %v6756_v29 = vsub.f32 %v6421_v0, %v6740_v28 }
 0xce5   :  { %v6767_v32 = vmul.f32 1.442695, %v6756_v29 }
 0xce7   :  { %10080 = vpow2.f32 %v6767_v32 }
 0xcea   :  { %v10079_v35 = vpop.eup %10078 }
 0xceb   :  { %v6780_v38 = vsel %vm2127_vm3, %v10079_v35, 0.0 }
 0xcec   :  { %v6746_v42 = vpop.xlane.xlu1 %6745  ;;  %6781 = vadd.xlane.f32.xlu1 %v6780_v38 }
 0xced   :  { %v6758_v45 = vsub.f32 %v6573_v3, %v6746_v42 }
 0xcef   :  { %v6771_v47 = vmul.f32 1.442695, %v6758_v45 }
 0xcf1   :  { %10082 = vpow2.f32 %v6771_v47 }
 0xcf4   :  { %v10081_v48 = vpop.eup %10080 }
 0xcf5   :  { %v6752_v49 = vpop.xlane.xlu1 %6751  ;;  %v6786_v50 = vsel %vm2127_vm3, %v10081_v48, 0.0 }
 0xcf6   :  { %v6760_v51 = vsub.f32 %v6725_v31, %v6752_v49  ;;  %6787 = vadd.xlane.f32.xlu1 %v6786_v50 }
 0xcf8   :  { %v6775_v52 = vmul.f32 1.442695, %v6760_v51 }
 0xcfa   :  { %10084 = vpow2.f32 %v6775_v52 }
 0xcfe   :  { %v10083_v54 = vpop.eup %10082 }
 0xcff   :  { %v6792_v55 = vsel %vm2127_vm3, %v10083_v54, 0.0 }
 0xd00   :  { %6793 = vadd.xlane.f32.xlu1 %v6792_v55 }
 0xd07   :  { %v10085_v56 = vpop.eup %10084 }
 0xd08   :  { %v6798_v57 = vsel %vm2127_vm3, %v10085_v56, 0.0 }
 0xd09   :  { %6799 = vadd.xlane.f32.xlu1 %v6798_v57  ;;  %v8679_v57 = vld [vmem:[%s8515_s27] ss:$0 sm:$0xff] }
 0xd4a   :  { %v6779_v58 = vpop.xlane.xlu0 %6778 }
 0xd4b   :  { %10086 = vrcp.f32 %v6779_v58 }
 0xd54   :  { %v6785_v59 = vpop.xlane.xlu0 %6784 }
 0xd55   :  { %10088 = vrcp.f32 %v6785_v59 }
 0xd58   :  { %v10087_v60 = vpop.eup %10086 }
 0xd59   :  { %v6809_v61 = vmul.f32 %v10087_v60, %v10071_v11 }
 0xd5b   :  { %9838 = vmatmul.mubr.msk.f32.vlgmr.msra.gmra.mxu1 %vm2127_vm3, %v6809_v61 }
 0xd5c   :  { %9846 = vmatpush3.msra.mxu1 %v11036_v7  ;;  %9847 = vmatprep.mubr.msk.f32.mxu1 %vm10114_vm2, %v10113_v21 }
 0xd5d   :  { %9855 = vmatprep.subr.mxu1 %v10113_v21 }
 0xd5e   :  { %v6791_v62 = vpop.xlane.xlu0 %6790 }
 0xd5f   :  { %10090 = vrcp.f32 %v6791_v62 }
 0xd62   :  { %v10089_v63 = vpop.eup %10088 }
 0xd63   :  { %v6811_v0 = vmul.f32 %v10089_v63, %v10073_v14 }
 0xd65   :  { %9848 = vmatmul.mubr.msk.f32.vlgmr.msra.gmra.mxu1 %vm2127_vm3, %v6811_v0 }
 0xd66   :  { %9856 = vmatpush3.msra.mxu1 %v11045_v44  ;;  %9857 = vmatprep.mubr.msk.f32.mxu1 %vm10114_vm2, %v10113_v21 }
 0xd67   :  { %9865 = vmatprep.subr.mxu1 %v10113_v21 }
 0xd68   :  { %v6797_v1 = vpop.xlane.xlu0 %6796 }
 0xd69   :  { %10092 = vrcp.f32 %v6797_v1 }
 0xd6c   :  { %v10091_v7 = vpop.eup %10090 }
 0xd6d   :  { %v6813_v2 = vmul.f32 %v10091_v7, %v10075_v20 }
 0xd6f   :  { %9858 = vmatmul.mubr.msk.f32.vlgmr.msra.gmra.mxu1 %vm2127_vm3, %v6813_v2 }
 0xd70   :  { %9866 = vmatpush3.msra.mxu1 %v11052_v18  ;;  %9867 = vmatprep.mubr.msk.f32.mxu1 %vm10114_vm2, %v10113_v21 }
 0xd71   :  { %9875 = vmatprep.subr.mxu1 %v10113_v21 }
 0xd75   :  { %v6782_v3 = vpop.xlane.xlu1 %6781 }
 0xd76   :  { %v10093_v44 = vpop.eup %10092  ;;  %10094 = vrcp.f32 %v6782_v3 }
 0xd77   :  { %v6815_v4 = vmul.f32 %v10093_v44, %v10077_v26 }
 0xd79   :  { %9868 = vmatmul.mubr.msk.f32.vlgmr.msra.gmra.mxu1 %vm2127_vm3, %v6815_v4 }
 0xd7a   :  { %9877 = vmatprep.mubr.msk.f32.mxu1 %vm10114_vm2, %v10113_v21  ;;  %9876 = vmatpush3.msra.mxu1 %v7401_v36 }
 0xd7b   :  { %9885 = vmatprep.subr.mxu1 %v10113_v21 }
 0xd7f   :  { %v6788_v5 = vpop.xlane.xlu1 %6787 }
 0xd80   :  { %10096 = vrcp.f32 %v6788_v5 }
 0xd83   :  { %v10095_v31 = vpop.eup %10094 }
 0xd84   :  { %v6810_v30 = vmul.f32 %v10095_v31, %v10079_v35 }
 0xd86   :  { %9843 = vmatmul.mubr.msk.f32.vlgmr.msra.gmra.mxu0 %vm2127_vm3, %v6810_v30 }
 0xd87   :  { %9851 = vmatpush3.msra.mxu0 %v11062_v33  ;;  %9852 = vmatprep.mubr.msk.f32.mxu0 %vm10114_vm2, %v10113_v21 }
 0xd88   :  { %9860 = vmatprep.subr.mxu0 %v10113_v21 }
 0xd89   :  { %v6794_v18 = vpop.xlane.xlu1 %6793 }
 0xd8a   :  { %10098 = vrcp.f32 %v6794_v18 }
 0xd8d   :  { %v10097_v41 = vpop.eup %10096 }
 0xd8e   :  { %v6812_v6 = vmul.f32 %v10097_v41, %v10081_v48 }
 0xd90   :  { %9853 = vmatmul.mubr.msk.f32.vlgmr.msra.gmra.mxu0 %vm2127_vm3, %v6812_v6 }
 0xd91   :  { %9861 = vmatpush3.msra.mxu0 %v11064_v40  ;;  %9862 = vmatprep.mubr.msk.f32.mxu0 %vm10114_vm2, %v10113_v21 }
 0xd92   :  { %v6800_v8 = vpop.xlane.xlu1 %6799  ;;  %9870 = vmatprep.subr.mxu0 %v10113_v21 }
 0xd93   :  { %10100 = vrcp.f32 %v6800_v8 }
 0xd97   :  { %v10099_v33 = vpop.eup %10098 }
 0xd98   :  { %v6814_v9 = vmul.f32 %v10099_v33, %v10083_v54 }
 0xd9a   :  { %9863 = vmatmul.mubr.msk.f32.vlgmr.msra.gmra.mxu0 %vm2127_vm3, %v6814_v9 }
 0xd9b   :  { %9871 = vmatpush3.msra.mxu0 %v11066_v46  ;;  %9872 = vmatprep.mubr.msk.f32.mxu0 %vm10114_vm2, %v10113_v21  ;;  %v7402_v46 = vld [vmem:[%s11119_s23 + $0x8] sm:$0xff] }
 0xd9c   :  { %9880 = vmatprep.subr.mxu0 %v10113_v21 }
 0xda0   :  { %v10101_v40 = vpop.eup %10100 }
 0xda1   :  { %v6816_v37 = vmul.f32 %v10101_v40, %v10085_v56 }
 0xda3   :  { %9873 = vmatmul.mubr.msk.f32.vlgmr.msra.gmra.mxu0 %vm2127_vm3, %v6816_v37 }
 0xda4   :  { %9882 = vmatprep.mubr.msk.f32.mxu0 %vm10114_vm2, %v10113_v21  ;;  %9881 = vmatpush3.msra.mxu0 %v7402_v46 }
 0xda5   :  { %9890 = vmatprep.subr.mxu0 %v10113_v21 }
 0xe1b   :  { %v6886_v11 = vpop.f32.mrf.mxu1 }
 0xe1c   :  { %9878 = vmatmul.mubr.msk.f32.vlgmr.msra.gmra.mxu1 %vm2127_vm3, %v6886_v11  ;;  %v8061_v11 = vld [vmem:[%s8516_s1 + $0x18] sm:$0xff] }
 0xe1d   :  { %v9839_v12 = vpop.f32.mrf.mxu1  ;;  %9886 = vmatpush3.msra.mxu1 %v7403_v10  ;;  %9887 = vmatprep.mubr.msk.f32.mxu1 %vm10114_vm2, %v10113_v21 }
 0xe1e   :  { %9895 = vmatprep.subr.mxu1 %v10113_v21  ;;  %v8060_v12 = vld [vmem:[%s8516_s1 + $0x10] sm:$0xff] }
 0xe25   :  { %v7032_v43 = vpop.f32.mrf.mxu1 }
 0xe26   :  { %9888 = vmatmul.mubr.msk.f32.vlgmr.msra.gmra.mxu1 %vm2127_vm3, %v7032_v43  ;;  %v8059_v43 = vld [vmem:[%s8516_s1 + $0x8] sm:$0xff] }
 0xe27   :  { %v9849_v13 = vpop.f32.mrf.mxu1  ;;  %9896 = vmatpush3.msra.mxu1 %v7401_v36  ;;  %9897 = vmatprep.mubr.msk.f32.mxu1 %vm10114_vm2, %v10113_v21 }
 0xe28   :  { %9905 = vmatprep.subr.mxu1 %v10113_v21  ;;  %v8058_v13 = vld [vmem:[%s8516_s1] sm:$0xff] }
 0xe2f   :  { %v7178_v53 = vpop.f32.mrf.mxu1 }
 0xe30   :  { %9898 = vmatmul.mubr.msk.f32.vlgmr.msra.gmra.mxu1 %vm2127_vm3, %v7178_v53  ;;  %v8167_v53 = vld [vmem:[%s11186_s5 + $0x78] sm:$0xff] }
 0xe31   :  { %v9859_v14 = vpop.f32.mrf.mxu1  ;;  %9906 = vmatpush3.msra.mxu1 %v7403_v10  ;;  %9907 = vmatprep.mubr.msk.f32.mxu1 %vm10114_vm2, %v10113_v21 }
 0xe32   :  { %9915 = vmatprep.subr.mxu1 %v8061_v11  ;;  %v8166_v14 = vld [vmem:[%s11186_s5 + $0x70] sm:$0xff] }
 0xe39   :  { %v7324_v15 = vpop.f32.mrf.mxu1 }
 0xe3a   :  { %9908 = vmatmul.mubr.msk.f32.vlgmr.msra.gmra.mxu1 %vm2127_vm3, %v7324_v15  ;;  %v8165_v15 = vld [vmem:[%s11186_s5 + $0x68] sm:$0xff] }
 0xe3b   :  { %v9869_v16 = vpop.f32.mrf.mxu1  ;;  %9916 = vmatpush3.msra.mxu1 %v8061_v11  ;;  %v8297_v11 = vld [vmem:[%s8524_s25 + $0x8] sm:$0xff] }
 0xe3c   :  { %9917 = vmatprep.subr.mxu1 %v8060_v12  ;;  %v8164_v16 = vld [vmem:[%s11186_s5 + $0x60] sm:$0xff] }
 0xe3d   :  { %9918 = vmatpush3.msra.mxu1 %v8060_v12  ;;  %v8296_v12 = vld [vmem:[%s8524_s25] sm:$0xff] }
 0xe3e   :  { %9919 = vmatprep.subr.mxu1 %v8059_v43 }
 0xe3f   :  { %9920 = vmatpush3.msra.mxu1 %v8059_v43 }
 0xe40   :  { %9921 = vmatprep.subr.mxu1 %v8058_v13 }
 0xe41   :  { %9922 = vmatpush3.msra.mxu1 %v8058_v13 }
 0xe46   :  { %v6959_v19 = vpop.f32.mrf.mxu0 }
 0xe47   :  { %9883 = vmatmul.mubr.msk.f32.vlgmr.msra.gmra.mxu0 %vm2127_vm3, %v6959_v19  ;;  %v8162_v19 = vld [vmem:[%s11186_s5 + $0x50] sm:$0xff] }
 0xe48   :  { %v9844_v20 = vpop.f32.mrf.mxu0  ;;  %9891 = vmatpush3.msra.mxu0 %v7404_v17  ;;  %9892 = vmatprep.mubr.msk.f32.mxu0 %vm10114_vm2, %v10113_v21 }
 0xe49   :  { %9900 = vmatprep.subr.mxu0 %v10113_v21  ;;  %v8161_v20 = vld [vmem:[%s11186_s5 + $0x48] sm:$0xff] }
 0xe50   :  { %v7105_v22 = vpop.f32.mrf.mxu0 }
 0xe51   :  { %9893 = vmatmul.mubr.msk.f32.vlgmr.msra.gmra.mxu0 %vm2127_vm3, %v7105_v22  ;;  %v8160_v22 = vld [vmem:[%s11186_s5 + $0x40] sm:$0xff] }
 0xe52   :  { %v9854_v23 = vpop.f32.mrf.mxu0  ;;  %9901 = vmatpush3.msra.mxu0 %v7402_v46  ;;  %9902 = vmatprep.mubr.msk.f32.mxu0 %vm10114_vm2, %v10113_v21 }
 0xe53   :  { %9910 = vmatprep.subr.mxu0 %v10113_v21  ;;  %v8159_v23 = vld [vmem:[%s11186_s5 + $0x38] sm:$0xff] }
 0xe5a   :  { %v7251_v24 = vpop.f32.mrf.mxu0 }
 0xe5b   :  { %9903 = vmatmul.mubr.msk.f32.vlgmr.msra.gmra.mxu0 %vm2127_vm3, %v7251_v24  ;;  %v8158_v24 = vld [vmem:[%s11186_s5 + $0x30] sm:$0xff] }
 0xe5c   :  { %v9864_v25 = vpop.f32.mrf.mxu0  ;;  %9911 = vmatpush3.msra.mxu0 %v7404_v17  ;;  %9912 = vmatprep.mubr.msk.f32.mxu0 %vm10114_vm2, %v10113_v21  ;;  %v8163_v17 = vld [vmem:[%s11186_s5 + $0x58] sm:$0xff] }
 0xe5d   :  { %9926 = vmatprep.subr.mxu0 %v8167_v53  ;;  %v8157_v25 = vld [vmem:[%s11186_s5 + $0x28] sm:$0xff] }
 0xe63   :  { %v7397_v26 = vpop.f32.mrf.mxu0 }
 0xe64   :  { %9913 = vmatmul.mubr.msk.f32.vlgmr.msra.gmra.mxu0 %vm2127_vm3, %v7397_v26  ;;  %v8156_v26 = vld [vmem:[%s11186_s5 + $0x20] sm:$0xff] }
 0xe65   :  { %v9874_v27 = vpop.f32.mrf.mxu0  ;;  %9927 = vmatpush3.msra.mxu0 %v8167_v53 }
 0xe66   :  { %9928 = vmatprep.subr.mxu0 %v8166_v14 }
 0xe67   :  { %9929 = vmatpush3.msra.mxu0 %v8166_v14 }
 0xe68   :  { %9930 = vmatprep.subr.mxu0 %v8165_v15 }
 0xe69   :  { %9931 = vmatpush3.msra.mxu0 %v8165_v15 }
 0xe6a   :  { %9932 = vmatprep.subr.mxu0 %v8164_v16 }
 0xe6b   :  { %9933 = vmatpush3.msra.mxu0 %v8164_v16 }
 0xe6c   :  { %9934 = vmatprep.subr.mxu0 %v8163_v17 }
 0xe6d   :  { %9935 = vmatpush3.msra.mxu0 %v8163_v17 }
 0xe6e   :  { %9936 = vmatprep.subr.mxu0 %v8162_v19 }
 0xe6f   :  { %9937 = vmatpush3.msra.mxu0 %v8162_v19 }
 0xe70   :  { %9938 = vmatprep.subr.mxu0 %v8161_v20 }
 0xe71   :  { %9939 = vmatpush3.msra.mxu0 %v8161_v20  ;;  %v8686_v20 = vld [vmem:[%s8522_s29] ss:$0 sm:$0xff] }
 0xe72   :  { %9940 = vmatprep.subr.mxu0 %v8160_v22 }
 0xe73   :  { %9941 = vmatpush3.msra.mxu0 %v8160_v22 }
 0xe74   :  { %9942 = vmatprep.subr.mxu0 %v8159_v23 }
 0xe75   :  { %9943 = vmatpush3.msra.mxu0 %v8159_v23 }
 0xe76   :  { %9944 = vmatprep.subr.mxu0 %v8158_v24 }
 0xe77   :  { %9945 = vmatpush3.msra.mxu0 %v8158_v24 }
 0xe78   :  { %9946 = vmatprep.subr.mxu0 %v8157_v25 }
 0xe79   :  { %9947 = vmatpush3.msra.mxu0 %v8157_v25 }
 0xe7a   :  { %9948 = vmatprep.subr.mxu0 %v8156_v26 }
 0xe7b   :  { %9949 = vmatpush3.msra.mxu0 %v8156_v26  ;;  %v8687_v26 = vld [vmem:[%s8523_s3] ss:$0 sm:$0xff] }
 0xedc   :  { %v7474_v28 = vpop.f32.mrf.mxu1 }
 0xedd   :  { %v7989_v21 = vsel %vm263_vm1, %v7474_v28, 0.0 }
 0xede   :  { %v9879_v29 = vpop.f32.mrf.mxu1 }
 0xee6   :  { %v7620_v32 = vpop.f32.mrf.mxu1 }
 0xee7   :  { %v7992_v52 = vsel %vm263_vm1, %v7620_v32, 0.0 }
 0xee8   :  { %v9889_v35 = vpop.f32.mrf.mxu1 }
 0xee9   :  { %v8680_v35 = vld [vmem:[%s8520_s9] ss:$0 sm:$0xff] }
 0xef0   :  { %v7766_v38 = vpop.f32.mrf.mxu1 }
 0xef1   :  { %v7996_v7 = vsel %vm263_vm1, %v7766_v38, 0.0 }
 0xef2   :  { %v9899_v42 = vpop.f32.mrf.mxu1 }
 0xefa   :  { %v7912_v45 = vpop.f32.mrf.mxu1 }
 0xefb   :  { %v7999_v3 = vsel %vm263_vm1, %v7912_v45, 0.0 }
 0xefc   :  { %v9909_v47 = vpop.f32.mrf.mxu1 }
 0xefd   :  { %v8681_v47 = vld [vmem:[%s8521_s13] ss:$0 sm:$0xff] }
 0xf07   :  { %v7547_v48 = vpop.f32.mrf.mxu0 }
 0xf08   :  { %v7990_v50 = vsel %vm263_vm1, %v7547_v48, 0.0 }
 0xf09   :  { %v9884_v49 = vpop.f32.mrf.mxu0  ;;  %v7991_v51 = vadd.f32 %v7990_v50, %v7989_v21 }
 0xf0b   :  { %v7993_v55 = vadd.f32 %v7992_v52, %v7991_v51 }
 0xf11   :  { %v7693_v54 = vpop.f32.mrf.mxu0 }
 0xf12   :  { %v7994_v56 = vsel %vm263_vm1, %v7693_v54, 0.0 }
 0xf13   :  { %v7995_v58 = vadd.f32 %v7994_v56, %v7993_v55  ;;  %v9894_v59 = vpop.f32.mrf.mxu0  ;;  %v8155_v55 = vld [vmem:[%s11186_s5 + $0x18] sm:$0xff]  ;;  %v8154_v56 = vld [vmem:[%s11186_s5 + $0x10] sm:$0xff] }
 0xf14   :  { %9950 = vmatprep.subr.mxu0 %v8155_v55  ;;  %v8682_v59 = vld [vmem:[%s8517_s17] ss:$0 sm:$0xff] }
 0xf15   :  { %v8010_v60 = vadd.f32 %v8679_v57, %v7995_v58  ;;  %9951 = vmatpush3.msra.mxu0 %v8155_v55  ;;  %v8152_v58 = vld [vmem:[%s11186_s5] sm:$0xff] }
 0xf16   :  { %9952 = vmatprep.subr.mxu0 %v8154_v56 }
 0xf17   :  { %v8012_v61 = vadd.f32 %v8010_v60, %v10737_v39  ;;  %9953 = vmatpush3.msra.mxu0 %v8154_v56 }
 0xf19   :  { %v8014_v62 = vsel %vm263_vm1, %v8012_v61, 0.0 }
 0xf1a   :  { %8015 = vadd.xlane.f32.xlu0 %v8014_v62 }
 0xf1b   :  { %v7839_v63 = vpop.f32.mrf.mxu0 }
 0xf1c   :  { %v7997_v0 = vsel %vm263_vm1, %v7839_v63, 0.0 }
 0xf1d   :  { %v9904_v1 = vpop.f32.mrf.mxu0  ;;  %v7998_v2 = vadd.f32 %v7997_v0, %v7996_v7  ;;  %v8685_v7 = vld [vmem:[%s8519_s21] ss:$0 sm:$0xff] }
 0xf1f   :  { %v8000_v4 = vadd.f32 %v7999_v3, %v7998_v2 }
 0xf24   :  { %v7985_v44 = vpop.f32.mrf.mxu0 }
 0xf25   :  { %v8001_v5 = vsel %vm263_vm1, %v7985_v44, 0.0 }
 0xf26   :  { %v8002_v31 = vadd.f32 %v8001_v5, %v8000_v4  ;;  %v9914_v30 = vpop.f32.mrf.mxu0 }
 0xf28   :  { %v8011_v18 = vadd.f32 %v8679_v57, %v8002_v31  ;;  %v8153_v57 = vld [vmem:[%s11186_s5 + $0x8] sm:$0xff] }
 0xf29   :  { %9954 = vmatprep.subr.mxu0 %v8153_v57 }
 0xf2a   :  { %v8013_v39 = vadd.f32 %v8011_v18, %v10729_v34  ;;  %9955 = vmatpush3.msra.mxu0 %v8153_v57 }
 0xf2b   :  { %9956 = vmatprep.subr.mxu0 %v8152_v58 }
 0xf2c   :  { %v8017_v41 = vsel %vm263_vm1, %v8013_v39, 0.0  ;;  %9957 = vmatpush3.msra.mxu0 %v8152_v58 }
 0xf2d   :  { %8018 = vadd.xlane.f32.xlu1 %v8017_v41 }
 0xfa3   :  { %v8016_v6 = vpop.xlane.xlu0 %8015 }
 0xfa4   :  { %v8020_v8 = vmul.f32 0.03125, %v8016_v6 }
 0xfa6   :  { %v11170_v33 = vsub.f32 %v8012_v61, %v8020_v8 }
 0xfa8   :  { %v8024_v9 = vmul.f32 %v11170_v33, %v11170_v33 }
 0xfaa   :  { %v8026_v40 = vsel %vm263_vm1, %v8024_v9, 0.0 }
 0xfab   :  { %8027 = vadd.xlane.f32.xlu0 %v8026_v40 }
 0xfb6   :  { %v8019_v37 = vpop.xlane.xlu1 %8018 }
 0xfb7   :  { %v8021_v36 = vmul.f32 0.03125, %v8019_v37 }
 0xfb9   :  { %v11175_v46 = vsub.f32 %v8013_v39, %v8021_v36 }
 0xfbb   :  { %v8025_v34 = vmul.f32 %v11175_v46, %v11175_v46 }
 0xfbd   :  { %v8029_v10 = vsel %vm263_vm1, %v8025_v34, 0.0  ;;  %v8299_v34 = vld [vmem:[%s8524_s25 + $0x18] sm:$0xff] }
 0xfbe   :  { %8030 = vadd.xlane.f32.xlu1 %v8029_v10  ;;  %v8298_v10 = vld [vmem:[%s8524_s25 + $0x10] sm:$0xff]  ;;  %9961 = vmatprep.subr.mxu1 %v8299_v34 }
0x1034   :  { %v8028_v27 = vpop.xlane.xlu0 %8027 }
0x1035   :  { %v8032_v28 = vmul.f32 0.03125, %v8028_v27 }
0x1037   :  { %v8034_v29 = vadd.f32 1e-05, %v8032_v28 }
0x1039   :  { %10102 = vrsqrt.f32 %v8034_v29  ;;  %v8393_v29 = vld [vmem:[%s8526_s7 + $0x18] sm:$0xff] }
0x1046   :  { %v10103_v32 = vpop.eup %10102 }
0x1047   :  { %v8031_v38 = vpop.xlane.xlu1 %8030  ;;  %v8038_v42 = vmul.f32 %v10103_v32, %v11170_v33  ;;  %v8392_v32 = vld [vmem:[%s8526_s7 + $0x10] sm:$0xff] }
0x1048   :  { %v8033_v45 = vmul.f32 0.03125, %v8031_v38  ;;  %v8390_v38 = vld [vmem:[%s8526_s7] sm:$0xff] }
0x1049   :  { %v8047_v48 = vmul.f32 %v8680_v35, %v8038_v42  ;;  %v8688_v42 = vld [vmem:[%s8525_s11] ss:$0 sm:$0xff] }
0x104a   :  { %v8035_v49 = vadd.f32 1e-05, %v8033_v45 }
0x104b   :  { %v8056_v50 = vadd.f32 %v8681_v47, %v8047_v48 }
0x104c   :  { %10104 = vrsqrt.f32 %v8035_v49 }
0x104d   :  { %9923 = vmatprep.mubr.msk.f32.mxu1 %vm263_vm1, %v8056_v50 }
0x1059   :  { %v10105_v21 = vpop.eup %10104 }
0x105a   :  { %v8039_v51 = vmul.f32 %v10105_v21, %v11175_v46 }
0x105c   :  { %v8048_v52 = vmul.f32 %v8680_v35, %v8039_v51  ;;  %v8391_v35 = vld [vmem:[%s8526_s7 + $0x8] sm:$0xff]  ;;  %v8691_v51 = vld [vmem:[%s8527_s15] ss:$0 sm:$0xff] }
0x105e   :  { %v8057_v54 = vadd.f32 %v8681_v47, %v8048_v52 }
0x1060   :  { %9924 = vmatmul.mubr.msk.f32.vlgmr.msra.gmra.mxu1 %vm263_vm1, %v8057_v54 }
0x1061   :  { %9962 = vmatpush3.msra.mxu1 %v8299_v34 }
0x1062   :  { %9963 = vmatprep.subr.mxu1 %v8298_v10 }
0x1063   :  { %9964 = vmatpush3.msra.mxu1 %v8298_v10 }
0x1064   :  { %9965 = vmatprep.subr.mxu1 %v8297_v11 }
0x1065   :  { %9966 = vmatpush3.msra.mxu1 %v8297_v11 }
0x1066   :  { %9967 = vmatprep.subr.mxu1 %v8296_v12 }
0x1067   :  { %9968 = vmatpush3.msra.mxu1 %v8296_v12 }
0x1068   :  { %9972 = vmatprep.subr.mxu1 %v8393_v29 }
0x1120   :  { %v9925_v60 = vpop.f32.mrf.mxu1 }
0x1121   :  { %v8147_v61 = vadd.f32 %v9925_v60, %v8682_v59 }
0x1122   :  { %v8141_v62 = vpop.f32.mrf.mxu1 }
0x1123   :  { %v8142_v63 = vadd.f32 %v8682_v59, %v8141_v62  ;;  %v8151_v1 = vmax.f32 %v8147_v61, 0.0 }
0x1125   :  { %v8150_v0 = vmax.f32 %v8142_v63, 0.0 }
0x1127   :  { %9958 = vmatprep.mubr.f32.mxu0 %v8150_v0 }
0x1128   :  { %9959 = vmatmul.mubr.f32.vlgmr.msra.gmra.mxu0 %v8151_v1 }
0x11e8   :  { %v9960_v2 = vpop.f32.mrf.mxu0 }
0x11e9   :  { %v8247_v3 = vadd.f32 %v9960_v2, %v8685_v7 }
0x11ea   :  { %v8241_v44 = vpop.f32.mrf.mxu0 }
0x11eb   :  { %v8242_v4 = vadd.f32 %v8685_v7, %v8241_v44  ;;  %v8251_v5 = vadd.f32 %v8247_v3, %v8057_v54 }
0x11ed   :  { %v8255_v31 = vsel %vm263_vm1, %v8251_v5, 0.0  ;;  %v8250_v30 = vadd.f32 %v8242_v4, %v8056_v50 }
0x11ee   :  { %8256 = vadd.xlane.f32.xlu1 %v8255_v31 }
0x11ef   :  { %v8252_v18 = vsel %vm263_vm1, %v8250_v30, 0.0 }
0x11f0   :  { %8253 = vadd.xlane.f32.xlu0 %v8252_v18 }
0x1277   :  { %v8257_v39 = vpop.xlane.xlu1 %8256 }
0x1278   :  { %v8259_v41 = vmul.f32 0.03125, %v8257_v39 }
0x1279   :  { %v8254_v6 = vpop.xlane.xlu0 %8253 }
0x127a   :  { %v8261_v8 = vsub.f32 %v8251_v5, %v8259_v41  ;;  %v8258_v33 = vmul.f32 0.03125, %v8254_v6 }
0x127c   :  { %v8260_v9 = vsub.f32 %v8250_v30, %v8258_v33  ;;  %v8263_v40 = vmul.f32 %v8261_v8, %v8261_v8 }
0x127e   :  { %v8267_v37 = vsel %vm263_vm1, %v8263_v40, 0.0  ;;  %v8262_v36 = vmul.f32 %v8260_v9, %v8260_v9 }
0x127f   :  { %8268 = vadd.xlane.f32.xlu1 %v8267_v37 }
0x1280   :  { %v8264_v46 = vsel %vm263_vm1, %v8262_v36, 0.0 }
0x1281   :  { %8265 = vadd.xlane.f32.xlu0 %v8264_v46 }
0x1308   :  { %v8269_v43 = vpop.xlane.xlu1 %8268 }
0x1309   :  { %v8271_v13 = vmul.f32 0.03125, %v8269_v43 }
0x130a   :  { %v8266_v53 = vpop.xlane.xlu0 %8265 }
0x130b   :  { %v8273_v14 = vadd.f32 1e-05, %v8271_v13  ;;  %v8270_v15 = vmul.f32 0.03125, %v8266_v53 }
0x130d   :  { %10106 = vrsqrt.f32 %v8273_v14  ;;  %v8272_v16 = vadd.f32 1e-05, %v8270_v15 }
0x130f   :  { %10108 = vrsqrt.f32 %v8272_v16 }
0x131a   :  { %v10107_v17 = vpop.eup %10106 }
0x131b   :  { %v8277_v19 = vmul.f32 %v10107_v17, %v8261_v8 }
0x131c   :  { %v10109_v22 = vpop.eup %10108 }
0x131d   :  { %v8276_v23 = vmul.f32 %v10109_v22, %v8260_v9  ;;  %v8286_v24 = vmul.f32 %v8686_v20, %v8277_v19 }
0x131f   :  { %v8285_v25 = vmul.f32 %v8686_v20, %v8276_v23  ;;  %v8295_v28 = vadd.f32 %v8687_v26, %v8286_v24 }
0x1321   :  { %v8294_v27 = vadd.f32 %v8687_v26, %v8285_v25 }
0x1323   :  { %9969 = vmatprep.mubr.msk.f32.mxu1 %vm263_vm1, %v8294_v27 }
0x1324   :  { %9970 = vmatmul.mubr.msk.f32.vlgmr.msra.gmra.mxu1 %vm263_vm1, %v8295_v28 }
0x1325   :  { %9973 = vmatpush3.msra.mxu1 %v8393_v29 }
0x1326   :  { %9974 = vmatprep.subr.mxu1 %v8392_v32 }
0x1327   :  { %9975 = vmatpush3.msra.mxu1 %v8392_v32 }
0x1328   :  { %9976 = vmatprep.subr.mxu1 %v8391_v35 }
0x1329   :  { %9977 = vmatpush3.msra.mxu1 %v8391_v35 }
0x132a   :  { %9978 = vmatprep.subr.mxu1 %v8390_v38 }
0x132b   :  { %9979 = vmatpush3.msra.mxu1 %v8390_v38 }
0x13e4   :  { %v9971_v45 = vpop.f32.mrf.mxu1 }
0x13e5   :  { %v8385_v47 = vadd.f32 %v9971_v45, %v8688_v42 }
0x13e6   :  { %v8379_v48 = vpop.f32.mrf.mxu1 }
0x13e7   :  { %v8380_v49 = vadd.f32 %v8688_v42, %v8379_v48  ;;  %v8389_v21 = vmax.f32 %v8385_v47, 0.0 }
0x13e9   :  { %v8388_v50 = vmax.f32 %v8380_v49, 0.0 }
0x13eb   :  { %9980 = vmatprep.mubr.msk.f32.mxu1 %vm263_vm1, %v8388_v50 }
0x13ec   :  { %9981 = vmatmul.mubr.msk.f32.vlgmr.msra.gmra.mxu1 %vm263_vm1, %v8389_v21 }
0x14ac   :  { %v9982_v52 = vpop.f32.mrf.mxu1 }
0x14ad   :  { %v8479_v54 = vadd.f32 %v9982_v52, %v8691_v51 }
0x14ae   :  { %v8473_v55 = vpop.f32.mrf.mxu1 }
0x14af   :  { %8483 = vst.msk [vmem:[%s8528_s19 + $0x8] sm:$0xff] %vm181_vm0, %v8479_v54  ;;  %v8474_v56 = vadd.f32 %v8691_v51, %v8473_v55 }
0x14b1   :  { %8482 = vst.msk [vmem:[%s8528_s19] sm:$0xff] %vm181_vm0, %v8474_v56 }

</bundles_post_ra>
